<compile_context>
chip_gen: v5e
topology: v5e:2x2
jax: 0.10.0
libtpu: 0.0.40
codegen_flags: <defaults>
</compile_context>

<pallas_src>
import functools

import jax
import jax.numpy as jnp
from jax import lax
from jax.experimental import pallas as pl
from jax.experimental.pallas import tpu as pltpu


def _round_up(x, m):
    return (x + m - 1) // m * m


def _lstm_decoder_kernel(x_ref, h0_ref, c0_ref, wih_ref, whh_ref, b_ref,
                         wout_hbm, bout_ref,
                         out_ref, hout_ref, cout_ref,
                         gx_sc, hseq_sc, wout_sc, wout_sem,
                         *, seq_len, batch, hidden_pad):
    T, B, Hp = seq_len, batch, hidden_pad

    # ---- 0) Start the W_out HBM->VMEM DMA now; it overlaps the hoisted input
    #         projection and the whole T-step recurrence, and is only waited
    #         on right before the vocab projection.
    wout_cp = pltpu.make_async_copy(wout_hbm, wout_sc, wout_sem)
    wout_cp.start()

    # ---- 1) Hoisted input projection over all time steps: ONE (T*B, Ep) bf16
    #         matmul with f32 accumulation, + fused (b_ih + b_hh) bias.
    gx_sc[...] = (jnp.dot(x_ref[...], wih_ref[...],
                          preferred_element_type=jnp.float32) + b_ref[...])

    # ---- 2) Serial LSTM recurrence.  Only h_prev @ W_hh is on the serial
    #         path; h/c are carried in vregs (loop carry) and h is cast to
    #         bf16 exactly once per step.
    h0 = h0_ref[...]
    carry0 = (h0, c0_ref[...], h0.astype(jnp.bfloat16))

    def step(t, carry):
        _, c_prev, h_bf16 = carry
        row = pl.multiple_of(t * B, B)
        # W_hh is streamed from VMEM as the matmul operand each step (avoids
        # pinning ~32 vregs across the unrolled loop).  Holding it
        # weight-stationary in the MXU (pltpu.matmul_push_rhs/acc_lhs/pop)
        # is a possible further win but is chip-specific; kept portable here.
        gates = gx_sc[pl.ds(row, B), :] + jnp.dot(
            h_bf16, whh_ref[...], preferred_element_type=jnp.float32)
        # PyTorch gate order: i, f, g, o -- each an aligned Hp-wide column block.
        i_g = jax.nn.sigmoid(gates[:, 0 * Hp:1 * Hp])
        f_g = jax.nn.sigmoid(gates[:, 1 * Hp:2 * Hp])
        g_g = jnp.tanh(gates[:, 2 * Hp:3 * Hp])
        o_g = jax.nn.sigmoid(gates[:, 3 * Hp:4 * Hp])
        c_new = f_g * c_prev + i_g * g_g
        h_new = o_g * jnp.tanh(c_new)
        h_new_bf16 = h_new.astype(jnp.bfloat16)
        hseq_sc[pl.ds(row, B), :] = h_new_bf16            # off the serial chain
        return (h_new, c_new, h_new_bf16)

    h_f, c_f, _ = lax.fori_loop(0, T, step, carry0, unroll=True)

    # ---- 3) Deferred vocab projection: ONE (T*B, Hp) @ (Hp, Vp) matmul.
    #         Wait for the W_out DMA only now.
    wout_cp.wait()
    logits = jnp.dot(hseq_sc[...], wout_sc[...],
                     preferred_element_type=jnp.float32)
    out_ref[...] = (logits + bout_ref[...]).astype(out_ref.dtype)

    # ---- 4) Final hidden/cell, written exactly once.
    hout_ref[...] = h_f
    cout_ref[...] = c_f


def lstm_decoder_forward(embedded, h0, c0, w_ih, w_hh, b_ih, b_hh, w_out, b_out):
    """embedded: (T,B,E) f32; h0/c0: (B,H); PyTorch-layout weights:
       w_ih (4H,E), w_hh (4H,H), b_ih/b_hh (4H,), w_out (V,H), b_out (V,).
       Returns logits (T,B,V), final hidden (B,H), final cell (B,H)."""
    T, B, E = embedded.shape
    H = h0.shape[-1]
    V = w_out.shape[0]

    LANE = 128
    Ep, Hp, Vp = _round_up(E, LANE), _round_up(H, LANE), _round_up(V, LANE)

    # Activations padded along feature dims; input pre-cast to bf16 (halves the
    # DMA, numerics unchanged: operands were already bf16 on the MXU).
    # Padded lanes stay inert: zero weight rows/cols + zero initial state.
    x_p = (jnp.zeros((T * B, Ep), jnp.bfloat16)
           .at[:, :E].set(embedded.reshape(T * B, E).astype(jnp.bfloat16)))
    h0_p = jnp.zeros((B, Hp), jnp.float32).at[:, :H].set(h0)
    c0_p = jnp.zeros((B, Hp), jnp.float32).at[:, :H].set(c0)

    # Per-gate zero padding so gate k occupies columns [k*Hp, (k+1)*Hp).
    def pack_gate_weight(w, in_dim, in_pad):
        w4 = w.reshape(4, H, in_dim)
        wp = jnp.zeros((4, Hp, in_pad), jnp.float32).at[:, :H, :in_dim].set(w4)
        return jnp.transpose(wp, (2, 0, 1)).reshape(in_pad, 4 * Hp).astype(jnp.bfloat16)

    wih_p = pack_gate_weight(w_ih, E, Ep)                             # (Ep, 4Hp) bf16
    whh_p = pack_gate_weight(w_hh, H, Hp)                             # (Hp, 4Hp) bf16
    b4 = (b_ih + b_hh).reshape(4, H)
    b_p = jnp.zeros((4, Hp), jnp.float32).at[:, :H].set(b4).reshape(1, 4 * Hp)
    wout_p = (jnp.zeros((Hp, Vp), jnp.float32).at[:H, :V].set(w_out.T)
              .astype(jnp.bfloat16))                                  # (Hp, Vp) bf16
    bout_p = jnp.zeros((1, Vp), jnp.float32).at[:, :V].set(b_out[None, :])

    kernel = functools.partial(_lstm_decoder_kernel,
                               seq_len=T, batch=B, hidden_pad=Hp)

    grid_spec = pltpu.PrefetchScalarGridSpec(
        num_scalar_prefetch=0,
        grid=(1,),
        in_specs=[
            pl.BlockSpec((T * B, Ep), lambda i: (0, 0)),              # embedded bf16
            pl.BlockSpec((B, Hp), lambda i: (0, 0)),                  # h0
            pl.BlockSpec((B, Hp), lambda i: (0, 0)),                  # c0
            pl.BlockSpec((Ep, 4 * Hp), lambda i: (0, 0)),             # W_ih^T bf16
            pl.BlockSpec((Hp, 4 * Hp), lambda i: (0, 0)),             # W_hh^T bf16
            pl.BlockSpec((1, 4 * Hp), lambda i: (0, 0)),              # b_ih + b_hh
            pl.BlockSpec(memory_space=pl.ANY),                        # W_out^T in HBM
            pl.BlockSpec((1, Vp), lambda i: (0, 0)),                  # b_out
        ],
        out_specs=(
            pl.BlockSpec((T * B, Vp), lambda i: (0, 0)),              # logits (flat)
            pl.BlockSpec((B, Hp), lambda i: (0, 0)),                  # final hidden
            pl.BlockSpec((B, Hp), lambda i: (0, 0)),                  # final cell
        ),
        scratch_shapes=[
            pltpu.VMEM((T * B, 4 * Hp), jnp.float32),                 # precomputed x-gates
            pltpu.VMEM((T * B, Hp), jnp.bfloat16),                    # h_t history (bf16)
            pltpu.VMEM((Hp, Vp), jnp.bfloat16),                       # W_out landing buffer
            pltpu.SemaphoreType.DMA,                                  # W_out DMA sem
        ],
    )

    out_shapes = (
        jax.ShapeDtypeStruct((T * B, Vp), jnp.float32),
        jax.ShapeDtypeStruct((B, Hp), jnp.float32),
        jax.ShapeDtypeStruct((B, Hp), jnp.float32),
    )

    logits_p, h_p, c_p = pl.pallas_call(
        kernel,
        out_shape=out_shapes,
        grid_spec=grid_spec,
        compiler_params=pltpu.CompilerParams(
            dimension_semantics=("arbitrary",),                       # single step
            vmem_limit_bytes=32 * 1024 * 1024,
        ),
    )(x_p, h0_p, c0_p, wih_p, whh_p, b_p, wout_p, bout_p)

    logits = logits_p[:, :V].reshape(T, B, V)
    return logits, h_p[:, :H], c_p[:, :H]


def reference_forward(embedded, h0, c0, w_ih, w_hh, b_ih, b_hh, w_out, b_out):
    """Pure-JAX f32 reference of the same PyTorch semantics."""
    H = h0.shape[-1]
    w_ih_t, w_hh_t, w_out_t = w_ih.T, w_hh.T, w_out.T
    b_sum = b_ih + b_hh

    def step(carry, x_t):
        h, c = carry
        gates = x_t @ w_ih_t + h @ w_hh_t + b_sum
        i = jax.nn.sigmoid(gates[:, 0 * H:1 * H])
        f = jax.nn.sigmoid(gates[:, 1 * H:2 * H])
        g = jnp.tanh(gates[:, 2 * H:3 * H])
        o = jax.nn.sigmoid(gates[:, 3 * H:4 * H])
        c_new = f * c + i * g
        h_new = o * jnp.tanh(c_new)
        return (h_new, c_new), h_new @ w_out_t + b_out

    (h_f, c_f), logits = jax.lax.scan(step, (h0, c0), embedded)
    return logits, h_f, c_f


if __name__ == "__main__":
    # Small deterministic problem consistent with the module:
    #   nn.LSTM(100, 100), nn.Linear(100, vocab_size)
    T, B = 8, 8           # seq length, batch
    E = 100               # embedding dim (= LSTM input size, hardcoded 100)
    H = 100               # hidden size (hardcoded 100)
    V = 256               # tokenizer.vocab_size (synthetic)

    key = jax.random.PRNGKey(0)
    k_emb, k_tok, k_wih, k_whh, k_bih, k_bhh, k_wo, k_bo = jax.random.split(key, 8)

    scale = 1.0 / jnp.sqrt(jnp.float32(H))
    emb_table = jax.random.normal(k_emb, (V, E), jnp.float32) * 0.1      # self.enc.emb
    w_ih = jax.random.uniform(k_wih, (4 * H, E), jnp.float32, -scale, scale)
    w_hh = jax.random.uniform(k_whh, (4 * H, H), jnp.float32, -scale, scale)
    b_ih = jax.random.uniform(k_bih, (4 * H,), jnp.float32, -scale, scale)
    b_hh = jax.random.uniform(k_bhh, (4 * H,), jnp.float32, -scale, scale)
    w_out = jax.random.uniform(k_wo, (V, H), jnp.float32, -scale, scale)  # self.out
    b_out = jax.random.uniform(k_bo, (V,), jnp.float32, -scale, scale)

    tokens = jax.random.randint(k_tok, (T, B), 0, V, jnp.int32)           # input (T,B)

    # TODO(synk): embedding lookup (self.enc.emb) is plain-JAX gather glue; the
    # LSTM recurrence + output projection are the Pallas kernel.
    embedded = jnp.take(emb_table, tokens, axis=0)                        # (T,B,E)
    hidden0 = jnp.zeros((1, B, H), jnp.float32)                           # init_states
    cell0 = jnp.zeros((1, B, H), jnp.float32)

    logits, h_f, c_f = lstm_decoder_forward(
        embedded, hidden0[0], cell0[0], w_ih, w_hh, b_ih, b_hh, w_out, b_out)
    jax.block_until_ready((logits, h_f, c_f))

    # Correctness check against the f32 pure-JAX reference (tolerance relaxed
    # because matmul operands run through bf16 on the MXU).
    ref_logits, ref_h, ref_c = reference_forward(
        embedded, hidden0[0], cell0[0], w_ih, w_hh, b_ih, b_hh, w_out, b_out)
    assert jnp.allclose(logits, ref_logits, atol=2e-2, rtol=2e-2)
    assert jnp.allclose(h_f, ref_h, atol=2e-2, rtol=2e-2)
    assert jnp.allclose(c_f, ref_c, atol=2e-2, rtol=2e-2)

    # Final module outputs: (out, (hidden, cell)) with PyTorch shapes.
    out = logits                          # (T, B, V)
    hidden = h_f[None]                    # (1, B, H)
    cell = c_f[None]                      # (1, B, H)
    jax.block_until_ready((out, hidden, cell))

    print("KERNEL_OK")
</pallas_src>

<mosaic_0001>
module attributes {stable_mosaic.version = 11 : i64} {
  func.func @_lstm_decoder_kernel(%arg0: i32, %arg1: memref<64x128xbf16, #tpu.memory_space<vmem>>, %arg2: memref<8x128xf32, #tpu.memory_space<vmem>>, %arg3: memref<8x128xf32, #tpu.memory_space<vmem>>, %arg4: memref<128x512xbf16, #tpu.memory_space<vmem>>, %arg5: memref<128x512xbf16, #tpu.memory_space<vmem>>, %arg6: memref<1x512xf32, #tpu.memory_space<vmem>>, %arg7: memref<128x256xbf16, #tpu.memory_space<any>>, %arg8: memref<1x256xf32, #tpu.memory_space<vmem>>, %arg9: memref<64x256xf32, #tpu.memory_space<vmem>>, %arg10: memref<8x128xf32, #tpu.memory_space<vmem>>, %arg11: memref<8x128xf32, #tpu.memory_space<vmem>>, %arg12: memref<64x512xf32, #tpu.memory_space<vmem>>, %arg13: memref<64x128xbf16, #tpu.memory_space<vmem>>, %arg14: memref<128x256xbf16, #tpu.memory_space<vmem>>, %arg15: memref<!tpu.dma_semaphore, #tpu.memory_space<semaphore_mem>>) attributes {dimension_semantics = [#tpu.dimension_semantics<arbitrary>], iteration_bounds = array<i64: 1>, scalar_prefetch = 0 : i64, scratch_operands = 4 : i64, tpu.core_type = #tpu.core_type<tc>, window_params = [{pipeline_mode = #tpu.pipeline_mode<synchronous>, transform_indices = @transform_0, window_bounds = array<i64: 64, 128>}, {pipeline_mode = #tpu.pipeline_mode<synchronous>, transform_indices = @transform_1, window_bounds = array<i64: 8, 128>}, {pipeline_mode = #tpu.pipeline_mode<synchronous>, transform_indices = @transform_2, window_bounds = array<i64: 8, 128>}, {pipeline_mode = #tpu.pipeline_mode<synchronous>, transform_indices = @transform_3, window_bounds = array<i64: 128, 512>}, {pipeline_mode = #tpu.pipeline_mode<synchronous>, transform_indices = @transform_4, window_bounds = array<i64: 128, 512>}, {pipeline_mode = #tpu.pipeline_mode<synchronous>, transform_indices = @transform_5, window_bounds = array<i64: 1, 512>}, {}, {pipeline_mode = #tpu.pipeline_mode<synchronous>, transform_indices = @transform_7, window_bounds = array<i64: 1, 256>}, {pipeline_mode = #tpu.pipeline_mode<synchronous>, transform_indices = @transform_8, window_bounds = array<i64: 64, 256>}, {pipeline_mode = #tpu.pipeline_mode<synchronous>, transform_indices = @transform_9, window_bounds = array<i64: 8, 128>}, {pipeline_mode = #tpu.pipeline_mode<synchronous>, transform_indices = @transform_10, window_bounds = array<i64: 8, 128>}]} {
    tpu.enqueue_dma source(%arg7 : memref<128x256xbf16, #tpu.memory_space<any>>) target(%arg14 : memref<128x256xbf16, #tpu.memory_space<vmem>>) target_semaphore(%arg15 : memref<!tpu.dma_semaphore, #tpu.memory_space<semaphore_mem>>)
    %c0 = arith.constant 0 : index
    %c0_0 = arith.constant 0 : index
    %0 = vector.load %arg1[%c0, %c0_0] : memref<64x128xbf16, #tpu.memory_space<vmem>>, vector<64x128xbf16>
    %c0_1 = arith.constant 0 : index
    %c0_2 = arith.constant 0 : index
    %1 = vector.load %arg4[%c0_1, %c0_2] : memref<128x512xbf16, #tpu.memory_space<vmem>>, vector<128x512xbf16>
    %cst = arith.constant dense<0.000000e+00> : vector<64x512xf32>
    %2 = tpu.matmul %0, %1, %cst {dimension_numbers = #tpu.dot_dimension_numbers<[1], [0], [0], [1], [0, 0, 1, 1], [], []>} : vector<64x128xbf16>, vector<128x512xbf16>, vector<64x512xf32> -> vector<64x512xf32>
    %c0_3 = arith.constant 0 : index
    %c0_4 = arith.constant 0 : index
    %3 = vector.load %arg6[%c0_3, %c0_4] : memref<1x512xf32, #tpu.memory_space<vmem>>, vector<1x512xf32>
    %4 = vector.broadcast %3 : vector<1x512xf32> to vector<64x512xf32>
    %5 = arith.addf %2, %4 : vector<64x512xf32>
    %c0_5 = arith.constant 0 : index
    %c0_6 = arith.constant 0 : index
    %6 = vector.load %arg12[%c0_5, %c0_6] : memref<64x512xf32, #tpu.memory_space<vmem>>, vector<64x512xf32>
    tpu.vector_store %arg12[%c0_5, %c0_6], %5 {strides = array<i32>} : memref<64x512xf32, #tpu.memory_space<vmem>>, vector<64x512xf32>,
    %c0_7 = arith.constant 0 : index
    %c0_8 = arith.constant 0 : index
    %7 = vector.load %arg2[%c0_7, %c0_8] : memref<8x128xf32, #tpu.memory_space<vmem>>, vector<8x128xf32>
    %c0_9 = arith.constant 0 : index
    %c0_10 = arith.constant 0 : index
    %8 = vector.load %arg3[%c0_9, %c0_10] : memref<8x128xf32, #tpu.memory_space<vmem>>, vector<8x128xf32>
    %9 = arith.truncf %7 : vector<8x128xf32> to vector<8x128xbf16>
    %c0_i32 = arith.constant 0 : i32
    %c8_i32 = arith.constant 8 : i32
    %10 = arith.muli %c0_i32, %c8_i32 : i32
    %11 = tpu.assume_multiple %10, 8 : i32
    %12 = arith.index_cast %11 : i32 to index
    %c0_11 = arith.constant 0 : index
    %13 = vector.load %arg12[%12, %c0_11] : memref<64x512xf32, #tpu.memory_space<vmem>>, vector<8x512xf32>
    %c0_12 = arith.constant 0 : index
    %c0_13 = arith.constant 0 : index
    %14 = vector.load %arg5[%c0_12, %c0_13] : memref<128x512xbf16, #tpu.memory_space<vmem>>, vector<128x512xbf16>
    %cst_14 = arith.constant dense<0.000000e+00> : vector<8x512xf32>
    %15 = tpu.matmul %9, %14, %cst_14 {dimension_numbers = #tpu.dot_dimension_numbers<[1], [0], [0], [1], [0, 0, 1, 1], [], []>} : vector<8x128xbf16>, vector<128x512xbf16>, vector<8x512xf32> -> vector<8x512xf32>
    %16 = arith.addf %13, %15 : vector<8x512xf32>
    %17 = vector.extract_strided_slice %16 {offsets = [0, 0], sizes = [8, 128], strides = [1, 1]} : vector<8x512xf32> to vector<8x128xf32>
    %18 = arith.negf %17 : vector<8x128xf32>
    %19 = math.exp %18 : vector<8x128xf32>
    %cst_15 = arith.constant 1.000000e+00 : f32
    %20 = vector.broadcast %cst_15 : f32 to vector<8x128xf32>
    %21 = arith.addf %20, %19 : vector<8x128xf32>
    %22 = arith.divf %20, %21 : vector<8x128xf32>
    %23 = vector.extract_strided_slice %16 {offsets = [0, 128], sizes = [8, 128], strides = [1, 1]} : vector<8x512xf32> to vector<8x128xf32>
    %24 = arith.negf %23 : vector<8x128xf32>
    %25 = math.exp %24 : vector<8x128xf32>
    %cst_16 = arith.constant 1.000000e+00 : f32
    %26 = vector.broadcast %cst_16 : f32 to vector<8x128xf32>
    %27 = arith.addf %26, %25 : vector<8x128xf32>
    %28 = arith.divf %26, %27 : vector<8x128xf32>
    %29 = vector.extract_strided_slice %16 {offsets = [0, 256], sizes = [8, 128], strides = [1, 1]} : vector<8x512xf32> to vector<8x128xf32>
    %30 = math.tanh %29 : vector<8x128xf32>
    %31 = vector.extract_strided_slice %16 {offsets = [0, 384], sizes = [8, 128], strides = [1, 1]} : vector<8x512xf32> to vector<8x128xf32>
    %32 = arith.negf %31 : vector<8x128xf32>
    %33 = math.exp %32 : vector<8x128xf32>
    %cst_17 = arith.constant 1.000000e+00 : f32
    %34 = vector.broadcast %cst_17 : f32 to vector<8x128xf32>
    %35 = arith.addf %34, %33 : vector<8x128xf32>
    %36 = arith.divf %34, %35 : vector<8x128xf32>
    %37 = arith.mulf %28, %8 : vector<8x128xf32>
    %38 = arith.mulf %22, %30 : vector<8x128xf32>
    %39 = arith.addf %37, %38 : vector<8x128xf32>
    %40 = math.tanh %39 : vector<8x128xf32>
    %41 = arith.mulf %36, %40 : vector<8x128xf32>
    %42 = arith.truncf %41 : vector<8x128xf32> to vector<8x128xbf16>
    %43 = arith.index_cast %11 : i32 to index
    %c0_18 = arith.constant 0 : index
    %44 = vector.load %arg13[%43, %c0_18] : memref<64x128xbf16, #tpu.memory_space<vmem>>, vector<8x128xbf16>
    tpu.vector_store %arg13[%43, %c0_18], %42 {strides = array<i32>} : memref<64x128xbf16, #tpu.memory_space<vmem>>, vector<8x128xbf16>,
    %c1_i32 = arith.constant 1 : i32
    %c8_i32_19 = arith.constant 8 : i32
    %45 = arith.muli %c1_i32, %c8_i32_19 : i32
    %46 = tpu.assume_multiple %45, 8 : i32
    %47 = arith.index_cast %46 : i32 to index
    %c0_20 = arith.constant 0 : index
    %48 = vector.load %arg12[%47, %c0_20] : memref<64x512xf32, #tpu.memory_space<vmem>>, vector<8x512xf32>
    %c0_21 = arith.constant 0 : index
    %c0_22 = arith.constant 0 : index
    %49 = vector.load %arg5[%c0_21, %c0_22] : memref<128x512xbf16, #tpu.memory_space<vmem>>, vector<128x512xbf16>
    %cst_23 = arith.constant dense<0.000000e+00> : vector<8x512xf32>
    %50 = tpu.matmul %42, %49, %cst_23 {dimension_numbers = #tpu.dot_dimension_numbers<[1], [0], [0], [1], [0, 0, 1, 1], [], []>} : vector<8x128xbf16>, vector<128x512xbf16>, vector<8x512xf32> -> vector<8x512xf32>
    %51 = arith.addf %48, %50 : vector<8x512xf32>
    %52 = vector.extract_strided_slice %51 {offsets = [0, 0], sizes = [8, 128], strides = [1, 1]} : vector<8x512xf32> to vector<8x128xf32>
    %53 = arith.negf %52 : vector<8x128xf32>
    %54 = math.exp %53 : vector<8x128xf32>
    %cst_24 = arith.constant 1.000000e+00 : f32
    %55 = vector.broadcast %cst_24 : f32 to vector<8x128xf32>
    %56 = arith.addf %55, %54 : vector<8x128xf32>
    %57 = arith.divf %55, %56 : vector<8x128xf32>
    %58 = vector.extract_strided_slice %51 {offsets = [0, 128], sizes = [8, 128], strides = [1, 1]} : vector<8x512xf32> to vector<8x128xf32>
    %59 = arith.negf %58 : vector<8x128xf32>
    %60 = math.exp %59 : vector<8x128xf32>
    %cst_25 = arith.constant 1.000000e+00 : f32
    %61 = vector.broadcast %cst_25 : f32 to vector<8x128xf32>
    %62 = arith.addf %61, %60 : vector<8x128xf32>
    %63 = arith.divf %61, %62 : vector<8x128xf32>
    %64 = vector.extract_strided_slice %51 {offsets = [0, 256], sizes = [8, 128], strides = [1, 1]} : vector<8x512xf32> to vector<8x128xf32>
    %65 = math.tanh %64 : vector<8x128xf32>
    %66 = vector.extract_strided_slice %51 {offsets = [0, 384], sizes = [8, 128], strides = [1, 1]} : vector<8x512xf32> to vector<8x128xf32>
    %67 = arith.negf %66 : vector<8x128xf32>
    %68 = math.exp %67 : vector<8x128xf32>
    %cst_26 = arith.constant 1.000000e+00 : f32
    %69 = vector.broadcast %cst_26 : f32 to vector<8x128xf32>
    %70 = arith.addf %69, %68 : vector<8x128xf32>
    %71 = arith.divf %69, %70 : vector<8x128xf32>
    %72 = arith.mulf %63, %39 : vector<8x128xf32>
    %73 = arith.mulf %57, %65 : vector<8x128xf32>
    %74 = arith.addf %72, %73 : vector<8x128xf32>
    %75 = math.tanh %74 : vector<8x128xf32>
    %76 = arith.mulf %71, %75 : vector<8x128xf32>
    %77 = arith.truncf %76 : vector<8x128xf32> to vector<8x128xbf16>
    %78 = arith.index_cast %46 : i32 to index
    %c0_27 = arith.constant 0 : index
    %79 = vector.load %arg13[%78, %c0_27] : memref<64x128xbf16, #tpu.memory_space<vmem>>, vector<8x128xbf16>
    tpu.vector_store %arg13[%78, %c0_27], %77 {strides = array<i32>} : memref<64x128xbf16, #tpu.memory_space<vmem>>, vector<8x128xbf16>,
    %c2_i32 = arith.constant 2 : i32
    %c8_i32_28 = arith.constant 8 : i32
    %80 = arith.muli %c2_i32, %c8_i32_28 : i32
    %81 = tpu.assume_multiple %80, 8 : i32
    %82 = arith.index_cast %81 : i32 to index
    %c0_29 = arith.constant 0 : index
    %83 = vector.load %arg12[%82, %c0_29] : memref<64x512xf32, #tpu.memory_space<vmem>>, vector<8x512xf32>
    %c0_30 = arith.constant 0 : index
    %c0_31 = arith.constant 0 : index
    %84 = vector.load %arg5[%c0_30, %c0_31] : memref<128x512xbf16, #tpu.memory_space<vmem>>, vector<128x512xbf16>
    %cst_32 = arith.constant dense<0.000000e+00> : vector<8x512xf32>
    %85 = tpu.matmul %77, %84, %cst_32 {dimension_numbers = #tpu.dot_dimension_numbers<[1], [0], [0], [1], [0, 0, 1, 1], [], []>} : vector<8x128xbf16>, vector<128x512xbf16>, vector<8x512xf32> -> vector<8x512xf32>
    %86 = arith.addf %83, %85 : vector<8x512xf32>
    %87 = vector.extract_strided_slice %86 {offsets = [0, 0], sizes = [8, 128], strides = [1, 1]} : vector<8x512xf32> to vector<8x128xf32>
    %88 = arith.negf %87 : vector<8x128xf32>
    %89 = math.exp %88 : vector<8x128xf32>
    %cst_33 = arith.constant 1.000000e+00 : f32
    %90 = vector.broadcast %cst_33 : f32 to vector<8x128xf32>
    %91 = arith.addf %90, %89 : vector<8x128xf32>
    %92 = arith.divf %90, %91 : vector<8x128xf32>
    %93 = vector.extract_strided_slice %86 {offsets = [0, 128], sizes = [8, 128], strides = [1, 1]} : vector<8x512xf32> to vector<8x128xf32>
    %94 = arith.negf %93 : vector<8x128xf32>
    %95 = math.exp %94 : vector<8x128xf32>
    %cst_34 = arith.constant 1.000000e+00 : f32
    %96 = vector.broadcast %cst_34 : f32 to vector<8x128xf32>
    %97 = arith.addf %96, %95 : vector<8x128xf32>
    %98 = arith.divf %96, %97 : vector<8x128xf32>
    %99 = vector.extract_strided_slice %86 {offsets = [0, 256], sizes = [8, 128], strides = [1, 1]} : vector<8x512xf32> to vector<8x128xf32>
    %100 = math.tanh %99 : vector<8x128xf32>
    %101 = vector.extract_strided_slice %86 {offsets = [0, 384], sizes = [8, 128], strides = [1, 1]} : vector<8x512xf32> to vector<8x128xf32>
    %102 = arith.negf %101 : vector<8x128xf32>
    %103 = math.exp %102 : vector<8x128xf32>
    %cst_35 = arith.constant 1.000000e+00 : f32
    %104 = vector.broadcast %cst_35 : f32 to vector<8x128xf32>
    %105 = arith.addf %104, %103 : vector<8x128xf32>
    %106 = arith.divf %104, %105 : vector<8x128xf32>
    %107 = arith.mulf %98, %74 : vector<8x128xf32>
    %108 = arith.mulf %92, %100 : vector<8x128xf32>
    %109 = arith.addf %107, %108 : vector<8x128xf32>
    %110 = math.tanh %109 : vector<8x128xf32>
    %111 = arith.mulf %106, %110 : vector<8x128xf32>
    %112 = arith.truncf %111 : vector<8x128xf32> to vector<8x128xbf16>
    %113 = arith.index_cast %81 : i32 to index
    %c0_36 = arith.constant 0 : index
    %114 = vector.load %arg13[%113, %c0_36] : memref<64x128xbf16, #tpu.memory_space<vmem>>, vector<8x128xbf16>
    tpu.vector_store %arg13[%113, %c0_36], %112 {strides = array<i32>} : memref<64x128xbf16, #tpu.memory_space<vmem>>, vector<8x128xbf16>,
    %c3_i32 = arith.constant 3 : i32
    %c8_i32_37 = arith.constant 8 : i32
    %115 = arith.muli %c3_i32, %c8_i32_37 : i32
    %116 = tpu.assume_multiple %115, 8 : i32
    %117 = arith.index_cast %116 : i32 to index
    %c0_38 = arith.constant 0 : index
    %118 = vector.load %arg12[%117, %c0_38] : memref<64x512xf32, #tpu.memory_space<vmem>>, vector<8x512xf32>
    %c0_39 = arith.constant 0 : index
    %c0_40 = arith.constant 0 : index
    %119 = vector.load %arg5[%c0_39, %c0_40] : memref<128x512xbf16, #tpu.memory_space<vmem>>, vector<128x512xbf16>
    %cst_41 = arith.constant dense<0.000000e+00> : vector<8x512xf32>
    %120 = tpu.matmul %112, %119, %cst_41 {dimension_numbers = #tpu.dot_dimension_numbers<[1], [0], [0], [1], [0, 0, 1, 1], [], []>} : vector<8x128xbf16>, vector<128x512xbf16>, vector<8x512xf32> -> vector<8x512xf32>
    %121 = arith.addf %118, %120 : vector<8x512xf32>
    %122 = vector.extract_strided_slice %121 {offsets = [0, 0], sizes = [8, 128], strides = [1, 1]} : vector<8x512xf32> to vector<8x128xf32>
    %123 = arith.negf %122 : vector<8x128xf32>
    %124 = math.exp %123 : vector<8x128xf32>
    %cst_42 = arith.constant 1.000000e+00 : f32
    %125 = vector.broadcast %cst_42 : f32 to vector<8x128xf32>
    %126 = arith.addf %125, %124 : vector<8x128xf32>
    %127 = arith.divf %125, %126 : vector<8x128xf32>
    %128 = vector.extract_strided_slice %121 {offsets = [0, 128], sizes = [8, 128], strides = [1, 1]} : vector<8x512xf32> to vector<8x128xf32>
    %129 = arith.negf %128 : vector<8x128xf32>
    %130 = math.exp %129 : vector<8x128xf32>
    %cst_43 = arith.constant 1.000000e+00 : f32
    %131 = vector.broadcast %cst_43 : f32 to vector<8x128xf32>
    %132 = arith.addf %131, %130 : vector<8x128xf32>
    %133 = arith.divf %131, %132 : vector<8x128xf32>
    %134 = vector.extract_strided_slice %121 {offsets = [0, 256], sizes = [8, 128], strides = [1, 1]} : vector<8x512xf32> to vector<8x128xf32>
    %135 = math.tanh %134 : vector<8x128xf32>
    %136 = vector.extract_strided_slice %121 {offsets = [0, 384], sizes = [8, 128], strides = [1, 1]} : vector<8x512xf32> to vector<8x128xf32>
    %137 = arith.negf %136 : vector<8x128xf32>
    %138 = math.exp %137 : vector<8x128xf32>
    %cst_44 = arith.constant 1.000000e+00 : f32
    %139 = vector.broadcast %cst_44 : f32 to vector<8x128xf32>
    %140 = arith.addf %139, %138 : vector<8x128xf32>
    %141 = arith.divf %139, %140 : vector<8x128xf32>
    %142 = arith.mulf %133, %109 : vector<8x128xf32>
    %143 = arith.mulf %127, %135 : vector<8x128xf32>
    %144 = arith.addf %142, %143 : vector<8x128xf32>
    %145 = math.tanh %144 : vector<8x128xf32>
    %146 = arith.mulf %141, %145 : vector<8x128xf32>
    %147 = arith.truncf %146 : vector<8x128xf32> to vector<8x128xbf16>
    %148 = arith.index_cast %116 : i32 to index
    %c0_45 = arith.constant 0 : index
    %149 = vector.load %arg13[%148, %c0_45] : memref<64x128xbf16, #tpu.memory_space<vmem>>, vector<8x128xbf16>
    tpu.vector_store %arg13[%148, %c0_45], %147 {strides = array<i32>} : memref<64x128xbf16, #tpu.memory_space<vmem>>, vector<8x128xbf16>,
    %c4_i32 = arith.constant 4 : i32
    %c8_i32_46 = arith.constant 8 : i32
    %150 = arith.muli %c4_i32, %c8_i32_46 : i32
    %151 = tpu.assume_multiple %150, 8 : i32
    %152 = arith.index_cast %151 : i32 to index
    %c0_47 = arith.constant 0 : index
    %153 = vector.load %arg12[%152, %c0_47] : memref<64x512xf32, #tpu.memory_space<vmem>>, vector<8x512xf32>
    %c0_48 = arith.constant 0 : index
    %c0_49 = arith.constant 0 : index
    %154 = vector.load %arg5[%c0_48, %c0_49] : memref<128x512xbf16, #tpu.memory_space<vmem>>, vector<128x512xbf16>
    %cst_50 = arith.constant dense<0.000000e+00> : vector<8x512xf32>
    %155 = tpu.matmul %147, %154, %cst_50 {dimension_numbers = #tpu.dot_dimension_numbers<[1], [0], [0], [1], [0, 0, 1, 1], [], []>} : vector<8x128xbf16>, vector<128x512xbf16>, vector<8x512xf32> -> vector<8x512xf32>
    %156 = arith.addf %153, %155 : vector<8x512xf32>
    %157 = vector.extract_strided_slice %156 {offsets = [0, 0], sizes = [8, 128], strides = [1, 1]} : vector<8x512xf32> to vector<8x128xf32>
    %158 = arith.negf %157 : vector<8x128xf32>
    %159 = math.exp %158 : vector<8x128xf32>
    %cst_51 = arith.constant 1.000000e+00 : f32
    %160 = vector.broadcast %cst_51 : f32 to vector<8x128xf32>
    %161 = arith.addf %160, %159 : vector<8x128xf32>
    %162 = arith.divf %160, %161 : vector<8x128xf32>
    %163 = vector.extract_strided_slice %156 {offsets = [0, 128], sizes = [8, 128], strides = [1, 1]} : vector<8x512xf32> to vector<8x128xf32>
    %164 = arith.negf %163 : vector<8x128xf32>
    %165 = math.exp %164 : vector<8x128xf32>
    %cst_52 = arith.constant 1.000000e+00 : f32
    %166 = vector.broadcast %cst_52 : f32 to vector<8x128xf32>
    %167 = arith.addf %166, %165 : vector<8x128xf32>
    %168 = arith.divf %166, %167 : vector<8x128xf32>
    %169 = vector.extract_strided_slice %156 {offsets = [0, 256], sizes = [8, 128], strides = [1, 1]} : vector<8x512xf32> to vector<8x128xf32>
    %170 = math.tanh %169 : vector<8x128xf32>
    %171 = vector.extract_strided_slice %156 {offsets = [0, 384], sizes = [8, 128], strides = [1, 1]} : vector<8x512xf32> to vector<8x128xf32>
    %172 = arith.negf %171 : vector<8x128xf32>
    %173 = math.exp %172 : vector<8x128xf32>
    %cst_53 = arith.constant 1.000000e+00 : f32
    %174 = vector.broadcast %cst_53 : f32 to vector<8x128xf32>
    %175 = arith.addf %174, %173 : vector<8x128xf32>
    %176 = arith.divf %174, %175 : vector<8x128xf32>
    %177 = arith.mulf %168, %144 : vector<8x128xf32>
    %178 = arith.mulf %162, %170 : vector<8x128xf32>
    %179 = arith.addf %177, %178 : vector<8x128xf32>
    %180 = math.tanh %179 : vector<8x128xf32>
    %181 = arith.mulf %176, %180 : vector<8x128xf32>
    %182 = arith.truncf %181 : vector<8x128xf32> to vector<8x128xbf16>
    %183 = arith.index_cast %151 : i32 to index
    %c0_54 = arith.constant 0 : index
    %184 = vector.load %arg13[%183, %c0_54] : memref<64x128xbf16, #tpu.memory_space<vmem>>, vector<8x128xbf16>
    tpu.vector_store %arg13[%183, %c0_54], %182 {strides = array<i32>} : memref<64x128xbf16, #tpu.memory_space<vmem>>, vector<8x128xbf16>,
    %c5_i32 = arith.constant 5 : i32
    %c8_i32_55 = arith.constant 8 : i32
    %185 = arith.muli %c5_i32, %c8_i32_55 : i32
    %186 = tpu.assume_multiple %185, 8 : i32
    %187 = arith.index_cast %186 : i32 to index
    %c0_56 = arith.constant 0 : index
    %188 = vector.load %arg12[%187, %c0_56] : memref<64x512xf32, #tpu.memory_space<vmem>>, vector<8x512xf32>
    %c0_57 = arith.constant 0 : index
    %c0_58 = arith.constant 0 : index
    %189 = vector.load %arg5[%c0_57, %c0_58] : memref<128x512xbf16, #tpu.memory_space<vmem>>, vector<128x512xbf16>
    %cst_59 = arith.constant dense<0.000000e+00> : vector<8x512xf32>
    %190 = tpu.matmul %182, %189, %cst_59 {dimension_numbers = #tpu.dot_dimension_numbers<[1], [0], [0], [1], [0, 0, 1, 1], [], []>} : vector<8x128xbf16>, vector<128x512xbf16>, vector<8x512xf32> -> vector<8x512xf32>
    %191 = arith.addf %188, %190 : vector<8x512xf32>
    %192 = vector.extract_strided_slice %191 {offsets = [0, 0], sizes = [8, 128], strides = [1, 1]} : vector<8x512xf32> to vector<8x128xf32>
    %193 = arith.negf %192 : vector<8x128xf32>
    %194 = math.exp %193 : vector<8x128xf32>
    %cst_60 = arith.constant 1.000000e+00 : f32
    %195 = vector.broadcast %cst_60 : f32 to vector<8x128xf32>
    %196 = arith.addf %195, %194 : vector<8x128xf32>
    %197 = arith.divf %195, %196 : vector<8x128xf32>
    %198 = vector.extract_strided_slice %191 {offsets = [0, 128], sizes = [8, 128], strides = [1, 1]} : vector<8x512xf32> to vector<8x128xf32>
    %199 = arith.negf %198 : vector<8x128xf32>
    %200 = math.exp %199 : vector<8x128xf32>
    %cst_61 = arith.constant 1.000000e+00 : f32
    %201 = vector.broadcast %cst_61 : f32 to vector<8x128xf32>
    %202 = arith.addf %201, %200 : vector<8x128xf32>
    %203 = arith.divf %201, %202 : vector<8x128xf32>
    %204 = vector.extract_strided_slice %191 {offsets = [0, 256], sizes = [8, 128], strides = [1, 1]} : vector<8x512xf32> to vector<8x128xf32>
    %205 = math.tanh %204 : vector<8x128xf32>
    %206 = vector.extract_strided_slice %191 {offsets = [0, 384], sizes = [8, 128], strides = [1, 1]} : vector<8x512xf32> to vector<8x128xf32>
    %207 = arith.negf %206 : vector<8x128xf32>
    %208 = math.exp %207 : vector<8x128xf32>
    %cst_62 = arith.constant 1.000000e+00 : f32
    %209 = vector.broadcast %cst_62 : f32 to vector<8x128xf32>
    %210 = arith.addf %209, %208 : vector<8x128xf32>
    %211 = arith.divf %209, %210 : vector<8x128xf32>
    %212 = arith.mulf %203, %179 : vector<8x128xf32>
    %213 = arith.mulf %197, %205 : vector<8x128xf32>
    %214 = arith.addf %212, %213 : vector<8x128xf32>
    %215 = math.tanh %214 : vector<8x128xf32>
    %216 = arith.mulf %211, %215 : vector<8x128xf32>
    %217 = arith.truncf %216 : vector<8x128xf32> to vector<8x128xbf16>
    %218 = arith.index_cast %186 : i32 to index
    %c0_63 = arith.constant 0 : index
    %219 = vector.load %arg13[%218, %c0_63] : memref<64x128xbf16, #tpu.memory_space<vmem>>, vector<8x128xbf16>
    tpu.vector_store %arg13[%218, %c0_63], %217 {strides = array<i32>} : memref<64x128xbf16, #tpu.memory_space<vmem>>, vector<8x128xbf16>,
    %c6_i32 = arith.constant 6 : i32
    %c8_i32_64 = arith.constant 8 : i32
    %220 = arith.muli %c6_i32, %c8_i32_64 : i32
    %221 = tpu.assume_multiple %220, 8 : i32
    %222 = arith.index_cast %221 : i32 to index
    %c0_65 = arith.constant 0 : index
    %223 = vector.load %arg12[%222, %c0_65] : memref<64x512xf32, #tpu.memory_space<vmem>>, vector<8x512xf32>
    %c0_66 = arith.constant 0 : index
    %c0_67 = arith.constant 0 : index
    %224 = vector.load %arg5[%c0_66, %c0_67] : memref<128x512xbf16, #tpu.memory_space<vmem>>, vector<128x512xbf16>
    %cst_68 = arith.constant dense<0.000000e+00> : vector<8x512xf32>
    %225 = tpu.matmul %217, %224, %cst_68 {dimension_numbers = #tpu.dot_dimension_numbers<[1], [0], [0], [1], [0, 0, 1, 1], [], []>} : vector<8x128xbf16>, vector<128x512xbf16>, vector<8x512xf32> -> vector<8x512xf32>
    %226 = arith.addf %223, %225 : vector<8x512xf32>
    %227 = vector.extract_strided_slice %226 {offsets = [0, 0], sizes = [8, 128], strides = [1, 1]} : vector<8x512xf32> to vector<8x128xf32>
    %228 = arith.negf %227 : vector<8x128xf32>
    %229 = math.exp %228 : vector<8x128xf32>
    %cst_69 = arith.constant 1.000000e+00 : f32
    %230 = vector.broadcast %cst_69 : f32 to vector<8x128xf32>
    %231 = arith.addf %230, %229 : vector<8x128xf32>
    %232 = arith.divf %230, %231 : vector<8x128xf32>
    %233 = vector.extract_strided_slice %226 {offsets = [0, 128], sizes = [8, 128], strides = [1, 1]} : vector<8x512xf32> to vector<8x128xf32>
    %234 = arith.negf %233 : vector<8x128xf32>
    %235 = math.exp %234 : vector<8x128xf32>
    %cst_70 = arith.constant 1.000000e+00 : f32
    %236 = vector.broadcast %cst_70 : f32 to vector<8x128xf32>
    %237 = arith.addf %236, %235 : vector<8x128xf32>
    %238 = arith.divf %236, %237 : vector<8x128xf32>
    %239 = vector.extract_strided_slice %226 {offsets = [0, 256], sizes = [8, 128], strides = [1, 1]} : vector<8x512xf32> to vector<8x128xf32>
    %240 = math.tanh %239 : vector<8x128xf32>
    %241 = vector.extract_strided_slice %226 {offsets = [0, 384], sizes = [8, 128], strides = [1, 1]} : vector<8x512xf32> to vector<8x128xf32>
    %242 = arith.negf %241 : vector<8x128xf32>
    %243 = math.exp %242 : vector<8x128xf32>
    %cst_71 = arith.constant 1.000000e+00 : f32
    %244 = vector.broadcast %cst_71 : f32 to vector<8x128xf32>
    %245 = arith.addf %244, %243 : vector<8x128xf32>
    %246 = arith.divf %244, %245 : vector<8x128xf32>
    %247 = arith.mulf %238, %214 : vector<8x128xf32>
    %248 = arith.mulf %232, %240 : vector<8x128xf32>
    %249 = arith.addf %247, %248 : vector<8x128xf32>
    %250 = math.tanh %249 : vector<8x128xf32>
    %251 = arith.mulf %246, %250 : vector<8x128xf32>
    %252 = arith.truncf %251 : vector<8x128xf32> to vector<8x128xbf16>
    %253 = arith.index_cast %221 : i32 to index
    %c0_72 = arith.constant 0 : index
    %254 = vector.load %arg13[%253, %c0_72] : memref<64x128xbf16, #tpu.memory_space<vmem>>, vector<8x128xbf16>
    tpu.vector_store %arg13[%253, %c0_72], %252 {strides = array<i32>} : memref<64x128xbf16, #tpu.memory_space<vmem>>, vector<8x128xbf16>,
    %c7_i32 = arith.constant 7 : i32
    %c8_i32_73 = arith.constant 8 : i32
    %255 = arith.muli %c7_i32, %c8_i32_73 : i32
    %256 = tpu.assume_multiple %255, 8 : i32
    %257 = arith.index_cast %256 : i32 to index
    %c0_74 = arith.constant 0 : index
    %258 = vector.load %arg12[%257, %c0_74] : memref<64x512xf32, #tpu.memory_space<vmem>>, vector<8x512xf32>
    %c0_75 = arith.constant 0 : index
    %c0_76 = arith.constant 0 : index
    %259 = vector.load %arg5[%c0_75, %c0_76] : memref<128x512xbf16, #tpu.memory_space<vmem>>, vector<128x512xbf16>
    %cst_77 = arith.constant dense<0.000000e+00> : vector<8x512xf32>
    %260 = tpu.matmul %252, %259, %cst_77 {dimension_numbers = #tpu.dot_dimension_numbers<[1], [0], [0], [1], [0, 0, 1, 1], [], []>} : vector<8x128xbf16>, vector<128x512xbf16>, vector<8x512xf32> -> vector<8x512xf32>
    %261 = arith.addf %258, %260 : vector<8x512xf32>
    %262 = vector.extract_strided_slice %261 {offsets = [0, 0], sizes = [8, 128], strides = [1, 1]} : vector<8x512xf32> to vector<8x128xf32>
    %263 = arith.negf %262 : vector<8x128xf32>
    %264 = math.exp %263 : vector<8x128xf32>
    %cst_78 = arith.constant 1.000000e+00 : f32
    %265 = vector.broadcast %cst_78 : f32 to vector<8x128xf32>
    %266 = arith.addf %265, %264 : vector<8x128xf32>
    %267 = arith.divf %265, %266 : vector<8x128xf32>
    %268 = vector.extract_strided_slice %261 {offsets = [0, 128], sizes = [8, 128], strides = [1, 1]} : vector<8x512xf32> to vector<8x128xf32>
    %269 = arith.negf %268 : vector<8x128xf32>
    %270 = math.exp %269 : vector<8x128xf32>
    %cst_79 = arith.constant 1.000000e+00 : f32
    %271 = vector.broadcast %cst_79 : f32 to vector<8x128xf32>
    %272 = arith.addf %271, %270 : vector<8x128xf32>
    %273 = arith.divf %271, %272 : vector<8x128xf32>
    %274 = vector.extract_strided_slice %261 {offsets = [0, 256], sizes = [8, 128], strides = [1, 1]} : vector<8x512xf32> to vector<8x128xf32>
    %275 = math.tanh %274 : vector<8x128xf32>
    %276 = vector.extract_strided_slice %261 {offsets = [0, 384], sizes = [8, 128], strides = [1, 1]} : vector<8x512xf32> to vector<8x128xf32>
    %277 = arith.negf %276 : vector<8x128xf32>
    %278 = math.exp %277 : vector<8x128xf32>
    %cst_80 = arith.constant 1.000000e+00 : f32
    %279 = vector.broadcast %cst_80 : f32 to vector<8x128xf32>
    %280 = arith.addf %279, %278 : vector<8x128xf32>
    %281 = arith.divf %279, %280 : vector<8x128xf32>
    %282 = arith.mulf %273, %249 : vector<8x128xf32>
    %283 = arith.mulf %267, %275 : vector<8x128xf32>
    %284 = arith.addf %282, %283 : vector<8x128xf32>
    %285 = math.tanh %284 : vector<8x128xf32>
    %286 = arith.mulf %281, %285 : vector<8x128xf32>
    %287 = arith.truncf %286 : vector<8x128xf32> to vector<8x128xbf16>
    %288 = arith.index_cast %256 : i32 to index
    %c0_81 = arith.constant 0 : index
    %289 = vector.load %arg13[%288, %c0_81] : memref<64x128xbf16, #tpu.memory_space<vmem>>, vector<8x128xbf16>
    tpu.vector_store %arg13[%288, %c0_81], %287 {strides = array<i32>} : memref<64x128xbf16, #tpu.memory_space<vmem>>, vector<8x128xbf16>,
    %c8_i32_82 = arith.constant 8 : i32
    tpu.wait_dma2 semaphore(%arg15 : memref<!tpu.dma_semaphore, #tpu.memory_space<semaphore_mem>>) src(%arg7 : memref<128x256xbf16, #tpu.memory_space<any>>) dst(%arg14 : memref<128x256xbf16, #tpu.memory_space<vmem>>)
    %c0_83 = arith.constant 0 : index
    %c0_84 = arith.constant 0 : index
    %290 = vector.load %arg13[%c0_83, %c0_84] : memref<64x128xbf16, #tpu.memory_space<vmem>>, vector<64x128xbf16>
    %c0_85 = arith.constant 0 : index
    %c0_86 = arith.constant 0 : index
    %291 = vector.load %arg14[%c0_85, %c0_86] : memref<128x256xbf16, #tpu.memory_space<vmem>>, vector<128x256xbf16>
    %cst_87 = arith.constant dense<0.000000e+00> : vector<64x256xf32>
    %292 = tpu.matmul %290, %291, %cst_87 {dimension_numbers = #tpu.dot_dimension_numbers<[1], [0], [0], [1], [0, 0, 1, 1], [], []>} : vector<64x128xbf16>, vector<128x256xbf16>, vector<64x256xf32> -> vector<64x256xf32>
    %c0_88 = arith.constant 0 : index
    %c0_89 = arith.constant 0 : index
    %293 = vector.load %arg8[%c0_88, %c0_89] : memref<1x256xf32, #tpu.memory_space<vmem>>, vector<1x256xf32>
    %294 = vector.broadcast %293 : vector<1x256xf32> to vector<64x256xf32>
    %295 = arith.addf %292, %294 : vector<64x256xf32>
    %c0_90 = arith.constant 0 : index
    %c0_91 = arith.constant 0 : index
    %296 = vector.load %arg9[%c0_90, %c0_91] : memref<64x256xf32, #tpu.memory_space<vmem>>, vector<64x256xf32>
    tpu.vector_store %arg9[%c0_90, %c0_91], %295 {strides = array<i32>} : memref<64x256xf32, #tpu.memory_space<vmem>>, vector<64x256xf32>,
    %c0_92 = arith.constant 0 : index
    %c0_93 = arith.constant 0 : index
    %297 = vector.load %arg10[%c0_92, %c0_93] : memref<8x128xf32, #tpu.memory_space<vmem>>, vector<8x128xf32>
    tpu.vector_store %arg10[%c0_92, %c0_93], %286 {strides = array<i32>} : memref<8x128xf32, #tpu.memory_space<vmem>>, vector<8x128xf32>,
    %c0_94 = arith.constant 0 : index
    %c0_95 = arith.constant 0 : index
    %298 = vector.load %arg11[%c0_94, %c0_95] : memref<8x128xf32, #tpu.memory_space<vmem>>, vector<8x128xf32>
    tpu.vector_store %arg11[%c0_94, %c0_95], %284 {strides = array<i32>} : memref<8x128xf32, #tpu.memory_space<vmem>>, vector<8x128xf32>,
    return
  }
  func.func @transform_0(%arg0: i32) -> (i32, i32) {
    %c0_i32 = arith.constant 0 : i32
    %c0_i32_0 = arith.constant 0 : i32
    %c0_i32_1 = arith.constant 0 : i32
    return %c0_i32, %c0_i32_0 : i32, i32
  }
  func.func @transform_1(%arg0: i32) -> (i32, i32) {
    %c0_i32 = arith.constant 0 : i32
    %c0_i32_0 = arith.constant 0 : i32
    %c0_i32_1 = arith.constant 0 : i32
    return %c0_i32, %c0_i32_0 : i32, i32
  }
  func.func @transform_2(%arg0: i32) -> (i32, i32) {
    %c0_i32 = arith.constant 0 : i32
    %c0_i32_0 = arith.constant 0 : i32
    %c0_i32_1 = arith.constant 0 : i32
    return %c0_i32, %c0_i32_0 : i32, i32
  }
  func.func @transform_3(%arg0: i32) -> (i32, i32) {
    %c0_i32 = arith.constant 0 : i32
    %c0_i32_0 = arith.constant 0 : i32
    %c0_i32_1 = arith.constant 0 : i32
    return %c0_i32, %c0_i32_0 : i32, i32
  }
  func.func @transform_4(%arg0: i32) -> (i32, i32) {
    %c0_i32 = arith.constant 0 : i32
    %c0_i32_0 = arith.constant 0 : i32
    %c0_i32_1 = arith.constant 0 : i32
    return %c0_i32, %c0_i32_0 : i32, i32
  }
  func.func @transform_5(%arg0: i32) -> (i32, i32) {
    %c0_i32 = arith.constant 0 : i32
    %c0_i32_0 = arith.constant 0 : i32
    %c0_i32_1 = arith.constant 0 : i32
    return %c0_i32, %c0_i32_0 : i32, i32
  }
  func.func @transform_7(%arg0: i32) -> (i32, i32) {
    %c0_i32 = arith.constant 0 : i32
    %c0_i32_0 = arith.constant 0 : i32
    %c0_i32_1 = arith.constant 0 : i32
    return %c0_i32, %c0_i32_0 : i32, i32
  }
  func.func @transform_8(%arg0: i32) -> (i32, i32) {
    %c0_i32 = arith.constant 0 : i32
    %c0_i32_0 = arith.constant 0 : i32
    %c0_i32_1 = arith.constant 0 : i32
    return %c0_i32, %c0_i32_0 : i32, i32
  }
  func.func @transform_9(%arg0: i32) -> (i32, i32) {
    %c0_i32 = arith.constant 0 : i32
    %c0_i32_0 = arith.constant 0 : i32
    %c0_i32_1 = arith.constant 0 : i32
    return %c0_i32, %c0_i32_0 : i32, i32
  }
  func.func @transform_10(%arg0: i32) -> (i32, i32) {
    %c0_i32 = arith.constant 0 : i32
    %c0_i32_0 = arith.constant 0 : i32
    %c0_i32_1 = arith.constant 0 : i32
    return %c0_i32, %c0_i32_0 : i32, i32
  }
}

</mosaic_0001>

<bundles_post_ra>
// kernel: tpu_custom_call.1
= control target key start
LH: loop header
LB: loop body
LE: loop exit
PB: predicated region body
PF: predicated region fallthrough
CT: control target
= control target key end

     0   :  { %16 = vsyncpa [#allocation7], 0  ;;  %s5660_s0 = inlined_call_operand.hbm [shape: bf16[64,128], index: 0, kind: input, shape index: {}]   ;;  %s5661_s1 = inlined_call_operand.hbm [shape: f32[8,128], index: 1, kind: input, shape index: {}]   ;;  %s5662_s2 = inlined_call_operand.hbm [shape: f32[8,128], index: 2, kind: input, shape index: {}]   ;;  %s5663_s3 = inlined_call_operand.hbm [shape: bf16[128,512], index: 3, kind: input, shape index: {}]   ;;  %s5664_s4 = inlined_call_operand.hbm [shape: bf16[128,512], index: 4, kind: input, shape index: {}]   ;;  %s5665_s5 = inlined_call_operand.vmem [shape: f32[1,512], index: 5, kind: input, shape index: {}]   ;;  %s5666_s6 = inlined_call_operand.hbm [shape: bf16[128,256], index: 6, kind: input, shape index: {}]   ;;  %s5667_s7 = inlined_call_operand.vmem [shape: f32[1,256], index: 7, kind: input, shape index: {}]   ;;  %s5668_s8 = inlined_call_operand.hbm [shape: f32[64,256], index: 8, kind: output, shape index: {0}]   ;;  %s5669_s9 = inlined_call_operand.hbm [shape: f32[8,128], index: 9, kind: output, shape index: {1}]   ;;  %s5670_s10 = inlined_call_operand.hbm [shape: f32[8,128], index: 10, kind: output, shape index: {2}]  }
   0x1   :  { %17 = vsyncpa [#allocation10], 0 }
   0x2   :  { %18 = vsyncpa [#allocation13], 0 }
   0x3   :  { %19 = vsyncpa [#allocation8], 0  ;;  %s39_s15 = sshll.u32 %s5661_s1, 4  ;;  %s40_s15 = int_to_ptr.hbm [resolvable:$true] %s39_s15 }
   0x4   :  { %20 = vsyncpa [#allocation17], 0  ;;  %s5320_s16 = smov [#allocation9]   ;;  %s60_s20 = sshll.u32 %s5663_s3, 4  ;;  %s61_s20 = int_to_ptr.hbm [resolvable:$true] %s60_s20 }
   0x5   :  { %s41_s17 = sshll.u32 %s5320_s16, 4  ;;  %s5321_s21 = smov [#allocation12]   ;;  %s42_s17 = int_to_ptr.vmem [resolvable:$true] %s41_s17 }
   0x6   :  { %44 = dma.hbm_to_vmem [thread:$0]  %s40_s15, 128, %s42_s17, [#allocation10]  }
   0x7   :  { %s62_s22 = sshll.u32 %s5321_s21, 4  ;;  %s5322_s23 = smov 256   ;;  %s63_s22 = int_to_ptr.vmem [resolvable:$true] %s62_s22 }
   0x8   :  { %s5323_s24 = smov 16   ;;  %s25_s26 = sshll.u32 %s5660_s0, 4  ;;  %s26_s26 = int_to_ptr.hbm [resolvable:$true] %s25_s26 }
   0x9   :  { %68 = dma.hbm_to_vmem [thread:$0]  %s61_s20, 4096, %s63_s22, [#allocation13], %s5322_s23, %s5322_s23, %s5323_s24  }
   0xa   :  { %s5324_s27 = smov [#allocation6]   ;;  %s50_s30 = sshll.u32 %s5662_s2, 4  ;;  %s51_s30 = int_to_ptr.hbm [resolvable:$true] %s50_s30 }
   0xb   :  { %s27_s28 = sshll.u32 %s5324_s27, 4  ;;  %s5325_s11 = smov 64   ;;  %s28_s28 = int_to_ptr.vmem [resolvable:$true] %s27_s28 }
   0xc   :  { %s5326_s12 = smov 4   ;;  %s5327_s13 = smov [#allocation11]  }
   0xd   :  { %33 = dma.hbm_to_vmem [thread:$0]  %s26_s26, 512, %s28_s28, [#allocation7], %s5325_s11, %s5325_s11, %s5326_s12  }
   0xe   :  { %s52_s14 = sshll.u32 %s5327_s13, 4  ;;  %s73_s17 = sshll.u32 %s5664_s4, 4  ;;  %s53_s14 = int_to_ptr.vmem [resolvable:$true] %s52_s14  ;;  %s74_s17 = int_to_ptr.hbm [resolvable:$true] %s73_s17 }
   0xf   :  { %55 = dma.hbm_to_vmem [thread:$0]  %s51_s30, 128, %s53_s14, [#allocation10]  }
  0x10   :  { %s5328_s0 = smov [#allocation14]  }
  0x11   :  { %s75_s18 = sshll.u32 %s5328_s0, 4  ;;  %s76_s18 = int_to_ptr.vmem [resolvable:$true] %s75_s18 }
  0x12   :  { %81 = dma.hbm_to_vmem [thread:$0]  %s74_s17, 4096, %s76_s18, [#allocation13], %s5322_s23, %s5322_s23, %s5323_s24  }
  0x13   :  { %5308 = dma.done.wait [#allocation7], 512  }
  0x14   :  { %5309 = vsyncadd [#allocation7], 4294966784 }
  0x15   :  { %5310 = dma.done.wait [#allocation10], 256  }
  0x16   :  { %5311 = vsyncadd [#allocation10], 4294967040 }
  0x17   :  { %5312 = dma.done.wait [#allocation13], 8192  }
  0x18   :  { %5313 = vsyncadd [#allocation13], 4294959104  ;;  %v3480_v0 = vld [vmem:[#allocation12 + $0xe0] sm:$0xf]  ;;  %v4657_v1 = vld [vmem:[#allocation12 + $0xec] sm:$0xf0] }
  0x19   :  { %v4655_v2 = vld [vmem:[#allocation12 + $0xe4] sm:$0xf]  ;;  %v3481_v3 = vor.u32 %v4657_v1, %v3480_v0  ;;  %v3482_v4 = vld [vmem:[#allocation12 + $0xf0] sm:$0xf0]  ;;  %v3464_v5 = vld [vmem:[#allocation12 + $0xc0] sm:$0xf] }
  0x1a   :  { %v4653_v6 = vld [vmem:[#allocation12 + $0xcc] sm:$0xf0]  ;;  %v3485_v7 = vor.u32 %v4655_v2, %v3482_v4  ;;  %v4651_v8 = vld [vmem:[#allocation12 + $0xc4] sm:$0xf]  ;;  %v3466_v9 = vld [vmem:[#allocation12 + $0xd0] sm:$0xf0] }
  0x1b   :  { %4935 = vmatpush.bf16.msra.mxu2 %v3481_v3  ;;  %v3465_v10 = vor.u32 %v4653_v6, %v3464_v5  ;;  %353 = vmatpush.bf16.msra.mxu0 %v3481_v3  ;;  %v3469_v11 = vor.u32 %v4651_v8, %v3466_v9  ;;  %v3448_v12 = vld [vmem:[#allocation12 + $0xa0] sm:$0xf]  ;;  %v4649_v13 = vld [vmem:[#allocation12 + $0xac] sm:$0xf0]  ;;  %v4647_v14 = vld [vmem:[#allocation12 + $0xa4] sm:$0xf] }
  0x1c   :  { %4943 = vmatpush.bf16.msra.mxu3 %v3485_v7  ;;  %382 = vmatpush.bf16.msra.mxu1 %v3485_v7  ;;  %v3450_v15 = vld [vmem:[#allocation12 + $0xb0] sm:$0xf0]  ;;  %v3449_v16 = vor.u32 %v4649_v13, %v3448_v12  ;;  %v3432_v18 = vld [vmem:[#allocation12 + $0x80] sm:$0xf]  ;;  %v4645_v19 = vld [vmem:[#allocation12 + $0x8c] sm:$0xf0] }
  0x1d   :  { %v3453_v17 = vor.u32 %v4647_v14, %v3450_v15  ;;  %v4643_v20 = vld [vmem:[#allocation12 + $0x84] sm:$0xf]  ;;  %v3434_v21 = vld [vmem:[#allocation12 + $0x90] sm:$0xf0]  ;;  %v3433_v22 = vor.u32 %v4645_v19, %v3432_v18  ;;  %v3416_v24 = vld [vmem:[#allocation12 + $0x60] sm:$0xf] }
  0x1e   :  { %v3437_v23 = vor.u32 %v4643_v20, %v3434_v21  ;;  %v4641_v25 = vld [vmem:[#allocation12 + $0x6c] sm:$0xf0]  ;;  %v4639_v26 = vld [vmem:[#allocation12 + $0x64] sm:$0xf]  ;;  %v3418_v27 = vld [vmem:[#allocation12 + $0x70] sm:$0xf0] }
  0x1f   :  { %4936 = vmatpush.bf16.msra.mxu2 %v3465_v10  ;;  %354 = vmatpush.bf16.msra.mxu0 %v3465_v10  ;;  %v3417_v28 = vor.u32 %v4641_v25, %v3416_v24  ;;  %v3421_v29 = vor.u32 %v4639_v26, %v3418_v27  ;;  %v3400_v30 = vld [vmem:[#allocation12 + $0x40] sm:$0xf]  ;;  %v4637_v31 = vld [vmem:[#allocation12 + $0x4c] sm:$0xf0]  ;;  %v4635_v32 = vld [vmem:[#allocation12 + $0x44] sm:$0xf] }
  0x20   :  { %4944 = vmatpush.bf16.msra.mxu3 %v3469_v11  ;;  %383 = vmatpush.bf16.msra.mxu1 %v3469_v11  ;;  %v3402_v33 = vld [vmem:[#allocation12 + $0x50] sm:$0xf0]  ;;  %v3401_v34 = vor.u32 %v4637_v31, %v3400_v30  ;;  %v3384_v36 = vld [vmem:[#allocation12 + $0x20] sm:$0xf]  ;;  %v4633_v37 = vld [vmem:[#allocation12 + $0x2c] sm:$0xf0] }
  0x21   :  { %v3405_v35 = vor.u32 %v4635_v32, %v3402_v33  ;;  %v4631_v38 = vld [vmem:[#allocation12 + $0x24] sm:$0xf]  ;;  %v3386_v39 = vld [vmem:[#allocation12 + $0x30] sm:$0xf0]  ;;  %v3385_v40 = vor.u32 %v4633_v37, %v3384_v36  ;;  %v3368_v42 = vld [vmem:[#allocation12] sm:$0xf] }
  0x22   :  { %v3389_v41 = vor.u32 %v4631_v38, %v3386_v39  ;;  %v4629_v43 = vld [vmem:[#allocation12 + $0xc] sm:$0xf0]  ;;  %v4627_v44 = vld [vmem:[#allocation12 + $0x4] sm:$0xf]  ;;  %v3370_v45 = vld [vmem:[#allocation12 + $0x10] sm:$0xf0] }
  0x23   :  { %4937 = vmatpush.bf16.msra.mxu2 %v3449_v16  ;;  %355 = vmatpush.bf16.msra.mxu0 %v3449_v16  ;;  %v3488_v46 = vld [vmem:[#allocation12 + $0xe8] sm:$0xf]  ;;  %v4658_v47 = vld [vmem:[#allocation12 + $0xf4] sm:$0xf0]  ;;  %v4656_v48 = vld [vmem:[#allocation12 + $0xec] sm:$0xf]  ;;  %v3369_v50 = vor.u32 %v4629_v43, %v3368_v42  ;;  %v3373_v51 = vor.u32 %v4627_v44, %v3370_v45 }
  0x24   :  { %4945 = vmatpush.bf16.msra.mxu3 %v3453_v17  ;;  %384 = vmatpush.bf16.msra.mxu1 %v3453_v17  ;;  %v3490_v49 = vld [vmem:[#allocation12 + $0xf8] sm:$0xf0]  ;;  %v5409_v52 = vld [vmem:[#allocation6 + $0x10] sm:$0xff]  ;;  %v3489_v53 = vor.u32 %v4658_v47, %v3488_v46  ;;  %v4652_v54 = vld [vmem:[#allocation12 + $0xcc] sm:$0xf]  ;;  %s113_s20 = sshll.u32 %s5666_s6, 4  ;;  %s114_s20 = int_to_ptr.hbm [resolvable:$true] %s113_s20 }
  0x25   :  { %v3608_v55 = vld [vmem:[#allocation14 + $0xe0] sm:$0xf]  ;;  %v4689_v56 = vld [vmem:[#allocation14 + $0xec] sm:$0xf0]  ;;  %v3493_v57 = vor.u32 %v4656_v48, %v3490_v49  ;;  %v3474_v58 = vld [vmem:[#allocation12 + $0xd8] sm:$0xf0] }
  0x26   :  { %v3472_v59 = vld [vmem:[#allocation12 + $0xc8] sm:$0xf]  ;;  %v4654_v60 = vld [vmem:[#allocation12 + $0xd4] sm:$0xf0]  ;;  %v5411_v61 = vld [vmem:[#allocation6] sm:$0xff]  ;;  %v3609_v0 = vor.u32 %v4689_v56, %v3608_v55  ;;  %v3477_v4 = vor.u32 %v4652_v54, %v3474_v58  ;;  %s5329_s21 = smov [#allocation4]  }
  0x27   :  { %4938 = vmatpush.bf16.msra.mxu2 %v3433_v22  ;;  %356 = vmatpush.bf16.msra.mxu0 %v3433_v22  ;;  %v4687_v62 = vld [vmem:[#allocation14 + $0xe4] sm:$0xf]  ;;  %v3610_v63 = vld [vmem:[#allocation14 + $0xf0] sm:$0xf0]  ;;  %v3473_v1 = vor.u32 %v4654_v60, %v3472_v59  ;;  %v3592_v2 = vld [vmem:[#allocation14 + $0xc0] sm:$0xf] }
  0x28   :  { %4946 = vmatpush.bf16.msra.mxu3 %v3437_v23  ;;  %385 = vmatpush.bf16.msra.mxu1 %v3437_v23  ;;  %v4685_v3 = vld [vmem:[#allocation14 + $0xcc] sm:$0xf0]  ;;  %v4648_v5 = vld [vmem:[#allocation12 + $0xac] sm:$0xf]  ;;  %v3456_v6 = vld [vmem:[#allocation12 + $0xa8] sm:$0xf]  ;;  %v3613_v8 = vor.u32 %v4687_v62, %v3610_v63 }
  0x29   :  { %v4650_v7 = vld [vmem:[#allocation12 + $0xb4] sm:$0xf0]  ;;  %v3458_v9 = vld [vmem:[#allocation12 + $0xb8] sm:$0xf0]  ;;  %v4683_v10 = vld [vmem:[#allocation14 + $0xc4] sm:$0xf]  ;;  %v3593_v12 = vor.u32 %v4685_v3, %v3592_v2 }
  0x2a   :  { %v3594_v11 = vld [vmem:[#allocation14 + $0xd0] sm:$0xf0]  ;;  %v3457_v13 = vor.u32 %v4650_v7, %v3456_v6  ;;  %v3576_v14 = vld [vmem:[#allocation14 + $0xa0] sm:$0xf]  ;;  %v4681_v15 = vld [vmem:[#allocation14 + $0xac] sm:$0xf0]  ;;  %v3461_v16 = vor.u32 %v4648_v5, %v3458_v9 }
  0x2b   :  { %4939 = vmatpush.bf16.msra.mxu2 %v3417_v28  ;;  %357 = vmatpush.bf16.msra.mxu0 %v3417_v28  ;;  %v4644_v17 = vld [vmem:[#allocation12 + $0x8c] sm:$0xf]  ;;  %v3440_v18 = vld [vmem:[#allocation12 + $0x88] sm:$0xf]  ;;  %v4646_v19 = vld [vmem:[#allocation12 + $0x94] sm:$0xf0]  ;;  %v3597_v20 = vor.u32 %v4683_v10, %v3594_v11  ;;  %v3577_v24 = vor.u32 %v4681_v15, %v3576_v14 }
  0x2c   :  { %4947 = vmatpush.bf16.msra.mxu3 %v3421_v29  ;;  %386 = vmatpush.bf16.msra.mxu1 %v3421_v29  ;;  %v3442_v21 = vld [vmem:[#allocation12 + $0x98] sm:$0xf0]  ;;  %v4679_v22 = vld [vmem:[#allocation14 + $0xa4] sm:$0xf]  ;;  %v3578_v23 = vld [vmem:[#allocation14 + $0xb0] sm:$0xf0]  ;;  %v3441_v25 = vor.u32 %v4646_v19, %v3440_v18 }
  0x2d   :  { %v3560_v26 = vld [vmem:[#allocation14 + $0x80] sm:$0xf]  ;;  %v4677_v27 = vld [vmem:[#allocation14 + $0x8c] sm:$0xf0]  ;;  %v3445_v28 = vor.u32 %v4644_v17, %v3442_v21  ;;  %v4640_v29 = vld [vmem:[#allocation12 + $0x6c] sm:$0xf]  ;;  %v3581_v32 = vor.u32 %v4679_v22, %v3578_v23 }
  0x2e   :  { %v3424_v30 = vld [vmem:[#allocation12 + $0x68] sm:$0xf]  ;;  %v4642_v31 = vld [vmem:[#allocation12 + $0x74] sm:$0xf0]  ;;  %v3426_v33 = vld [vmem:[#allocation12 + $0x78] sm:$0xf0]  ;;  %v3561_v36 = vor.u32 %v4677_v27, %v3560_v26 }
  0x2f   :  { %4940 = vmatpush.bf16.msra.mxu2 %v3401_v34  ;;  %358 = vmatpush.bf16.msra.mxu0 %v3401_v34  ;;  %v4675_v34 = vld [vmem:[#allocation14 + $0x84] sm:$0xf]  ;;  %v5417_v37 = vld [vmem:[#allocation6 + $0x18] sm:$0xff]  ;;  %v3425_v38 = vor.u32 %v4642_v31, %v3424_v30  ;;  %v3429_v42 = vor.u32 %v4640_v29, %v3426_v33  ;;  %v3410_v43 = vld [vmem:[#allocation12 + $0x58] sm:$0xf0]  ;;  %s115_s22 = sshll.u32 %s5329_s21, 4  ;;  %s116_s22 = int_to_ptr.vmem [resolvable:$true] %s115_s22 }
  0x30   :  { %4948 = vmatpush.bf16.msra.mxu3 %v3405_v35  ;;  %387 = vmatpush.bf16.msra.mxu1 %v3405_v35  ;;  %v3562_v35 = vld [vmem:[#allocation14 + $0x90] sm:$0xf0]  ;;  %v4636_v39 = vld [vmem:[#allocation12 + $0x4c] sm:$0xf]  ;;  %v3408_v44 = vld [vmem:[#allocation12 + $0x48] sm:$0xf] }
  0x31   :  { %v4638_v45 = vld [vmem:[#allocation12 + $0x54] sm:$0xf0]  ;;  %v3565_v46 = vor.u32 %v4675_v34, %v3562_v35  ;;  %v4671_v48 = vld [vmem:[#allocation14 + $0x64] sm:$0xf]  ;;  %v3546_v49 = vld [vmem:[#allocation14 + $0x70] sm:$0xf0]  ;;  %v3413_v55 = vor.u32 %v4636_v39, %v3410_v43 }
  0x32   :  { %v5419_v47 = vld [vmem:[#allocation6 + $0x8] sm:$0xff]  ;;  %v4669_v54 = vld [vmem:[#allocation14 + $0x4c] sm:$0xf0]  ;;  %v4632_v56 = vld [vmem:[#allocation12 + $0x2c] sm:$0xf]  ;;  %v3549_v59 = vor.u32 %v4671_v48, %v3546_v49 }
  0x33   :  { %4941 = vmatpush.bf16.msra.mxu2 %v3385_v40  ;;  %359 = vmatpush.bf16.msra.mxu0 %v3385_v40  ;;  %v3544_v40 = vld [vmem:[#allocation14 + $0x60] sm:$0xf]  ;;  %v4634_v58 = vld [vmem:[#allocation12 + $0x34] sm:$0xf0]  ;;  %v3394_v60 = vld [vmem:[#allocation12 + $0x38] sm:$0xf0] }
  0x34   :  { %4949 = vmatpush.bf16.msra.mxu3 %v3389_v41  ;;  %388 = vmatpush.bf16.msra.mxu1 %v3389_v41  ;;  %v4673_v41 = vld [vmem:[#allocation14 + $0x6c] sm:$0xf0]  ;;  %v4667_v62 = vld [vmem:[#allocation14 + $0x44] sm:$0xf]  ;;  %v3530_v63 = vld [vmem:[#allocation14 + $0x50] sm:$0xf0]  ;;  %v3397_v5 = vor.u32 %v4632_v56, %v3394_v60 }
  0x35   :  { %v4628_v2 = vld [vmem:[#allocation12 + $0xc] sm:$0xf]  ;;  %v3512_v3 = vld [vmem:[#allocation14 + $0x20] sm:$0xf]  ;;  %v3378_v6 = vld [vmem:[#allocation12 + $0x18] sm:$0xf0]  ;;  %v3533_v9 = vor.u32 %v4667_v62, %v3530_v63 }
  0x36   :  { %v3376_v7 = vld [vmem:[#allocation12 + $0x8] sm:$0xf]  ;;  %v4688_v10 = vld [vmem:[#allocation14 + $0xec] sm:$0xf]  ;;  %v4663_v11 = vld [vmem:[#allocation14 + $0x24] sm:$0xf] }
  0x37   :  { %4942 = vmatpush.bf16.msra.mxu2 %v3369_v50  ;;  %360 = vmatpush.bf16.msra.mxu0 %v3369_v50  ;;  %v3545_v50 = vor.u32 %v4673_v41, %v3544_v40  ;;  %v3616_v15 = vld [vmem:[#allocation14 + $0xe8] sm:$0xf]  ;;  %v3496_v18 = vld [vmem:[#allocation14] sm:$0xf]  ;;  %v4661_v19 = vld [vmem:[#allocation14 + $0xc] sm:$0xf0] }
  0x38   :  { %4950 = vmatpush.bf16.msra.mxu3 %v3373_v51  ;;  %389 = vmatpush.bf16.msra.mxu1 %v3373_v51  ;;  %v3409_v51 = vor.u32 %v4638_v45, %v3408_v44  ;;  %v4684_v26 = vld [vmem:[#allocation14 + $0xcc] sm:$0xf]  ;;  %v3602_v27 = vld [vmem:[#allocation14 + $0xd8] sm:$0xf0]  ;;  %v501_v29 = vld [vmem:[#allocation9] sm:$0xff] }
  0x39   :  { %v3600_v31 = vld [vmem:[#allocation14 + $0xc8] sm:$0xf]  ;;  %v3605_v33 = vor.u32 %v4684_v26, %v3602_v27  ;;  %v5425_v34 = vpack.c.bf16 %v501_v29, %v501_v29  ;;  %v4680_v35 = vld [vmem:[#allocation14 + $0xac] sm:$0xf]  ;;  %v4682_v40 = vld [vmem:[#allocation14 + $0xb4] sm:$0xf0] }
  0x3a   :  { %371 = vmatmul.bf16.vlgmr.msra.gmra.mxu2 %v5409_v52  ;;  %361 = vmatmul.bf16.vlgmr.msra.gmra.mxu0 %v5411_v61  ;;  %v3584_v39 = vld [vmem:[#allocation14 + $0xa8] sm:$0xf]  ;;  %v3570_v43 = vld [vmem:[#allocation14 + $0x98] sm:$0xf0]  ;;  %v4672_v49 = vld [vmem:[#allocation14 + $0x6c] sm:$0xf] }
  0x3b   :  { %411 = vmatpush.bf16.msrb.mxu2 %v3489_v53  ;;  %400 = vmatmul.bf16.vlgmr.msra.gmra.mxu3 %v5409_v52  ;;  %v3528_v53 = vld [vmem:[#allocation14 + $0x40] sm:$0xf]  ;;  %v3585_v44 = vor.u32 %v4682_v40, %v3584_v39  ;;  %v3568_v45 = vld [vmem:[#allocation14 + $0x88] sm:$0xf]  ;;  %v3538_v56 = vld [vmem:[#allocation14 + $0x58] sm:$0xf0] }
  0x3c   :  { %440 = vmatpush.bf16.msrb.mxu3 %v3493_v57  ;;  %703 = vmatpush.bf16.msrb.mxu0 %v3609_v0  ;;  %v3392_v57 = vld [vmem:[#allocation12 + $0x28] sm:$0xf]  ;;  %v3529_v0 = vor.u32 %v4669_v54, %v3528_v53  ;;  %v4674_v54 = vld [vmem:[#allocation14 + $0x74] sm:$0xf0]  ;;  %v3522_v60 = vld [vmem:[#allocation14 + $0x38] sm:$0xf0] }
  0x3d   :  { %390 = vmatmul.bf16.vlgmr.msra.gmra.mxu1 %v5411_v61  ;;  %v3552_v53 = vld [vmem:[#allocation14 + $0x68] sm:$0xf]  ;;  %118 = dma.hbm_to_vmem [thread:$0]  %s114_s20, 2048, %s116_s22, [#allocation5] }
  0x3e   :  { %716 = vmatpush.bf16.msrb.mxu1 %v3613_v8  ;;  %v4630_v8 = vld [vmem:[#allocation12 + $0x14] sm:$0xf0]  ;;  %v3536_v62 = vld [vmem:[#allocation14 + $0x48] sm:$0xf] }
  0x3f   :  { %412 = vmatpush.bf16.msrb.mxu2 %v3473_v1  ;;  %v3393_v1 = vor.u32 %v4634_v58, %v3392_v57  ;;  %v3377_v17 = vor.u32 %v4630_v8, %v3376_v7  ;;  %v3553_v57 = vor.u32 %v4674_v54, %v3552_v53  ;;  %v3504_v8 = vld [vmem:[#allocation14 + $0x8] sm:$0xf] }
  0x40   :  { %441 = vmatpush.bf16.msrb.mxu3 %v3477_v4  ;;  %704 = vmatpush.bf16.msrb.mxu0 %v3593_v12  ;;  %v4665_v4 = vld [vmem:[#allocation14 + $0x2c] sm:$0xf0]  ;;  %v3514_v12 = vld [vmem:[#allocation14 + $0x30] sm:$0xf0] }
  0x41   :  { %v3513_v14 = vor.u32 %v4665_v4, %v3512_v3  ;;  %v3517_v21 = vor.u32 %v4663_v11, %v3514_v12  ;;  %v3520_v4 = vld [vmem:[#allocation14 + $0x28] sm:$0xf]  ;;  %v159_v11 = vld [vmem:[%s5665_s5] sm:$0xf] }
  0x42   :  { %717 = vmatpush.bf16.msrb.mxu1 %v3597_v20  ;;  %v3381_v20 = vor.u32 %v4628_v2, %v3378_v6  ;;  %v3506_v2 = vld [vmem:[#allocation14 + $0x18] sm:$0xf0] }
  0x43   :  { %413 = vmatpush.bf16.msrb.mxu2 %v3457_v13  ;;  %v3618_v13 = vld [vmem:[#allocation14 + $0xf8] sm:$0xf0] }
  0x44   :  { %442 = vmatpush.bf16.msrb.mxu3 %v3461_v16  ;;  %705 = vmatpush.bf16.msrb.mxu0 %v3577_v24  ;;  %v4690_v16 = vld [vmem:[#allocation14 + $0xf4] sm:$0xf0]  ;;  %v3621_v22 = vor.u32 %v4688_v10, %v3618_v13  ;;  %v4659_v24 = vld [vmem:[#allocation14 + $0x4] sm:$0xf]  ;;  %v5442_v13 = vperm.slane %v159_v11, 0 }
  0x45   :  { %v3617_v23 = vor.u32 %v4690_v16, %v3616_v15 }
  0x46   :  { %718 = vmatpush.bf16.msrb.mxu1 %v3581_v32  ;;  %v4686_v32 = vld [vmem:[#allocation14 + $0xd4] sm:$0xf0] }
  0x47   :  { %414 = vmatpush.bf16.msrb.mxu2 %v3441_v25  ;;  %v3498_v25 = vld [vmem:[#allocation14 + $0x10] sm:$0xf0] }
  0x48   :  { %443 = vmatpush.bf16.msrb.mxu3 %v3445_v28  ;;  %706 = vmatpush.bf16.msrb.mxu0 %v3561_v36  ;;  %v3497_v28 = vor.u32 %v4661_v19, %v3496_v18  ;;  %v3501_v30 = vor.u32 %v4659_v24, %v3498_v25  ;;  %v3586_v36 = vld [vmem:[#allocation14 + $0xb8] sm:$0xf0] }
  0x49   :  { %v3589_v41 = vor.u32 %v4680_v35, %v3586_v36 }
  0x4a   :  { %719 = vmatpush.bf16.msrb.mxu1 %v3565_v46  ;;  %376 = vmatmul.bf16.gmra.mxu2 %v5417_v37  ;;  %v4678_v46 = vld [vmem:[#allocation14 + $0x94] sm:$0xf0] }
  0x4b   :  { %415 = vmatpush.bf16.msrb.mxu2 %v3425_v38  ;;  %366 = vmatmul.bf16.gmra.mxu0 %v5419_v47  ;;  %v3601_v38 = vor.u32 %v4686_v32, %v3600_v31 }
  0x4c   :  { %444 = vmatpush.bf16.msrb.mxu3 %v3429_v42  ;;  %707 = vmatpush.bf16.msrb.mxu0 %v3545_v50  ;;  %v4676_v42 = vld [vmem:[#allocation14 + $0x8c] sm:$0xf]  ;;  %v3554_v50 = vld [vmem:[#allocation14 + $0x78] sm:$0xf0] }
  0x4d   :  { %405 = vmatmul.bf16.gmra.mxu3 %v5417_v37  ;;  %395 = vmatmul.bf16.gmra.mxu1 %v5419_v47  ;;  %v3573_v48 = vor.u32 %v4676_v42, %v3570_v43 }
  0x4e   :  { %720 = vmatpush.bf16.msrb.mxu1 %v3549_v59  ;;  %v4664_v59 = vld [vmem:[#allocation14 + $0x2c] sm:$0xf] }
  0x4f   :  { %416 = vmatpush.bf16.msrb.mxu2 %v3409_v51  ;;  %v3569_v51 = vor.u32 %v4678_v46, %v3568_v45  ;;  %v3525_v63 = vor.u32 %v4664_v59, %v3522_v60  ;;  %v5490_v45 = vperm.slane %v159_v11, 3 }
  0x50   :  { %445 = vmatpush.bf16.msrb.mxu3 %v3413_v55  ;;  %708 = vmatpush.bf16.msrb.mxu0 %v3529_v0  ;;  %v4668_v55 = vld [vmem:[#allocation14 + $0x4c] sm:$0xf]  ;;  %v4670_v0 = vld [vmem:[#allocation14 + $0x54] sm:$0xf0] }
  0x51   :  { %v3541_v58 = vor.u32 %v4668_v55, %v3538_v56  ;;  %v3537_v3 = vor.u32 %v4670_v0, %v3536_v62 }
  0x52   :  { %721 = vmatpush.bf16.msrb.mxu1 %v3533_v9  ;;  %v4662_v9 = vld [vmem:[#allocation14 + $0x14] sm:$0xf0] }
  0x53   :  { %417 = vmatpush.bf16.msrb.mxu2 %v3393_v1  ;;  %v4660_v1 = vld [vmem:[#allocation14 + $0xc] sm:$0xf]  ;;  %v3505_v10 = vor.u32 %v4662_v9, %v3504_v8  ;;  %v4721_v8 = vld [vmem:[#allocation14 + $0xec] sm:$0xf0]  ;;  %v4719_v9 = vld [vmem:[#allocation14 + $0xe4] sm:$0xf] }
  0x54   :  { %446 = vmatpush.bf16.msrb.mxu3 %v3397_v5  ;;  %709 = vmatpush.bf16.msrb.mxu0 %v3513_v14  ;;  %v4666_v5 = vld [vmem:[#allocation14 + $0x34] sm:$0xf0]  ;;  %v3509_v6 = vor.u32 %v4660_v1, %v3506_v2  ;;  %v5444_v14 = vperm.slane %v159_v11, 1 }
  0x55   :  { %v3521_v7 = vor.u32 %v4666_v5, %v3520_v4 }
  0x56   :  { %722 = vmatpush.bf16.msrb.mxu1 %v3517_v21 }
  0x57   :  { %418 = vmatpush.bf16.msrb.mxu2 %v3377_v17 }
  0x58   :  { %447 = vmatpush.bf16.msrb.mxu3 %v3381_v20  ;;  %710 = vmatpush.bf16.msrb.mxu0 %v3497_v28 }
  0x5a   :  { %723 = vmatpush.bf16.msrb.mxu1 %v3501_v30  ;;  %419 = vmatmul.bf16.vlgmr.msrb.gmra.mxu2 %v5411_v61 }
  0x5b   :  { %729 = vmatpush.bf16.msra.mxu2 %v3617_v23  ;;  %711 = vmatmul.bf16.vlgmr.msrb.gmra.mxu0 %v5425_v34 }
  0x5c   :  { %742 = vmatpush.bf16.msra.mxu3 %v3621_v22 }
  0x5d   :  { %448 = vmatmul.bf16.vlgmr.msrb.gmra.mxu3 %v5411_v61  ;;  %724 = vmatmul.bf16.vlgmr.msrb.gmra.mxu1 %v5425_v34  ;;  %v3557_v61 = vor.u32 %v4672_v49, %v3554_v50 }
  0x5f   :  { %730 = vmatpush.bf16.msra.mxu2 %v3601_v38 }
  0x60   :  { %743 = vmatpush.bf16.msra.mxu3 %v3605_v33 }
  0x63   :  { %731 = vmatpush.bf16.msra.mxu2 %v3585_v44  ;;  %v5488_v44 = vperm.slane %v159_v11, 2  ;;  %v3747_v11 = vld [vmem:[#allocation14 + $0xe8] sm:$0xf] }
  0x64   :  { %744 = vmatpush.bf16.msra.mxu3 %v3589_v41 }
  0x67   :  { %732 = vmatpush.bf16.msra.mxu2 %v3569_v51 }
  0x68   :  { %745 = vmatpush.bf16.msra.mxu3 %v3573_v48 }
  0x6a   :  { %424 = vmatmul.bf16.gmra.mxu2 %v5419_v47 }
  0x6b   :  { %733 = vmatpush.bf16.msra.mxu2 %v3553_v57 }
  0x6c   :  { %746 = vmatpush.bf16.msra.mxu3 %v3557_v61 }
  0x6d   :  { %453 = vmatmul.bf16.gmra.mxu3 %v5419_v47 }
  0x6f   :  { %734 = vmatpush.bf16.msra.mxu2 %v3537_v3 }
  0x70   :  { %747 = vmatpush.bf16.msra.mxu3 %v3541_v58 }
  0x73   :  { %735 = vmatpush.bf16.msra.mxu2 %v3521_v7  ;;  %v3739_v7 = vld [vmem:[#allocation14 + $0xe0] sm:$0xf] }
  0x74   :  { %748 = vmatpush.bf16.msra.mxu3 %v3525_v63 }
  0x77   :  { %736 = vmatpush.bf16.msra.mxu2 %v3505_v10  ;;  %v3740_v10 = vor.u32 %v4721_v8, %v3739_v7  ;;  %v3715_v7 = vld [vmem:[#allocation14 + $0xa8] sm:$0xf]  ;;  %v4714_v8 = vld [vmem:[#allocation14 + $0xb4] sm:$0xf0] }
  0x78   :  { %749 = vmatpush.bf16.msra.mxu3 %v3509_v6 }
  0x79   :  { %1023 = vmatpush.bf16.msra.mxu0 %v3740_v10  ;;  %v3716_v10 = vor.u32 %v4714_v8, %v3715_v7 }
  0x7a   :  { %429 = vmatmul.bf16.gmra.mxu2 %v5409_v52 }
  0x7d   :  { %458 = vmatmul.bf16.gmra.mxu3 %v5409_v52 }
  0x8a   :  { %434 = vmatmul.bf16.gmra.mxu2 %v5417_v37 }
  0x8d   :  { %463 = vmatmul.bf16.gmra.mxu3 %v5417_v37 }
  0x9a   :  { %737 = vmatmul.bf16.vlgmr.msra.gmra.mxu2 %v5425_v34 }
  0x9d   :  { %750 = vmatmul.bf16.vlgmr.msra.gmra.mxu3 %v5425_v34 }
  0xb7   :  { %v362_v47 = vpop.f32.mrf.mxu0 }
  0xb8   :  { %v363_v56 = vadd.f32 %v362_v47, %v5442_v13  ;;  %v3741_v47 = vld [vmem:[#allocation14 + $0xf0] sm:$0xf0] }
  0xba   :  { %v391_v12 = vpop.f32.mrf.mxu1 }
  0xbb   :  { %v392_v51 = vadd.f32 %v391_v12, %v5444_v14  ;;  %v4722_v12 = vld [vmem:[#allocation14 + $0xf4] sm:$0xf0] }
  0xbd   :  { %v372_v15 = vpop.f32.mrf.mxu2 }
  0xbe   :  { %v5447_v52 = vadd.f32 %v372_v15, %v5442_v13  ;;  %v401_v16 = vpop.f32.mrf.mxu3  ;;  %v3744_v15 = vor.u32 %v4719_v9, %v3741_v47  ;;  %v4712_v47 = vld [vmem:[#allocation14 + $0xac] sm:$0xf] }
  0xbf   :  { %v5450_v37 = vadd.f32 %v401_v16, %v5444_v14  ;;  %v364_v17 = vpop.f32.mrf.mxu0  ;;  %v3748_v16 = vor.u32 %v4722_v12, %v3747_v11  ;;  %v3717_v11 = vld [vmem:[#allocation14 + $0xb8] sm:$0xf0] }
  0xc0   :  { %v5453_v18 = vadd.f32 %v364_v17, %v5442_v13  ;;  %v4720_v17 = vld [vmem:[#allocation14 + $0xec] sm:$0xf]  ;;  %1036 = vmatpush.bf16.msra.mxu1 %v3744_v15  ;;  %v3720_v12 = vor.u32 %v4712_v47, %v3717_v11  ;;  %v3691_v15 = vld [vmem:[#allocation14 + $0x80] sm:$0xf]  ;;  %v3685_v47 = vld [vmem:[#allocation14 + $0x78] sm:$0xf0] }
  0xc1   :  { %1049 = vmatpush.bf16.msrb.mxu2 %v3748_v16  ;;  %v4709_v16 = vld [vmem:[#allocation14 + $0x8c] sm:$0xf0] }
  0xc2   :  { %v393_v19 = vpop.f32.mrf.mxu1 }
  0xc3   :  { %v5456_v20 = vadd.f32 %v393_v19, %v5444_v14  ;;  %v3749_v19 = vld [vmem:[#allocation14 + $0xf8] sm:$0xf0] }
  0xc5   :  { %v5458_v21 = vpop.f32.mrf.mxu2 }
  0xc6   :  { %v5460_v22 = vpop.f32.mrf.mxu3 }
  0xc8   :  { %v367_v23 = vpop.f32.mrf.mxu0 }
  0xc9   :  { %v5463_v24 = vadd.f32 %v367_v23, %v5442_v13 }
  0xca   :  { %v396_v25 = vpop.f32.mrf.mxu1 }
  0xcb   :  { %v5466_v26 = vadd.f32 %v396_v25, %v5444_v14 }
  0xcd   :  { %v377_v27 = vpop.f32.mrf.mxu2 }
  0xce   :  { %v5469_v28 = vadd.f32 %v377_v27, %v5442_v13  ;;  %v3752_v27 = vor.u32 %v4720_v17, %v3749_v19  ;;  %v4707_v17 = vld [vmem:[#allocation14 + $0x84] sm:$0xf]  ;;  %v3692_v19 = vor.u32 %v4709_v16, %v3691_v15  ;;  %v3659_v15 = vld [vmem:[#allocation14 + $0x40] sm:$0xf]  ;;  %v4701_v16 = vld [vmem:[#allocation14 + $0x4c] sm:$0xf0] }
  0xd0   :  { %v406_v29 = vpop.f32.mrf.mxu3  ;;  %v369_v31 = vpop.f32.mrf.mxu0  ;;  %1062 = vmatpush.bf16.msrb.mxu3 %v3752_v27  ;;  %v3699_v27 = vld [vmem:[#allocation14 + $0x88] sm:$0xf] }
  0xd1   :  { %v5472_v30 = vadd.f32 %v406_v29, %v5444_v14  ;;  %v5475_v32 = vadd.f32 %v369_v31, %v5442_v13  ;;  %v3723_v29 = vld [vmem:[#allocation14 + $0xc0] sm:$0xf]  ;;  %v4717_v31 = vld [vmem:[#allocation14 + $0xcc] sm:$0xf0] }
  0xd2   :  { %v398_v33 = vpop.f32.mrf.mxu1 }
  0xd3   :  { %v5478_v34 = vadd.f32 %v398_v33, %v5444_v14  ;;  %v4715_v33 = vld [vmem:[#allocation14 + $0xc4] sm:$0xf] }
  0xd5   :  { %v5480_v35 = vpop.f32.mrf.mxu2 }
  0xd8   :  { %v5482_v36 = vpop.f32.mrf.mxu3  ;;  %v712_v38 = vpop.f32.mrf.mxu0 }
  0xd9   :  { %v755_v58 = vadd.f32 %v712_v38, %v363_v56  ;;  %v3724_v38 = vor.u32 %v4717_v31, %v3723_v29  ;;  %v3733_v56 = vld [vmem:[#allocation14 + $0xd8] sm:$0xf0]  ;;  %v4710_v29 = vld [vmem:[#allocation14 + $0x94] sm:$0xf0] }
  0xda   :  { %v725_v39 = vpop.f32.mrf.mxu1 }
  0xdb   :  { %v756_v57 = vadd.f32 %v725_v39, %v392_v51  ;;  %v3622_v1 = vmul.f32 -1.442695, %v755_v58  ;;  %v3725_v39 = vld [vmem:[#allocation14 + $0xd0] sm:$0xf0]  ;;  %1024 = vmatpush.bf16.msra.mxu0 %v3724_v38  ;;  %v3700_v38 = vor.u32 %v4710_v29, %v3699_v27  ;;  %v3667_v27 = vld [vmem:[#allocation14 + $0x48] sm:$0xf] }
  0xdc   :  { %v3728_v51 = vor.u32 %v4715_v33, %v3725_v39  ;;  %v4708_v39 = vld [vmem:[#allocation14 + $0x8c] sm:$0xf]  ;;  %v4702_v29 = vld [vmem:[#allocation14 + $0x54] sm:$0xf0] }
  0xdd   :  { %v5484_v40 = vpop.f32.mrf.mxu2  ;;  %v3623_v59 = vmul.f32 -1.442695, %v756_v57 }
  0xde   :  { %1037 = vmatpush.bf16.msra.mxu1 %v3728_v51 }
  0xdf   :  { %4964 = vpow2.f32 %v3623_v59 }
  0xe0   :  { %v5486_v41 = vpop.f32.mrf.mxu3  ;;  %v714_v42 = vpop.f32.mrf.mxu0  ;;  %4966 = vpow2.f32 %v3622_v1  ;;  %v4713_v1 = vld [vmem:[#allocation14 + $0xac] sm:$0xf0] }
  0xe1   :  { %v3731_v42 = vld [vmem:[#allocation14 + $0xc8] sm:$0xf] }
  0xe2   :  { %v727_v43 = vpop.f32.mrf.mxu1 }
  0xe3   :  { %v4718_v43 = vld [vmem:[#allocation14 + $0xd4] sm:$0xf0] }
  0xe5   :  { %v422_v46 = vpop.f32.mrf.mxu2  ;;  %v4965_v5 = vpop.eup %4964 }
  0xe6   :  { %v5493_v48 = vadd.f32 %v422_v46, %v5488_v44  ;;  %v4967_v23 = vpop.eup %4966  ;;  %v5518_v25 = vadd.f32 1.0, %v4965_v5  ;;  %v3709_v5 = vld [vmem:[#allocation14 + $0xb0] sm:$0xf0] }
  0xe7   :  { %v5520_v46 = vadd.f32 1.0, %v4967_v23  ;;  %v3693_v23 = vld [vmem:[#allocation14 + $0x90] sm:$0xf0] }
  0xe8   :  { %v451_v49 = vpop.f32.mrf.mxu3  ;;  %4968 = vrcp.f32 %v5518_v25  ;;  %v3696_v33 = vor.u32 %v4707_v17, %v3693_v23  ;;  %v4699_v17 = vld [vmem:[#allocation14 + $0x44] sm:$0xf]  ;;  %v3661_v23 = vld [vmem:[#allocation14 + $0x50] sm:$0xf0]  ;;  %vm787_vm0 = vweird.f32 %v5518_v25 }
  0xe9   :  { %v5496_v50 = vadd.f32 %v451_v49, %v5490_v45  ;;  %4970 = vrcp.f32 %v5520_v46  ;;  %vm768_vm2 = vweird.f32 %v5520_v46 }
  0xed   :  { %v425_v53 = vpop.f32.mrf.mxu2 }
  0xee   :  { %v5500_v54 = vadd.f32 %v425_v53, %v5488_v44  ;;  %v3732_v53 = vor.u32 %v4718_v43, %v3731_v42  ;;  %v3701_v42 = vld [vmem:[#allocation14 + $0x98] sm:$0xf0]  ;;  %v5530_v43 = vpop.eup %4968 }
  0xef   :  { %v783_v7 = vmul.f32 %v5530_v43, %v5518_v25  ;;  %vm788_vm1 = vweird.f32 %v5530_v43 }
  0xf0   :  { %v454_v61 = vpop.f32.mrf.mxu3  ;;  %1050 = vmatpush.bf16.msrb.mxu2 %v3732_v53  ;;  %v3704_v53 = vor.u32 %v4708_v39, %v3701_v42  ;;  %v3668_v39 = vor.u32 %v4702_v29, %v3667_v27  ;;  %v4700_v42 = vld [vmem:[#allocation14 + $0x4c] sm:$0xf]  ;;  %v4693_v27 = vld [vmem:[#allocation14 + $0xc] sm:$0xf0]  ;;  %v4691_v29 = vld [vmem:[#allocation14 + $0x4] sm:$0xf] }
  0xf1   :  { %v5503_v55 = vadd.f32 %v454_v61, %v5490_v45  ;;  %v4716_v61 = vld [vmem:[#allocation14 + $0xcc] sm:$0xf]  ;;  %vm5567_vm4 = vmor %vm787_vm0, %vm788_vm1 }
  0xf2   :  { %v3736_v59 = vor.u32 %v4716_v61, %v3733_v56  ;;  %v5535_v61 = vpop.eup %4970 }
  0xf3   :  { %v764_v11 = vmul.f32 %v5535_v61, %v5520_v46  ;;  %vm769_vm3 = vweird.f32 %v5535_v61 }
  0xf4   :  { %1063 = vmatpush.bf16.msrb.mxu3 %v3736_v59  ;;  %1051 = vmatpush.bf16.msrb.mxu2 %v3716_v10  ;;  %v4705_v59 = vld [vmem:[#allocation14 + $0x6c] sm:$0xf0]  ;;  %v4704_v10 = vld [vmem:[#allocation14 + $0x6c] sm:$0xf]  ;;  %vm770_vm5 = vmor %vm768_vm2, %vm769_vm3 }
  0xf5   :  { %v427_v60 = vpop.f32.mrf.mxu2 }
  0xf6   :  { %v5507_v62 = vadd.f32 %v427_v60, %v5488_v44 }
  0xf8   :  { %v456_v63 = vpop.f32.mrf.mxu3  ;;  %1064 = vmatpush.bf16.msrb.mxu3 %v3720_v12  ;;  %1052 = vmatpush.bf16.msrb.mxu2 %v3700_v38  ;;  %v3688_v12 = vor.u32 %v4704_v10, %v3685_v47  ;;  %v3664_v38 = vor.u32 %v4699_v17, %v3661_v23  ;;  %v4698_v10 = vld [vmem:[#allocation14 + $0x34] sm:$0xf0]  ;;  %v3627_v17 = vld [vmem:[#allocation14] sm:$0xf] }
  0xf9   :  { %v5510_v0 = vadd.f32 %v456_v63, %v5490_v45  ;;  %v3707_v63 = vld [vmem:[#allocation14 + $0xa0] sm:$0xf] }
  0xfc   :  { %1065 = vmatpush.bf16.msrb.mxu3 %v3704_v53  ;;  %v765_v53 = vsub.f32 1.0, %v764_v11 }
  0xfd   :  { %v430_v2 = vpop.f32.mrf.mxu2 }
  0xfe   :  { %v5513_v3 = vadd.f32 %v430_v2, %v5488_v44  ;;  %v4711_v2 = vld [vmem:[#allocation14 + $0xa4] sm:$0xf] }
  0xff   :  { %v3712_v9 = vor.u32 %v4711_v2, %v3709_v5  ;;  %v3677_v2 = vld [vmem:[#allocation14 + $0x70] sm:$0xf0]  ;;  %v4706_v5 = vld [vmem:[#allocation14 + $0x74] sm:$0xf0] }
 0x100   :  { %v459_v4 = vpop.f32.mrf.mxu3  ;;  %1066 = vmatpush.bf16.msrb.mxu3 %v3688_v12 }
 0x101   :  { %v5516_v6 = vadd.f32 %v459_v4, %v5490_v45  ;;  %v3708_v4 = vor.u32 %v4713_v1, %v3707_v63  ;;  %1038 = vmatpush.bf16.msra.mxu1 %v3712_v9  ;;  %v4703_v63 = vld [vmem:[#allocation14 + $0x64] sm:$0xf] }
 0x102   :  { %v3680_v8 = vor.u32 %v4703_v63, %v3677_v2  ;;  %v3643_v2 = vld [vmem:[#allocation14 + $0x20] sm:$0xf] }
 0x103   :  { %1025 = vmatpush.bf16.msra.mxu0 %v3708_v4  ;;  %v3683_v4 = vld [vmem:[#allocation14 + $0x68] sm:$0xf] }
 0x104   :  { %v3684_v9 = vor.u32 %v4706_v5, %v3683_v4  ;;  %v4697_v4 = vld [vmem:[#allocation14 + $0x2c] sm:$0xf0]  ;;  %v4695_v5 = vld [vmem:[#allocation14 + $0x24] sm:$0xf] }
 0x105   :  { %v432_v49 = vpop.f32.mrf.mxu2  ;;  %1039 = vmatpush.bf16.msra.mxu1 %v3696_v33 }
 0x106   :  { %v5523_v57 = vadd.f32 %v432_v49, %v5488_v44  ;;  %1053 = vmatpush.bf16.msrb.mxu2 %v3684_v9  ;;  %v3651_v9 = vld [vmem:[#allocation14 + $0x28] sm:$0xf] }
 0x107   :  { %1026 = vmatpush.bf16.msra.mxu0 %v3692_v19  ;;  %v3660_v19 = vor.u32 %v4701_v16, %v3659_v15  ;;  %v3652_v12 = vor.u32 %v4698_v10, %v3651_v9  ;;  %v4696_v15 = vld [vmem:[#allocation14 + $0x2c] sm:$0xf]  ;;  %v3653_v16 = vld [vmem:[#allocation14 + $0x38] sm:$0xf0] }
 0x108   :  { %v461_v58 = vpop.f32.mrf.mxu3  ;;  %v3656_v23 = vor.u32 %v4696_v15, %v3653_v16 }
 0x109   :  { %v5526_v60 = vadd.f32 %v461_v58, %v5490_v45  ;;  %v3675_v58 = vld [vmem:[#allocation14 + $0x60] sm:$0xf]  ;;  %1040 = vmatpush.bf16.msra.mxu1 %v3680_v8  ;;  %v3645_v8 = vld [vmem:[#allocation14 + $0x30] sm:$0xf0] }
 0x10a   :  { %v3676_v1 = vor.u32 %v4705_v59, %v3675_v58  ;;  %1054 = vmatpush.bf16.msrb.mxu2 %v3668_v39  ;;  %v3648_v11 = vor.u32 %v4695_v5, %v3645_v8  ;;  %v791_v5 = vand.u32 2147483647, %v5518_v25  ;;  %v774_v8 = vand.u32 2147483648, %v5520_v46 }
 0x10c   :  { %1027 = vmatpush.bf16.msra.mxu0 %v3676_v1  ;;  %vm792_vm6 = vcmp.eq.f32.partialorder %v791_v5, 8.507059e+37  ;;  %v775_v16 = vor.u32 1.1754944e-38, %v774_v8  ;;  %v3870_v8 = vld [vmem:[#allocation14 + $0xe0] sm:$0xf] }
 0x10d   :  { %v435_v31 = vpop.f32.mrf.mxu2  ;;  %1041 = vmatpush.bf16.msra.mxu1 %v3664_v38  ;;  %v766_v38 = vmul.f32 %v5535_v61, %v765_v53 }
 0x10e   :  { %v5533_v49 = vadd.f32 %v435_v31, %v5488_v44  ;;  %v784_v31 = vsub.f32 1.0, %v783_v7  ;;  %v3644_v7 = vor.u32 %v4697_v4, %v3643_v2  ;;  %1055 = vmatpush.bf16.msrb.mxu2 %v3652_v12  ;;  %v3637_v2 = vld [vmem:[#allocation14 + $0x18] sm:$0xf0] }
 0x10f   :  { %v767_v10 = vadd.f32 %v5535_v61, %v766_v38 }
 0x110   :  { %v464_v51 = vpop.f32.mrf.mxu3  ;;  %1028 = vmatpush.bf16.msra.mxu0 %v3660_v19  ;;  %v785_v47 = vmul.f32 %v5530_v43, %v784_v31  ;;  %v421_v19 = vadd.f32 %v5484_v40, %v5488_v44  ;;  %v3628_v31 = vor.u32 %v4693_v27, %v3627_v17  ;;  %v450_v40 = vadd.f32 %v5486_v41, %v5490_v45 }
 0x111   :  { %v5538_v56 = vadd.f32 %v464_v51, %v5490_v45  ;;  %v3669_v51 = vld [vmem:[#allocation14 + $0x58] sm:$0xf0]  ;;  %1042 = vmatpush.bf16.msra.mxu1 %v3648_v11  ;;  %v771_v17 = vsel %vm770_vm5, %v5535_v61, %v767_v10  ;;  %v4751_v10 = vld [vmem:[#allocation14 + $0xe4] sm:$0xf] }
 0x112   :  { %v3672_v63 = vor.u32 %v4700_v42, %v3669_v51  ;;  %v3635_v42 = vld [vmem:[#allocation14 + $0x8] sm:$0xf]  ;;  %v4694_v51 = vld [vmem:[#allocation14 + $0x14] sm:$0xf0]  ;;  %v786_v53 = vadd.f32 %v5530_v43, %v785_v47  ;;  %v772_v47 = vand.u32 2147483647, %v5520_v46 }
 0x114   :  { %1067 = vmatpush.bf16.msrb.mxu3 %v3672_v63  ;;  %1029 = vmatpush.bf16.msra.mxu0 %v3644_v7  ;;  %v3636_v63 = vor.u32 %v4694_v51, %v3635_v42  ;;  %vm773_vm7 = vcmp.eq.f32.partialorder %v772_v47, 8.507059e+37 }
 0x115   :  { %v437_v33 = vpop.f32.mrf.mxu2 }
 0x116   :  { %v5545_v58 = vadd.f32 %v437_v33, %v5488_v44  ;;  %v3629_v33 = vld [vmem:[#allocation14 + $0x10] sm:$0xf0]  ;;  %v793_v44 = vand.u32 2147483648, %v5518_v25  ;;  %1056 = vmatpush.bf16.msrb.mxu2 %v3636_v63  ;;  %v790_v25 = vsel %vm5567_vm4, %v5530_v43, %v786_v53 }
 0x117   :  { %v3632_v39 = vor.u32 %v4691_v29, %v3629_v33  ;;  %v776_v33 = vsel %vm773_vm7, %v775_v16, %v771_v17  ;;  %v4752_v17 = vld [vmem:[#allocation14 + $0xec] sm:$0xf] }
 0x118   :  { %v466_v59 = vpop.f32.mrf.mxu3  ;;  %1068 = vmatpush.bf16.msrb.mxu3 %v3656_v23  ;;  %1030 = vmatpush.bf16.msra.mxu0 %v3628_v31  ;;  %v794_v12 = vor.u32 1.1754944e-38, %v793_v44 }
 0x119   :  { %v5548_v1 = vadd.f32 %v466_v59, %v5490_v45  ;;  %v4692_v59 = vld [vmem:[#allocation14 + $0xc] sm:$0xf]  ;;  %1043 = vmatpush.bf16.msra.mxu1 %v3632_v39 }
 0x11a   :  { %v3640_v7 = vor.u32 %v4692_v59, %v3637_v2  ;;  %v795_v23 = vsel %vm792_vm6, %v794_v12, %v790_v25  ;;  %v3878_v12 = vld [vmem:[#allocation14 + $0xe8] sm:$0xf]  ;;  %v4754_v25 = vld [vmem:[#allocation14 + $0xf4] sm:$0xf0] }
 0x11b   :  { %v3879_v16 = vor.u32 %v4754_v25, %v3878_v12  ;;  %v4739_v12 = vld [vmem:[#allocation14 + $0x84] sm:$0xf] }
 0x11c   :  { %1069 = vmatpush.bf16.msrb.mxu3 %v3640_v7 }
 0x11d   :  { %v738_v4 = vpop.f32.mrf.mxu2  ;;  %1370 = vmatpush.bf16.msra.mxu2 %v3879_v16  ;;  %v3830_v16 = vld [vmem:[#allocation14 + $0x88] sm:$0xf] }
 0x11e   :  { %v757_v45 = vadd.f32 %v738_v4, %v421_v19  ;;  %v502_v19 = vld [vmem:[#allocation11] sm:$0xff] }
 0x11f   :  { %v817_v38 = vmul.f32 %v795_v23, %v502_v19  ;;  %v3880_v19 = vld [vmem:[#allocation14 + $0xf8] sm:$0xf0] }
 0x120   :  { %v751_v9 = vpop.f32.mrf.mxu3  ;;  %4972 = vtanh.f32 %v757_v45  ;;  %v3883_v23 = vor.u32 %v4752_v17, %v3880_v19  ;;  %v4742_v17 = vld [vmem:[#allocation14 + $0x94] sm:$0xf0] }
 0x121   :  { %v758_v11 = vadd.f32 %v751_v9, %v450_v40  ;;  %v4753_v9 = vld [vmem:[#allocation14 + $0xec] sm:$0xf0] }
 0x122   :  { %v3871_v47 = vor.u32 %v4753_v9, %v3870_v8  ;;  %1383 = vmatpush.bf16.msra.mxu3 %v3883_v23  ;;  %v4744_v8 = vld [vmem:[#allocation14 + $0xac] sm:$0xf]  ;;  %v3848_v9 = vld [vmem:[#allocation14 + $0xb8] sm:$0xf0]  ;;  %v3831_v23 = vor.u32 %v4742_v17, %v3830_v16  ;;  %v3774_v17 = vld [vmem:[#allocation14 + $0x20] sm:$0xf] }
 0x123   :  { %v3624_v15 = vmul.f32 -1.442695, %v758_v11  ;;  %v3872_v11 = vld [vmem:[#allocation14 + $0xf0] sm:$0xf0]  ;;  %v4732_v16 = vld [vmem:[#allocation14 + $0x4c] sm:$0xf] }
 0x124   :  { %1344 = vmatpush.bf16.msrb.mxu0 %v3871_v47  ;;  %v3822_v47 = vld [vmem:[#allocation14 + $0x80] sm:$0xf] }
 0x125   :  { %4974 = vpow2.f32 %v3624_v15  ;;  %v740_v27 = vpop.f32.mrf.mxu2  ;;  %v3875_v15 = vor.u32 %v4751_v10, %v3872_v11  ;;  %v3851_v10 = vor.u32 %v4744_v8, %v3848_v9  ;;  %v4741_v11 = vld [vmem:[#allocation14 + $0x8c] sm:$0xf0]  ;;  %v4731_v8 = vld [vmem:[#allocation14 + $0x44] sm:$0xf] }
 0x126   :  { %v4973_v29 = vpop.eup %4972  ;;  %v3854_v27 = vld [vmem:[#allocation14 + $0xc0] sm:$0xf]  ;;  %v3823_v25 = vor.u32 %v4741_v11, %v3822_v47  ;;  %v3792_v11 = vld [vmem:[#allocation14 + $0x50] sm:$0xf0] }
 0x127   :  { %v818_v31 = vmul.f32 %v4973_v29, %v776_v33  ;;  %1357 = vmatpush.bf16.msrb.mxu1 %v3875_v15  ;;  %v4749_v29 = vld [vmem:[#allocation14 + $0xcc] sm:$0xf0]  ;;  %v4747_v33 = vld [vmem:[#allocation14 + $0xc4] sm:$0xf]  ;;  %v3824_v15 = vld [vmem:[#allocation14 + $0x90] sm:$0xf0] }
 0x128   :  { %v753_v46 = vpop.f32.mrf.mxu3  ;;  %v3827_v19 = vor.u32 %v4739_v12, %v3824_v15  ;;  %v3795_v12 = vor.u32 %v4731_v8, %v3792_v11  ;;  %v4734_v15 = vld [vmem:[#allocation14 + $0x54] sm:$0xf0]  ;;  %v3768_v11 = vld [vmem:[#allocation14 + $0x18] sm:$0xf0] }
 0x129   :  { %v5582_v42 = vadd.f32 %v818_v31, %v817_v38  ;;  %v3855_v46 = vor.u32 %v4749_v29, %v3854_v27  ;;  %v3856_v38 = vld [vmem:[#allocation14 + $0xd0] sm:$0xf0]  ;;  %v3862_v31 = vld [vmem:[#allocation14 + $0xc8] sm:$0xf]  ;;  %v4740_v27 = vld [vmem:[#allocation14 + $0x8c] sm:$0xf] }
 0x12a   :  { %v3832_v29 = vld [vmem:[#allocation14 + $0x98] sm:$0xf0]  ;;  %v4726_v8 = vld [vmem:[#allocation14 + $0x14] sm:$0xf0] }
 0x12b   :  { %v4975_v39 = vpop.eup %4974  ;;  %1345 = vmatpush.bf16.msrb.mxu0 %v3855_v46  ;;  %v3806_v46 = vld [vmem:[#allocation14 + $0x60] sm:$0xf] }
 0x12c   :  { %v801_v51 = vadd.f32 1.0, %v4975_v39  ;;  %v4750_v39 = vld [vmem:[#allocation14 + $0xd4] sm:$0xf0] }
 0x12e   :  { %4976 = vrcp.f32 %v801_v51  ;;  %v813_v61 = vand.u32 2147483648, %v801_v51  ;;  %v811_v63 = vand.u32 2147483647, %v801_v51  ;;  %vm807_vm9 = vweird.f32 %v801_v51 }
 0x12f   :  { %4978 = vtanh.f32 %v5582_v42 }
 0x130   :  { %v814_v4 = vor.u32 1.1754944e-38, %v813_v61  ;;  %vm812_vm11 = vcmp.eq.f32.partialorder %v811_v63, 8.507059e+37  ;;  %v4745_v63 = vld [vmem:[#allocation14 + $0xac] sm:$0xf0] }
 0x134   :  { %v4977_v43 = vpop.eup %4976 }
 0x135   :  { %v803_v59 = vmul.f32 %v4977_v43, %v801_v51  ;;  %vm808_vm8 = vweird.f32 %v4977_v43  ;;  %v4979_v5 = vpop.eup %4978  ;;  %v3859_v51 = vor.u32 %v4747_v33, %v3856_v38  ;;  %v3835_v33 = vor.u32 %v4740_v27, %v3832_v29  ;;  %v4737_v38 = vld [vmem:[#allocation14 + $0x6c] sm:$0xf0]  ;;  %v4727_v29 = vld [vmem:[#allocation14 + $0x24] sm:$0xf] }
 0x136   :  { %vm809_vm10 = vmor %vm807_vm9, %vm808_vm8 }
 0x137   :  { %v804_v40 = vsub.f32 1.0, %v803_v59  ;;  %v4748_v59 = vld [vmem:[#allocation14 + $0xcc] sm:$0xf]  ;;  %1358 = vmatpush.bf16.msrb.mxu1 %v3859_v51  ;;  %v3808_v51 = vld [vmem:[#allocation14 + $0x70] sm:$0xf0] }
 0x139   :  { %v805_v44 = vmul.f32 %v4977_v43, %v804_v40  ;;  %v3864_v40 = vld [vmem:[#allocation14 + $0xd8] sm:$0xf0] }
 0x13a   :  { %v3867_v61 = vor.u32 %v4748_v59, %v3864_v40  ;;  %v4738_v59 = vld [vmem:[#allocation14 + $0x74] sm:$0xf0] }
 0x13b   :  { %v806_v2 = vadd.f32 %v4977_v43, %v805_v44  ;;  %v3838_v44 = vld [vmem:[#allocation14 + $0xa0] sm:$0xf] }
 0x13c   :  { %1384 = vmatpush.bf16.msra.mxu3 %v3867_v61 }
 0x13d   :  { %v810_v53 = vsel %vm809_vm10, %v4977_v43, %v806_v2  ;;  %v3863_v43 = vor.u32 %v4750_v39, %v3862_v31  ;;  %v4743_v2 = vld [vmem:[#allocation14 + $0xa4] sm:$0xf]  ;;  %v3807_v39 = vor.u32 %v4737_v38, %v3806_v46  ;;  %v3782_v46 = vld [vmem:[#allocation14 + $0x28] sm:$0xf] }
 0x13e   :  { %v815_v7 = vsel %vm812_vm11, %v814_v4, %v810_v53  ;;  %v3839_v4 = vor.u32 %v4745_v63, %v3838_v44  ;;  %v3840_v53 = vld [vmem:[#allocation14 + $0xb0] sm:$0xf0]  ;;  %v4735_v31 = vld [vmem:[#allocation14 + $0x64] sm:$0xf] }
 0x13f   :  { %v821_v41 = vmul.f32 %v4979_v5, %v815_v7  ;;  %1371 = vmatpush.bf16.msra.mxu2 %v3863_v43  ;;  %v3846_v5 = vld [vmem:[#allocation14 + $0xa8] sm:$0xf]  ;;  %v4746_v7 = vld [vmem:[#allocation14 + $0xb4] sm:$0xf0]  ;;  %v3811_v44 = vor.u32 %v4735_v31, %v3808_v51 }
 0x140   :  { %1346 = vmatpush.bf16.msrb.mxu0 %v3839_v4  ;;  %1385 = vmatpush.bf16.msra.mxu3 %v3851_v10  ;;  %v3814_v43 = vld [vmem:[#allocation14 + $0x68] sm:$0xf]  ;;  %v3816_v4 = vld [vmem:[#allocation14 + $0x78] sm:$0xf0]  ;;  %v4730_v51 = vld [vmem:[#allocation14 + $0x34] sm:$0xf0] }
 0x141   :  { %v822_v45 = vpack.c.bf16 %v821_v41, %v821_v41  ;;  %v3843_v41 = vor.u32 %v4743_v2, %v3840_v53  ;;  %v3815_v63 = vor.u32 %v4738_v59, %v3814_v43  ;;  %v4736_v2 = vld [vmem:[#allocation14 + $0x6c] sm:$0xf]  ;;  %v3784_v59 = vld [vmem:[#allocation14 + $0x38] sm:$0xf0] }
 0x142   :  { %v4728_v43 = vld [vmem:[#allocation14 + $0x2c] sm:$0xf] }
 0x143   :  { %823 = vst [vmem:[#allocation3] sm:$0xf] %v822_v45  ;;  %1031 = vmatmul.bf16.vlgmr.msra.gmra.mxu0 %v822_v45  ;;  %1044 = vmatmul.bf16.vlgmr.msra.gmra.mxu1 %v822_v45 }
 0x144   :  { %1057 = vmatmul.bf16.vlgmr.msrb.gmra.mxu2 %v822_v45  ;;  %1070 = vmatmul.bf16.vlgmr.msrb.gmra.mxu3 %v822_v45  ;;  %v3847_v45 = vor.u32 %v4746_v7, %v3846_v5  ;;  %v3819_v7 = vor.u32 %v4736_v2, %v3816_v4  ;;  %v3787_v2 = vor.u32 %v4728_v43, %v3784_v59  ;;  %v3758_v4 = vld [vmem:[#allocation14] sm:$0xf] }
 0x145   :  { %1359 = vmatpush.bf16.msrb.mxu1 %v3843_v41  ;;  %1347 = vmatpush.bf16.msrb.mxu0 %v3823_v25  ;;  %v3790_v41 = vld [vmem:[#allocation14 + $0x40] sm:$0xf]  ;;  %v3798_v25 = vld [vmem:[#allocation14 + $0x48] sm:$0xf] }
 0x146   :  { %1372 = vmatpush.bf16.msra.mxu2 %v3847_v45  ;;  %1386 = vmatpush.bf16.msra.mxu3 %v3835_v33  ;;  %v4733_v45 = vld [vmem:[#allocation14 + $0x4c] sm:$0xf0]  ;;  %v3776_v33 = vld [vmem:[#allocation14 + $0x30] sm:$0xf0] }
 0x147   :  { %v3791_v47 = vor.u32 %v4733_v45, %v3790_v41  ;;  %v3760_v41 = vld [vmem:[#allocation14 + $0x10] sm:$0xf0]  ;;  %v3766_v45 = vld [vmem:[#allocation14 + $0x8] sm:$0xf] }
 0x149   :  { %1360 = vmatpush.bf16.msrb.mxu1 %v3827_v19  ;;  %1348 = vmatpush.bf16.msrb.mxu0 %v3807_v39  ;;  %v4729_v19 = vld [vmem:[#allocation14 + $0x2c] sm:$0xf0]  ;;  %v3779_v39 = vor.u32 %v4727_v29, %v3776_v33 }
 0x14a   :  { %1373 = vmatpush.bf16.msra.mxu2 %v3831_v23  ;;  %1387 = vmatpush.bf16.msra.mxu3 %v3819_v7  ;;  %v3775_v27 = vor.u32 %v4729_v19, %v3774_v17 }
 0x14d   :  { %1361 = vmatpush.bf16.msrb.mxu1 %v3811_v44  ;;  %1349 = vmatpush.bf16.msrb.mxu0 %v3791_v47  ;;  %v4724_v47 = vld [vmem:[#allocation14 + $0xc] sm:$0xf] }
 0x14e   :  { %1374 = vmatpush.bf16.msra.mxu2 %v3815_v63  ;;  %v3783_v63 = vor.u32 %v4730_v51, %v3782_v46 }
 0x151   :  { %1362 = vmatpush.bf16.msrb.mxu1 %v3795_v12  ;;  %1350 = vmatpush.bf16.msrb.mxu0 %v3775_v27 }
 0x155   :  { %1363 = vmatpush.bf16.msrb.mxu1 %v3779_v39 }
 0x1c0   :  { %v1032_v40 = vpop.f32.mrf.mxu0  ;;  %v1045_v61 = vpop.f32.mrf.mxu1 }
 0x1c1   :  { %v1075_v53 = vadd.f32 %v1032_v40, %v5453_v18  ;;  %v1076_v5 = vadd.f32 %v1045_v61, %v5456_v20  ;;  %v3799_v18 = vor.u32 %v4734_v15, %v3798_v25  ;;  %v3800_v20 = vld [vmem:[#allocation14 + $0x58] sm:$0xf0] }
 0x1c2   :  { %v3803_v23 = vor.u32 %v4732_v16, %v3800_v20  ;;  %v3771_v16 = vor.u32 %v4724_v47, %v3768_v11 }
 0x1c3   :  { %v3753_v9 = vmul.f32 -1.442695, %v1075_v53  ;;  %v3754_v10 = vmul.f32 -1.442695, %v1076_v5  ;;  %1375 = vmatpush.bf16.msra.mxu2 %v3799_v18  ;;  %v4725_v53 = vld [vmem:[#allocation14 + $0xc] sm:$0xf0] }
 0x1c4   :  { %1388 = vmatpush.bf16.msra.mxu3 %v3803_v23  ;;  %v4723_v5 = vld [vmem:[#allocation14 + $0x4] sm:$0xf]  ;;  %v3759_v7 = vor.u32 %v4725_v53, %v3758_v4 }
 0x1c5   :  { %4980 = vpow2.f32 %v3753_v9 }
 0x1c6   :  { %4982 = vpow2.f32 %v3754_v10  ;;  %v3763_v10 = vor.u32 %v4723_v5, %v3760_v41  ;;  %1351 = vmatpush.bf16.msrb.mxu0 %v3759_v7 }
 0x1c7   :  { %v1058_v38 = vpop.f32.mrf.mxu2  ;;  %v1071_v31 = vpop.f32.mrf.mxu3  ;;  %1376 = vmatpush.bf16.msra.mxu2 %v3783_v63 }
 0x1c8   :  { %v1078_v40 = vadd.f32 %v1071_v31, %v5496_v50  ;;  %v1034_v61 = vpop.f32.mrf.mxu0  ;;  %v1047_v44 = vpop.f32.mrf.mxu1  ;;  %v3767_v50 = vor.u32 %v4726_v8, %v3766_v45  ;;  %1389 = vmatpush.bf16.msra.mxu3 %v3787_v2  ;;  %1364 = vmatpush.bf16.msrb.mxu1 %v3763_v10  ;;  %v1077_v29 = vadd.f32 %v1058_v38, %v5493_v48 }
 0x1ca   :  { %v3755_v9 = vmul.f32 -1.442695, %v1078_v40 }
 0x1cb   :  { %v4981_v12 = vpop.eup %4980  ;;  %1377 = vmatpush.bf16.msra.mxu2 %v3767_v50 }
 0x1cc   :  { %v4983_v25 = vpop.eup %4982  ;;  %v1082_v15 = vadd.f32 1.0, %v4981_v12  ;;  %4984 = vpow2.f32 %v3755_v9  ;;  %1390 = vmatpush.bf16.msra.mxu3 %v3771_v16 }
 0x1cd   :  { %v1101_v18 = vadd.f32 1.0, %v4983_v25 }
 0x1ce   :  { %4986 = vrcp.f32 %v1082_v15  ;;  %v1094_v43 = vand.u32 2147483648, %v1082_v15  ;;  %v1092_v61 = vand.u32 2147483647, %v1082_v15  ;;  %vm1088_vm14 = vweird.f32 %v1082_v15 }
 0x1cf   :  { %4988 = vrcp.f32 %v1101_v18  ;;  %v1060_v20 = vpop.f32.mrf.mxu2  ;;  %v1073_v17 = vpop.f32.mrf.mxu3  ;;  %v1113_v59 = vand.u32 2147483648, %v1101_v18  ;;  %v1111_v63 = vand.u32 2147483647, %v1101_v18  ;;  %vm1107_vm15 = vweird.f32 %v1101_v18 }
 0x1d0   :  { %v1095_v48 = vor.u32 1.1754944e-38, %v1094_v43  ;;  %vm1093_vm2 = vcmp.eq.f32.partialorder %v1092_v61, 8.507059e+37  ;;  %v4011_v61 = vld [vmem:[#allocation14 + $0xf8] sm:$0xf0] }
 0x1d1   :  { %v1114_v5 = vor.u32 1.1754944e-38, %v1113_v59  ;;  %vm1112_vm3 = vcmp.eq.f32.partialorder %v1111_v63, 8.507059e+37  ;;  %v3985_v63 = vld [vmem:[#allocation14 + $0xc0] sm:$0xf] }
 0x1d2   :  { %v4985_v19 = vpop.eup %4984 }
 0x1d3   :  { %v1121_v23 = vadd.f32 1.0, %v4985_v19 }
 0x1d4   :  { %v4987_v27 = vpop.eup %4986 }
 0x1d5   :  { %v4989_v33 = vpop.eup %4988  ;;  %v1084_v46 = vmul.f32 %v4987_v27, %v1082_v15  ;;  %4990 = vrcp.f32 %v1121_v23  ;;  %vm1089_vm12 = vweird.f32 %v4987_v27  ;;  %v1133_v15 = vand.u32 2147483648, %v1121_v23 }
 0x1d6   :  { %v1103_v31 = vmul.f32 %v4989_v33, %v1101_v18  ;;  %4992 = vtanh.f32 %v1077_v29  ;;  %vm1108_vm13 = vweird.f32 %v4989_v33  ;;  %vm1090_vm0 = vmor %vm1088_vm14, %vm1089_vm12  ;;  %vm1127_vm5 = vweird.f32 %v1121_v23 }
 0x1d7   :  { %v1085_v39 = vsub.f32 1.0, %v1084_v46  ;;  %vm1109_vm1 = vmor %vm1107_vm15, %vm1108_vm13  ;;  %v1131_v16 = vand.u32 2147483647, %v1121_v23  ;;  %v1134_v20 = vor.u32 1.1754944e-38, %v1133_v15  ;;  %v4783_v46 = vld [vmem:[#allocation14 + $0xe4] sm:$0xf] }
 0x1d8   :  { %v1104_v51 = vsub.f32 1.0, %v1103_v31  ;;  %v3977_v15 = vld [vmem:[#allocation14 + $0xa8] sm:$0xf] }
 0x1d9   :  { %v1086_v40 = vmul.f32 %v4987_v27, %v1085_v39  ;;  %vm1132_vm7 = vcmp.eq.f32.partialorder %v1131_v16, 8.507059e+37  ;;  %v4003_v39 = vld [vmem:[#allocation14 + $0xf0] sm:$0xf0]  ;;  %v4778_v16 = vld [vmem:[#allocation14 + $0xb4] sm:$0xf0] }
 0x1da   :  { %v1105_v44 = vmul.f32 %v4989_v33, %v1104_v51  ;;  %v4009_v51 = vld [vmem:[#allocation14 + $0xe8] sm:$0xf]  ;;  %v4006_v43 = vor.u32 %v4783_v46, %v4003_v39 }
 0x1db   :  { %v4991_v2 = vpop.eup %4990  ;;  %v1087_v4 = vadd.f32 %v4987_v27, %v1086_v40  ;;  %v4784_v40 = vld [vmem:[#allocation14 + $0xec] sm:$0xf]  ;;  %v3961_v39 = vld [vmem:[#allocation14 + $0x88] sm:$0xf] }
 0x1dc   :  { %v1106_v38 = vadd.f32 %v4989_v33, %v1105_v44  ;;  %v1123_v53 = vmul.f32 %v4991_v2, %v1121_v23  ;;  %v4993_v41 = vpop.eup %4992  ;;  %vm1128_vm4 = vweird.f32 %v4991_v2  ;;  %v4786_v23 = vld [vmem:[#allocation14 + $0xf4] sm:$0xf0]  ;;  %v4014_v44 = vor.u32 %v4784_v40, %v4011_v61  ;;  %1678 = vmatpush.bf16.msra.mxu1 %v4006_v43  ;;  %v3963_v40 = vld [vmem:[#allocation14 + $0x98] sm:$0xf0] }
 0x1dd   :  { %v1091_v7 = vsel %vm1090_vm0, %v4987_v27, %v1087_v4  ;;  %vm1129_vm6 = vmor %vm1127_vm5, %vm1128_vm4  ;;  %v4010_v59 = vor.u32 %v4786_v23, %v4009_v51  ;;  %v4779_v4 = vld [vmem:[#allocation14 + $0xc4] sm:$0xf]  ;;  %v4774_v51 = vld [vmem:[#allocation14 + $0x94] sm:$0xf0] }
 0x1de   :  { %v1096_v45 = vsel %vm1093_vm2, %v1095_v48, %v1091_v7  ;;  %v1110_v8 = vsel %vm1109_vm1, %v4989_v33, %v1106_v38  ;;  %v1124_v9 = vsub.f32 1.0, %v1123_v53  ;;  %v4785_v33 = vld [vmem:[#allocation14 + $0xec] sm:$0xf0]  ;;  %1704 = vmatpush.bf16.msrb.mxu3 %v4014_v44  ;;  %v3987_v38 = vld [vmem:[#allocation14 + $0xd0] sm:$0xf0]  ;;  %v3962_v43 = vor.u32 %v4774_v51, %v3961_v39 }
 0x1df   :  { %v1115_v10 = vsel %vm1112_vm3, %v1114_v5, %v1110_v8  ;;  %v1138_v47 = vmul.f32 %v4993_v41, %v1096_v45  ;;  %1691 = vmatpush.bf16.msrb.mxu2 %v4010_v59  ;;  %v3993_v53 = vld [vmem:[#allocation14 + $0xc8] sm:$0xf]  ;;  %v4782_v5 = vld [vmem:[#allocation14 + $0xd4] sm:$0xf0]  ;;  %v3990_v7 = vor.u32 %v4779_v4, %v3987_v38  ;;  %v4780_v45 = vld [vmem:[#allocation14 + $0xcc] sm:$0xf] }
 0x1e0   :  { %v1137_v11 = vmul.f32 %v1115_v10, %v5582_v42  ;;  %v1125_v12 = vmul.f32 %v4991_v2, %v1124_v9  ;;  %v4001_v42 = vld [vmem:[#allocation14 + $0xe0] sm:$0xf]  ;;  %v3994_v41 = vor.u32 %v4782_v5, %v3993_v53  ;;  %v3995_v8 = vld [vmem:[#allocation14 + $0xd8] sm:$0xf0]  ;;  %v4772_v59 = vld [vmem:[#allocation14 + $0x8c] sm:$0xf] }
 0x1e1   :  { %v4002_v31 = vor.u32 %v4785_v33, %v4001_v42  ;;  %v3998_v9 = vor.u32 %v4780_v45, %v3995_v8  ;;  %1679 = vmatpush.bf16.msra.mxu1 %v3990_v7  ;;  %v3969_v10 = vld [vmem:[#allocation14 + $0xa0] sm:$0xf]  ;;  %v4773_v42 = vld [vmem:[#allocation14 + $0x8c] sm:$0xf0]  ;;  %v4771_v33 = vld [vmem:[#allocation14 + $0x84] sm:$0xf]  ;;  %v3966_v61 = vor.u32 %v4772_v59, %v3963_v40 }
 0x1e2   :  { %v5590_v50 = vadd.f32 %v1138_v47, %v1137_v11  ;;  %v1126_v25 = vadd.f32 %v4991_v2, %v1125_v12  ;;  %v4777_v47 = vld [vmem:[#allocation14 + $0xac] sm:$0xf0]  ;;  %v4775_v11 = vld [vmem:[#allocation14 + $0xa4] sm:$0xf]  ;;  %v3937_v44 = vld [vmem:[#allocation14 + $0x60] sm:$0xf] }
 0x1e3   :  { %1665 = vmatpush.bf16.msra.mxu0 %v4002_v31  ;;  %1692 = vmatpush.bf16.msrb.mxu2 %v3994_v41  ;;  %v3970_v12 = vor.u32 %v4777_v47, %v3969_v10  ;;  %v3955_v31 = vld [vmem:[#allocation14 + $0x90] sm:$0xf0]  ;;  %v3945_v38 = vld [vmem:[#allocation14 + $0x68] sm:$0xf]  ;;  %v4770_v53 = vld [vmem:[#allocation14 + $0x74] sm:$0xf0] }
 0x1e4   :  { %4994 = vtanh.f32 %v5590_v50  ;;  %v1130_v18 = vsel %vm1129_vm6, %v4991_v2, %v1126_v25  ;;  %v4781_v2 = vld [vmem:[#allocation14 + $0xcc] sm:$0xf0]  ;;  %1705 = vmatpush.bf16.msrb.mxu3 %v3998_v9  ;;  %v3971_v25 = vld [vmem:[#allocation14 + $0xb0] sm:$0xf0]  ;;  %v3958_v23 = vor.u32 %v4771_v33, %v3955_v31  ;;  %v3946_v45 = vor.u32 %v4770_v53, %v3945_v38  ;;  %v4768_v8 = vld [vmem:[#allocation14 + $0x6c] sm:$0xf] }
 0x1e5   :  { %v1135_v19 = vsel %vm1132_vm7, %v1134_v20, %v1130_v18  ;;  %v3986_v48 = vor.u32 %v4781_v2, %v3985_v63  ;;  %v3974_v18 = vor.u32 %v4775_v11, %v3971_v25  ;;  %v3978_v20 = vor.u32 %v4778_v16, %v3977_v15  ;;  %v4769_v63 = vld [vmem:[#allocation14 + $0x6c] sm:$0xf0]  ;;  %v4767_v2 = vld [vmem:[#allocation14 + $0x64] sm:$0xf]  ;;  %v3947_v9 = vld [vmem:[#allocation14 + $0x78] sm:$0xf0] }
 0x1e6   :  { %v3938_v4 = vor.u32 %v4769_v63, %v3937_v44  ;;  %v3950_v11 = vor.u32 %v4768_v8, %v3947_v9  ;;  %v4765_v25 = vld [vmem:[#allocation14 + $0x4c] sm:$0xf0]  ;;  %v4763_v15 = vld [vmem:[#allocation14 + $0x44] sm:$0xf]  ;;  %v3905_v33 = vld [vmem:[#allocation14 + $0x20] sm:$0xf] }
 0x1e7   :  { %1666 = vmatpush.bf16.msra.mxu0 %v3986_v48  ;;  %1680 = vmatpush.bf16.msra.mxu1 %v3974_v18  ;;  %v3939_v48 = vld [vmem:[#allocation14 + $0x70] sm:$0xf0]  ;;  %v4759_v51 = vld [vmem:[#allocation14 + $0x24] sm:$0xf]  ;;  %v4762_v44 = vld [vmem:[#allocation14 + $0x34] sm:$0xf0] }
 0x1e8   :  { %1693 = vmatpush.bf16.msrb.mxu2 %v3978_v20  ;;  %v3942_v41 = vor.u32 %v4767_v2, %v3939_v48  ;;  %v4760_v63 = vld [vmem:[#allocation14 + $0x2c] sm:$0xf]  ;;  %v3915_v2 = vld [vmem:[#allocation14 + $0x38] sm:$0xf0]  ;;  %v3891_v9 = vld [vmem:[#allocation14 + $0x10] sm:$0xf0] }
 0x1ea   :  { %v4995_v17 = vpop.eup %4994 }
 0x1eb   :  { %v1141_v27 = vmul.f32 %v4995_v17, %v1135_v19  ;;  %v4776_v17 = vld [vmem:[#allocation14 + $0xac] sm:$0xf]  ;;  %v3979_v19 = vld [vmem:[#allocation14 + $0xb8] sm:$0xf0]  ;;  %1667 = vmatpush.bf16.msra.mxu0 %v3970_v12  ;;  %1681 = vmatpush.bf16.msra.mxu1 %v3958_v23  ;;  %v3921_v12 = vld [vmem:[#allocation14 + $0x40] sm:$0xf] }
 0x1ec   :  { %1694 = vmatpush.bf16.msrb.mxu2 %v3962_v43  ;;  %v3922_v20 = vor.u32 %v4765_v25, %v3921_v12  ;;  %v3907_v23 = vld [vmem:[#allocation14 + $0x30] sm:$0xf0]  ;;  %v3913_v43 = vld [vmem:[#allocation14 + $0x28] sm:$0xf]  ;;  %v4756_v25 = vld [vmem:[#allocation14 + $0xc] sm:$0xf] }
 0x1ed   :  { %v1142_v29 = vpack.c.bf16 %v1141_v27, %v1141_v27  ;;  %v3982_v27 = vor.u32 %v4776_v17, %v3979_v19  ;;  %v3923_v17 = vld [vmem:[#allocation14 + $0x50] sm:$0xf0]  ;;  %v3914_v53 = vor.u32 %v4762_v44, %v3913_v43 }
 0x1ee   :  { %v3926_v19 = vor.u32 %v4763_v15, %v3923_v17  ;;  %v3899_v15 = vld [vmem:[#allocation14 + $0x18] sm:$0xf0] }
 0x1ef   :  { %1144 = vst [vmem:[#allocation3 + $0x4] sm:$0xf] %v1142_v29  ;;  %1352 = vmatmul.bf16.vlgmr.msrb.gmra.mxu0 %v1142_v29  ;;  %1365 = vmatmul.bf16.vlgmr.msrb.gmra.mxu1 %v1142_v29  ;;  %v3902_v17 = vor.u32 %v4756_v25, %v3899_v15 }
 0x1f0   :  { %1378 = vmatmul.bf16.vlgmr.msra.gmra.mxu2 %v1142_v29  ;;  %1391 = vmatmul.bf16.vlgmr.msra.gmra.mxu3 %v1142_v29  ;;  %v3953_v29 = vld [vmem:[#allocation14 + $0x80] sm:$0xf] }
 0x1f1   :  { %1706 = vmatpush.bf16.msrb.mxu3 %v3982_v27  ;;  %v3954_v46 = vor.u32 %v4773_v42, %v3953_v29  ;;  %1682 = vmatpush.bf16.msra.mxu1 %v3942_v41  ;;  %v3929_v27 = vld [vmem:[#allocation14 + $0x48] sm:$0xf]  ;;  %v4766_v29 = vld [vmem:[#allocation14 + $0x54] sm:$0xf0]  ;;  %v4764_v42 = vld [vmem:[#allocation14 + $0x4c] sm:$0xf] }
 0x1f2   :  { %1695 = vmatpush.bf16.msrb.mxu2 %v3946_v45  ;;  %v4757_v41 = vld [vmem:[#allocation14 + $0xc] sm:$0xf0]  ;;  %v4755_v45 = vld [vmem:[#allocation14 + $0x4] sm:$0xf] }
 0x1f3   :  { %1668 = vmatpush.bf16.msra.mxu0 %v3954_v46  ;;  %v4761_v46 = vld [vmem:[#allocation14 + $0x2c] sm:$0xf0]  ;;  %v3894_v12 = vor.u32 %v4755_v45, %v3891_v9 }
 0x1f4   :  { %v3906_v39 = vor.u32 %v4761_v46, %v3905_v33 }
 0x1f5   :  { %1707 = vmatpush.bf16.msrb.mxu3 %v3966_v61  ;;  %1683 = vmatpush.bf16.msra.mxu1 %v3926_v19  ;;  %v3910_v61 = vor.u32 %v4759_v51, %v3907_v23 }
 0x1f7   :  { %1669 = vmatpush.bf16.msra.mxu0 %v3938_v4 }
 0x1f9   :  { %1708 = vmatpush.bf16.msrb.mxu3 %v3950_v11  ;;  %1684 = vmatpush.bf16.msra.mxu1 %v3910_v61 }
 0x1fb   :  { %1670 = vmatpush.bf16.msra.mxu0 %v3922_v20 }
 0x1fd   :  { %1685 = vmatpush.bf16.msra.mxu1 %v3894_v12 }
 0x1ff   :  { %1671 = vmatpush.bf16.msra.mxu0 %v3906_v39 }
 0x26c   :  { %v1353_v5 = vpop.f32.mrf.mxu0  ;;  %v1366_v7 = vpop.f32.mrf.mxu1 }
 0x26d   :  { %v1396_v10 = vadd.f32 %v1353_v5, %v5463_v24  ;;  %v1397_v47 = vadd.f32 %v1366_v7, %v5466_v26  ;;  %v3930_v24 = vor.u32 %v4766_v29, %v3929_v27  ;;  %v3931_v26 = vld [vmem:[#allocation14 + $0x58] sm:$0xf0]  ;;  %v3918_v5 = vor.u32 %v4760_v63, %v3915_v2  ;;  %v3889_v7 = vld [vmem:[#allocation14] sm:$0xf] }
 0x26e   :  { %v3934_v31 = vor.u32 %v4764_v42, %v3931_v26  ;;  %v3890_v8 = vor.u32 %v4757_v41, %v3889_v7 }
 0x26f   :  { %v3884_v16 = vmul.f32 -1.442695, %v1396_v10  ;;  %v3885_v18 = vmul.f32 -1.442695, %v1397_v47  ;;  %1696 = vmatpush.bf16.msrb.mxu2 %v3930_v24  ;;  %v3897_v10 = vld [vmem:[#allocation14 + $0x8] sm:$0xf] }
 0x270   :  { %1709 = vmatpush.bf16.msrb.mxu3 %v3934_v31  ;;  %v4758_v47 = vld [vmem:[#allocation14 + $0x14] sm:$0xf0]  ;;  %1672 = vmatpush.bf16.msra.mxu0 %v3890_v8 }
 0x271   :  { %4996 = vpow2.f32 %v3884_v16 }
 0x272   :  { %4998 = vpow2.f32 %v3885_v18 }
 0x273   :  { %v1379_v59 = vpop.f32.mrf.mxu2  ;;  %v1392_v40 = vpop.f32.mrf.mxu3  ;;  %1697 = vmatpush.bf16.msrb.mxu2 %v3914_v53 }
 0x274   :  { %v1399_v4 = vadd.f32 %v1392_v40, %v5503_v55  ;;  %v1355_v48 = vpop.f32.mrf.mxu0  ;;  %v1368_v38 = vpop.f32.mrf.mxu1  ;;  %v3898_v55 = vor.u32 %v4758_v47, %v3897_v10  ;;  %1710 = vmatpush.bf16.msrb.mxu3 %v3918_v5  ;;  %v1398_v33 = vadd.f32 %v1379_v59, %v5500_v54 }
 0x276   :  { %v3886_v11 = vmul.f32 -1.442695, %v1399_v4 }
 0x277   :  { %v4997_v16 = vpop.eup %4996  ;;  %1698 = vmatpush.bf16.msrb.mxu2 %v3898_v55 }
 0x278   :  { %v4999_v18 = vpop.eup %4998  ;;  %v1403_v20 = vadd.f32 1.0, %v4997_v16  ;;  %5000 = vpow2.f32 %v3886_v11  ;;  %1711 = vmatpush.bf16.msrb.mxu3 %v3902_v17 }
 0x279   :  { %v1422_v19 = vadd.f32 1.0, %v4999_v18 }
 0x27a   :  { %5002 = vrcp.f32 %v1403_v20  ;;  %v1415_v43 = vand.u32 2147483648, %v1403_v20  ;;  %v1413_v44 = vand.u32 2147483647, %v1403_v20  ;;  %vm1409_vm10 = vweird.f32 %v1403_v20 }
 0x27b   :  { %5004 = vrcp.f32 %v1422_v19  ;;  %v1381_v27 = vpop.f32.mrf.mxu2  ;;  %v1394_v29 = vpop.f32.mrf.mxu3  ;;  %v1434_v40 = vand.u32 2147483648, %v1422_v19  ;;  %v1432_v2 = vand.u32 2147483647, %v1422_v19  ;;  %vm1428_vm11 = vweird.f32 %v1422_v19 }
 0x27c   :  { %v1416_v54 = vor.u32 1.1754944e-38, %v1415_v43  ;;  %vm1414_vm14 = vcmp.eq.f32.partialorder %v1413_v44, 8.507059e+37  ;;  %v4817_v29 = vld [vmem:[#allocation14 + $0xec] sm:$0xf0]  ;;  %v4811_v44 = vld [vmem:[#allocation14 + $0xc4] sm:$0xf] }
 0x27d   :  { %v1435_v53 = vor.u32 1.1754944e-38, %v1434_v40  ;;  %vm1433_vm15 = vcmp.eq.f32.partialorder %v1432_v2, 8.507059e+37  ;;  %v4116_v40 = vld [vmem:[#allocation14 + $0xc0] sm:$0xf]  ;;  %v4118_v2 = vld [vmem:[#allocation14 + $0xd0] sm:$0xf0] }
 0x27e   :  { %v5001_v42 = vpop.eup %5000 }
 0x27f   :  { %v1442_v24 = vadd.f32 1.0, %v5001_v42  ;;  %v4815_v42 = vld [vmem:[#allocation14 + $0xe4] sm:$0xf] }
 0x280   :  { %v5003_v26 = vpop.eup %5002 }
 0x281   :  { %v5005_v46 = vpop.eup %5004  ;;  %v1405_v31 = vmul.f32 %v5003_v26, %v1403_v20  ;;  %5006 = vrcp.f32 %v1442_v24  ;;  %vm1410_vm8 = vweird.f32 %v5003_v26  ;;  %v1454_v15 = vand.u32 2147483648, %v1442_v24 }
 0x282   :  { %v1424_v39 = vmul.f32 %v5005_v46, %v1422_v19  ;;  %5008 = vtanh.f32 %v1398_v33  ;;  %vm1429_vm9 = vweird.f32 %v5005_v46  ;;  %vm1411_vm12 = vmor %vm1409_vm10, %vm1410_vm8  ;;  %vm1448_vm1 = vweird.f32 %v1442_v24  ;;  %v4134_v33 = vld [vmem:[#allocation14 + $0xf0] sm:$0xf0] }
 0x283   :  { %v1406_v51 = vsub.f32 1.0, %v1405_v31  ;;  %vm1430_vm13 = vmor %vm1428_vm11, %vm1429_vm9  ;;  %v1452_v16 = vand.u32 2147483647, %v1442_v24  ;;  %v1455_v18 = vor.u32 1.1754944e-38, %v1454_v15  ;;  %v4137_v31 = vor.u32 %v4815_v42, %v4134_v33  ;;  %v4808_v15 = vld [vmem:[#allocation14 + $0xac] sm:$0xf] }
 0x284   :  { %v1425_v23 = vsub.f32 1.0, %v1424_v39  ;;  %v4804_v33 = vld [vmem:[#allocation14 + $0x8c] sm:$0xf] }
 0x285   :  { %v1407_v61 = vmul.f32 %v5003_v26, %v1406_v51  ;;  %vm1453_vm3 = vcmp.eq.f32.partialorder %v1452_v16, 8.507059e+37  ;;  %v4816_v51 = vld [vmem:[#allocation14 + $0xec] sm:$0xf]  ;;  %1999 = vmatpush.bf16.msrb.mxu1 %v4137_v31  ;;  %v4110_v16 = vld [vmem:[#allocation14 + $0xb8] sm:$0xf0] }
 0x286   :  { %v1426_v63 = vmul.f32 %v5005_v46, %v1425_v23  ;;  %v4142_v23 = vld [vmem:[#allocation14 + $0xf8] sm:$0xf0]  ;;  %v4068_v31 = vld [vmem:[#allocation14 + $0x60] sm:$0xf] }
 0x287   :  { %v5007_v4 = vpop.eup %5006  ;;  %v1408_v48 = vadd.f32 %v5003_v26, %v1407_v61  ;;  %v4145_v43 = vor.u32 %v4816_v51, %v4142_v23  ;;  %v4813_v61 = vld [vmem:[#allocation14 + $0xcc] sm:$0xf0]  ;;  %v4799_v51 = vld [vmem:[#allocation14 + $0x64] sm:$0xf] }
 0x288   :  { %v1427_v59 = vadd.f32 %v5005_v46, %v1426_v63  ;;  %v1444_v38 = vmul.f32 %v5007_v4, %v1442_v24  ;;  %v5009_v7 = vpop.eup %5008  ;;  %vm1449_vm0 = vweird.f32 %v5007_v4  ;;  %v4818_v24 = vld [vmem:[#allocation14 + $0xf4] sm:$0xf0]  ;;  %v4117_v63 = vor.u32 %v4813_v61, %v4116_v40  ;;  %v4076_v40 = vld [vmem:[#allocation14 + $0x68] sm:$0xf] }
 0x289   :  { %v1412_v5 = vsel %vm1411_vm12, %v5003_v26, %v1408_v48  ;;  %vm1450_vm2 = vmor %vm1448_vm1, %vm1449_vm0  ;;  %2025 = vmatpush.bf16.msra.mxu3 %v4145_v43  ;;  %v4814_v48 = vld [vmem:[#allocation14 + $0xd4] sm:$0xf0]  ;;  %v4070_v43 = vld [vmem:[#allocation14 + $0x70] sm:$0xf0] }
 0x28a   :  { %v1417_v41 = vsel %vm1414_vm14, %v1416_v54, %v1412_v5  ;;  %v1431_v45 = vsel %vm1430_vm13, %v5005_v46, %v1427_v59  ;;  %v1445_v8 = vsub.f32 1.0, %v1444_v38  ;;  %v4140_v46 = vld [vmem:[#allocation14 + $0xe8] sm:$0xf]  ;;  %v4121_v54 = vor.u32 %v4811_v44, %v4118_v2  ;;  %v4812_v38 = vld [vmem:[#allocation14 + $0xcc] sm:$0xf] }
 0x28b   :  { %v1436_v9 = vsel %vm1433_vm15, %v1435_v53, %v1431_v45  ;;  %v1459_v10 = vmul.f32 %v5009_v7, %v1417_v41  ;;  %v4141_v39 = vor.u32 %v4818_v24, %v4140_v46  ;;  %v4126_v53 = vld [vmem:[#allocation14 + $0xd8] sm:$0xf0]  ;;  %v4100_v7 = vld [vmem:[#allocation14 + $0xa0] sm:$0xf]  ;;  %v4809_v41 = vld [vmem:[#allocation14 + $0xac] sm:$0xf0]  ;;  %v4073_v2 = vor.u32 %v4799_v51, %v4070_v43 }
 0x28c   :  { %v1458_v47 = vmul.f32 %v1436_v9, %v5590_v50  ;;  %v1446_v11 = vmul.f32 %v5007_v4, %v1445_v8  ;;  %v4132_v50 = vld [vmem:[#allocation14 + $0xe0] sm:$0xf]  ;;  %v4129_v5 = vor.u32 %v4812_v38, %v4126_v53  ;;  %2000 = vmatpush.bf16.msrb.mxu1 %v4121_v54  ;;  %v4807_v45 = vld [vmem:[#allocation14 + $0xa4] sm:$0xf]  ;;  %v4101_v8 = vor.u32 %v4809_v41, %v4100_v7  ;;  %v4102_v9 = vld [vmem:[#allocation14 + $0xb0] sm:$0xf0] }
 0x28d   :  { %v4133_v26 = vor.u32 %v4817_v29, %v4132_v50  ;;  %2012 = vmatpush.bf16.msra.mxu2 %v4141_v39  ;;  %v4092_v50 = vld [vmem:[#allocation14 + $0x88] sm:$0xf]  ;;  %v4806_v29 = vld [vmem:[#allocation14 + $0x94] sm:$0xf0]  ;;  %v4094_v46 = vld [vmem:[#allocation14 + $0x98] sm:$0xf0] }
 0x28e   :  { %v5598_v12 = vadd.f32 %v1459_v10, %v1458_v47  ;;  %v1447_v25 = vadd.f32 %v5007_v4, %v1446_v11  ;;  %2026 = vmatpush.bf16.msra.mxu3 %v4129_v5  ;;  %v4108_v10 = vld [vmem:[#allocation14 + $0xa8] sm:$0xf]  ;;  %v4810_v47 = vld [vmem:[#allocation14 + $0xb4] sm:$0xf0]  ;;  %v4105_v11 = vor.u32 %v4807_v45, %v4102_v9  ;;  %v4097_v24 = vor.u32 %v4804_v33, %v4094_v46  ;;  %v4801_v39 = vld [vmem:[#allocation14 + $0x6c] sm:$0xf0] }
 0x28f   :  { %1986 = vmatpush.bf16.msrb.mxu0 %v4133_v26  ;;  %v4093_v26 = vor.u32 %v4806_v29, %v4092_v50  ;;  %v4069_v23 = vor.u32 %v4801_v39, %v4068_v31  ;;  %v4802_v61 = vld [vmem:[#allocation14 + $0x74] sm:$0xf0]  ;;  %v4078_v54 = vld [vmem:[#allocation14 + $0x78] sm:$0xf0]  ;;  %v4052_v5 = vld [vmem:[#allocation14 + $0x40] sm:$0xf] }
 0x290   :  { %5010 = vtanh.f32 %v5598_v12  ;;  %v1451_v55 = vsel %vm1450_vm2, %v5007_v4, %v1447_v25  ;;  %v4124_v4 = vld [vmem:[#allocation14 + $0xc8] sm:$0xf]  ;;  %v4109_v25 = vor.u32 %v4810_v47, %v4108_v10  ;;  %2001 = vmatpush.bf16.msrb.mxu1 %v4105_v11  ;;  %v4797_v7 = vld [vmem:[#allocation14 + $0x4c] sm:$0xf0]  ;;  %v4795_v41 = vld [vmem:[#allocation14 + $0x44] sm:$0xf] }
 0x291   :  { %v1456_v17 = vsel %vm1453_vm3, %v1455_v18, %v1451_v55  ;;  %v4125_v59 = vor.u32 %v4814_v48, %v4124_v4  ;;  %v4113_v55 = vor.u32 %v4808_v15, %v4110_v16  ;;  %v4084_v18 = vld [vmem:[#allocation14 + $0x80] sm:$0xf]  ;;  %v4077_v4 = vor.u32 %v4802_v61, %v4076_v40  ;;  %v4800_v48 = vld [vmem:[#allocation14 + $0x6c] sm:$0xf]  ;;  %v4054_v10 = vld [vmem:[#allocation14 + $0x50] sm:$0xf0] }
 0x292   :  { %v4081_v53 = vor.u32 %v4800_v48, %v4078_v54  ;;  %v4053_v9 = vor.u32 %v4797_v7, %v4052_v5  ;;  %v4057_v47 = vor.u32 %v4795_v41, %v4054_v10  ;;  %v4060_v11 = vld [vmem:[#allocation14 + $0x48] sm:$0xf]  ;;  %v4796_v15 = vld [vmem:[#allocation14 + $0x4c] sm:$0xf]  ;;  %v4036_v16 = vld [vmem:[#allocation14 + $0x20] sm:$0xf] }
 0x293   :  { %1987 = vmatpush.bf16.msrb.mxu0 %v4117_v63  ;;  %2013 = vmatpush.bf16.msra.mxu2 %v4125_v59  ;;  %v4792_v33 = vld [vmem:[#allocation14 + $0x2c] sm:$0xf]  ;;  %v4046_v46 = vld [vmem:[#allocation14 + $0x38] sm:$0xf0]  ;;  %v4020_v43 = vld [vmem:[#allocation14] sm:$0xf] }
 0x294   :  { %2027 = vmatpush.bf16.msra.mxu3 %v4113_v55  ;;  %v4793_v55 = vld [vmem:[#allocation14 + $0x2c] sm:$0xf0]  ;;  %v4787_v61 = vld [vmem:[#allocation14 + $0x4] sm:$0xf] }
 0x295   :  { %v4789_v40 = vld [vmem:[#allocation14 + $0xc] sm:$0xf0] }
 0x296   :  { %v5011_v20 = vpop.eup %5010 }
 0x297   :  { %v1462_v19 = vmul.f32 %v5011_v20, %v1456_v17  ;;  %1988 = vmatpush.bf16.msrb.mxu0 %v4101_v8  ;;  %2014 = vmatpush.bf16.msra.mxu2 %v4109_v25  ;;  %v4805_v20 = vld [vmem:[#allocation14 + $0x8c] sm:$0xf0]  ;;  %v4803_v17 = vld [vmem:[#allocation14 + $0x84] sm:$0xf]  ;;  %v4798_v25 = vld [vmem:[#allocation14 + $0x54] sm:$0xf0] }
 0x298   :  { %2028 = vmatpush.bf16.msra.mxu3 %v4097_v24 }
 0x299   :  { %v1463_v27 = vpack.c.bf16 %v1462_v19, %v1462_v19  ;;  %v4085_v19 = vor.u32 %v4805_v20, %v4084_v18  ;;  %v4037_v20 = vor.u32 %v4793_v55, %v4036_v16 }
 0x29b   :  { %1465 = vst [vmem:[#allocation3 + $0x8] sm:$0xf] %v1463_v27  ;;  %1673 = vmatmul.bf16.vlgmr.msra.gmra.mxu0 %v1463_v27  ;;  %1686 = vmatmul.bf16.vlgmr.msra.gmra.mxu1 %v1463_v27 }
 0x29c   :  { %1699 = vmatmul.bf16.vlgmr.msrb.gmra.mxu2 %v1463_v27  ;;  %1712 = vmatmul.bf16.vlgmr.msrb.gmra.mxu3 %v1463_v27  ;;  %v4086_v27 = vld [vmem:[#allocation14 + $0x90] sm:$0xf0] }
 0x29d   :  { %v4089_v42 = vor.u32 %v4803_v17, %v4086_v27  ;;  %1989 = vmatpush.bf16.msrb.mxu0 %v4085_v19  ;;  %2015 = vmatpush.bf16.msra.mxu2 %v4093_v26  ;;  %v4791_v17 = vld [vmem:[#allocation14 + $0x24] sm:$0xf]  ;;  %v4038_v19 = vld [vmem:[#allocation14 + $0x30] sm:$0xf0]  ;;  %v4044_v27 = vld [vmem:[#allocation14 + $0x28] sm:$0xf] }
 0x29e   :  { %2029 = vmatpush.bf16.msra.mxu3 %v4081_v53  ;;  %v4794_v26 = vld [vmem:[#allocation14 + $0x34] sm:$0xf0] }
 0x29f   :  { %2002 = vmatpush.bf16.msrb.mxu1 %v4089_v42  ;;  %v4041_v42 = vor.u32 %v4791_v17, %v4038_v19  ;;  %v4045_v51 = vor.u32 %v4794_v26, %v4044_v27 }
 0x2a1   :  { %1990 = vmatpush.bf16.msrb.mxu0 %v4069_v23  ;;  %2016 = vmatpush.bf16.msra.mxu2 %v4077_v4  ;;  %v4049_v23 = vor.u32 %v4792_v33, %v4046_v46  ;;  %v4790_v4 = vld [vmem:[#allocation14 + $0x14] sm:$0xf0] }
 0x2a3   :  { %2003 = vmatpush.bf16.msrb.mxu1 %v4073_v2  ;;  %v4028_v2 = vld [vmem:[#allocation14 + $0x8] sm:$0xf] }
 0x2a5   :  { %1991 = vmatpush.bf16.msrb.mxu0 %v4053_v9 }
 0x2a7   :  { %2004 = vmatpush.bf16.msrb.mxu1 %v4057_v47 }
 0x2a9   :  { %1992 = vmatpush.bf16.msrb.mxu0 %v4037_v20 }
 0x2ab   :  { %2005 = vmatpush.bf16.msrb.mxu1 %v4041_v42 }
 0x318   :  { %v1674_v44 = vpop.f32.mrf.mxu0  ;;  %v1687_v63 = vpop.f32.mrf.mxu1 }
 0x319   :  { %v1717_v59 = vadd.f32 %v1674_v44, %v5475_v32  ;;  %v1718_v38 = vadd.f32 %v1687_v63, %v5478_v34  ;;  %v4061_v32 = vor.u32 %v4798_v25, %v4060_v11  ;;  %v4062_v34 = vld [vmem:[#allocation14 + $0x58] sm:$0xf0]  ;;  %v4021_v44 = vor.u32 %v4789_v40, %v4020_v43  ;;  %v4022_v63 = vld [vmem:[#allocation14 + $0x10] sm:$0xf0] }
 0x31a   :  { %v4065_v18 = vor.u32 %v4796_v15, %v4062_v34  ;;  %v4025_v54 = vor.u32 %v4787_v61, %v4022_v63 }
 0x31b   :  { %v4015_v45 = vmul.f32 -1.442695, %v1717_v59  ;;  %v4016_v8 = vmul.f32 -1.442695, %v1718_v38  ;;  %2017 = vmatpush.bf16.msra.mxu2 %v4061_v32  ;;  %v4788_v59 = vld [vmem:[#allocation14 + $0xc] sm:$0xf]  ;;  %1993 = vmatpush.bf16.msrb.mxu0 %v4021_v44 }
 0x31c   :  { %2030 = vmatpush.bf16.msra.mxu3 %v4065_v18  ;;  %v4030_v38 = vld [vmem:[#allocation14 + $0x18] sm:$0xf0]  ;;  %2006 = vmatpush.bf16.msrb.mxu1 %v4025_v54 }
 0x31d   :  { %5012 = vpow2.f32 %v4015_v45  ;;  %v4033_v41 = vor.u32 %v4788_v59, %v4030_v38 }
 0x31e   :  { %5014 = vpow2.f32 %v4016_v8 }
 0x31f   :  { %v1700_v50 = vpop.f32.mrf.mxu2  ;;  %v1713_v29 = vpop.f32.mrf.mxu3  ;;  %2018 = vmatpush.bf16.msra.mxu2 %v4045_v51 }
 0x320   :  { %v1720_v24 = vadd.f32 %v1713_v29, %v5510_v0  ;;  %v1676_v31 = vpop.f32.mrf.mxu0  ;;  %v1689_v39 = vpop.f32.mrf.mxu1  ;;  %v4029_v0 = vor.u32 %v4790_v4, %v4028_v2  ;;  %2031 = vmatpush.bf16.msra.mxu3 %v4049_v23  ;;  %v1719_v25 = vadd.f32 %v1700_v50, %v5507_v62 }
 0x322   :  { %v4017_v48 = vmul.f32 -1.442695, %v1720_v24 }
 0x323   :  { %v5013_v53 = vpop.eup %5012  ;;  %2019 = vmatpush.bf16.msra.mxu2 %v4029_v0 }
 0x324   :  { %v5015_v5 = vpop.eup %5014  ;;  %v1724_v7 = vadd.f32 1.0, %v5013_v53  ;;  %5016 = vpow2.f32 %v4017_v48  ;;  %2032 = vmatpush.bf16.msra.mxu3 %v4033_v41  ;;  %v4847_v41 = vld [vmem:[#allocation14 + $0xe4] sm:$0xf] }
 0x325   :  { %v1743_v45 = vadd.f32 1.0, %v5015_v5 }
 0x326   :  { %5018 = vrcp.f32 %v1724_v7  ;;  %v1736_v18 = vand.u32 2147483648, %v1724_v7  ;;  %v1734_v19 = vand.u32 2147483647, %v1724_v7  ;;  %vm1730_vm6 = vweird.f32 %v1724_v7 }
 0x327   :  { %5020 = vrcp.f32 %v1743_v45  ;;  %v1702_v8 = vpop.f32.mrf.mxu2  ;;  %v1715_v9 = vpop.f32.mrf.mxu3  ;;  %v1755_v20 = vand.u32 2147483648, %v1743_v45  ;;  %v1753_v29 = vand.u32 2147483647, %v1743_v45  ;;  %vm1749_vm7 = vweird.f32 %v1743_v45 }
 0x328   :  { %v1737_v62 = vor.u32 1.1754944e-38, %v1736_v18  ;;  %vm1735_vm10 = vcmp.eq.f32.partialorder %v1734_v19, 8.507059e+37  ;;  %v4265_v8 = vld [vmem:[#allocation14 + $0xf0] sm:$0xf0]  ;;  %v4271_v9 = vld [vmem:[#allocation14 + $0xe8] sm:$0xf] }
 0x329   :  { %v1756_v46 = vor.u32 1.1754944e-38, %v1755_v20  ;;  %vm1754_vm11 = vcmp.eq.f32.partialorder %v1753_v29, 8.507059e+37  ;;  %v4249_v20 = vld [vmem:[#allocation14 + $0xd0] sm:$0xf0]  ;;  %v4846_v19 = vld [vmem:[#allocation14 + $0xd4] sm:$0xf0] }
 0x32a   :  { %v5017_v10 = vpop.eup %5016 }
 0x32b   :  { %v1763_v47 = vadd.f32 1.0, %v5017_v10  ;;  %v4850_v10 = vld [vmem:[#allocation14 + $0xf4] sm:$0xf0] }
 0x32c   :  { %v5019_v11 = vpop.eup %5018 }
 0x32d   :  { %v5021_v15 = vpop.eup %5020  ;;  %v1726_v32 = vmul.f32 %v5019_v11, %v1724_v7  ;;  %5022 = vrcp.f32 %v1763_v47  ;;  %vm1731_vm4 = vweird.f32 %v5019_v11  ;;  %v1775_v4 = vand.u32 2147483648, %v1763_v47  ;;  %v4849_v7 = vld [vmem:[#allocation14 + $0xec] sm:$0xf0] }
 0x32e   :  { %v1745_v34 = vmul.f32 %v5021_v15, %v1743_v45  ;;  %5024 = vtanh.f32 %v1719_v25  ;;  %vm1750_vm5 = vweird.f32 %v5021_v15  ;;  %vm1732_vm8 = vmor %vm1730_vm6, %vm1731_vm4  ;;  %vm1769_vm13 = vweird.f32 %v1763_v47  ;;  %v4848_v25 = vld [vmem:[#allocation14 + $0xec] sm:$0xf] }
 0x32f   :  { %v1727_v16 = vsub.f32 1.0, %v1726_v32  ;;  %vm1751_vm9 = vmor %vm1749_vm7, %vm1750_vm5  ;;  %v1773_v48 = vand.u32 2147483647, %v1763_v47  ;;  %v1776_v59 = vor.u32 1.1754944e-38, %v1775_v4  ;;  %v4837_v4 = vld [vmem:[#allocation14 + $0x8c] sm:$0xf0] }
 0x330   :  { %v1746_v55 = vsub.f32 1.0, %v1745_v34  ;;  %v4247_v34 = vld [vmem:[#allocation14 + $0xc0] sm:$0xf] }
 0x331   :  { %v1728_v17 = vmul.f32 %v5019_v11, %v1727_v16  ;;  %vm1774_vm15 = vcmp.eq.f32.partialorder %v1773_v48, 8.507059e+37  ;;  %v4845_v16 = vld [vmem:[#allocation14 + $0xcc] sm:$0xf0]  ;;  %v4835_v48 = vld [vmem:[#allocation14 + $0x84] sm:$0xf] }
 0x332   :  { %v1747_v27 = vmul.f32 %v5021_v15, %v1746_v55  ;;  %v4843_v55 = vld [vmem:[#allocation14 + $0xc4] sm:$0xf]  ;;  %v4248_v18 = vor.u32 %v4845_v16, %v4247_v34 }
 0x333   :  { %v5023_v42 = vpop.eup %5022  ;;  %v1729_v26 = vadd.f32 %v5019_v11, %v1728_v17  ;;  %v4255_v17 = vld [vmem:[#allocation14 + $0xc8] sm:$0xf] }
 0x334   :  { %v1748_v50 = vadd.f32 %v5021_v15, %v1747_v27  ;;  %v1765_v33 = vmul.f32 %v5023_v42, %v1763_v47  ;;  %v5025_v31 = vpop.eup %5024  ;;  %vm1770_vm12 = vweird.f32 %v5023_v42  ;;  %v4268_v47 = vor.u32 %v4847_v41, %v4265_v8  ;;  %v4833_v8 = vld [vmem:[#allocation14 + $0x6c] sm:$0xf0] }
 0x335   :  { %v1733_v24 = vsel %vm1732_vm8, %v5019_v11, %v1729_v26  ;;  %vm1771_vm14 = vmor %vm1769_vm13, %vm1770_vm12  ;;  %v4272_v11 = vor.u32 %v4850_v10, %v4271_v9  ;;  %v4252_v27 = vor.u32 %v4843_v55, %v4249_v20  ;;  %v4256_v29 = vor.u32 %v4846_v19, %v4255_v17  ;;  %v4257_v26 = vld [vmem:[#allocation14 + $0xd8] sm:$0xf0]  ;;  %v4831_v9 = vld [vmem:[#allocation14 + $0x64] sm:$0xf] }
 0x336   :  { %v1738_v39 = vsel %vm1735_vm10, %v1737_v62, %v1733_v24  ;;  %v1752_v51 = vsel %vm1751_vm9, %v5021_v15, %v1748_v50  ;;  %v1766_v23 = vsub.f32 1.0, %v1765_v33  ;;  %v4273_v15 = vld [vmem:[#allocation14 + $0xf8] sm:$0xf0]  ;;  %2320 = vmatpush.bf16.msra.mxu1 %v4268_v47  ;;  %v4231_v50 = vld [vmem:[#allocation14 + $0xa0] sm:$0xf] }
 0x337   :  { %v1757_v43 = vsel %vm1754_vm11, %v1756_v46, %v1752_v51  ;;  %v1780_v40 = vmul.f32 %v5025_v31, %v1738_v39  ;;  %v4276_v32 = vor.u32 %v4848_v25, %v4273_v15  ;;  %2333 = vmatpush.bf16.msrb.mxu2 %v4272_v11  ;;  %v4841_v33 = vld [vmem:[#allocation14 + $0xac] sm:$0xf0]  ;;  %v4839_v46 = vld [vmem:[#allocation14 + $0xa4] sm:$0xf]  ;;  %v4233_v31 = vld [vmem:[#allocation14 + $0xb0] sm:$0xf0] }
 0x338   :  { %v1779_v61 = vmul.f32 %v1757_v43, %v5598_v12  ;;  %v1767_v44 = vmul.f32 %v5023_v42, %v1766_v23  ;;  %v4263_v12 = vld [vmem:[#allocation14 + $0xe0] sm:$0xf]  ;;  %v4232_v24 = vor.u32 %v4841_v33, %v4231_v50  ;;  %v4239_v39 = vld [vmem:[#allocation14 + $0xa8] sm:$0xf]  ;;  %v4842_v51 = vld [vmem:[#allocation14 + $0xb4] sm:$0xf0]  ;;  %v4236_v23 = vor.u32 %v4839_v46, %v4233_v31 }
 0x339   :  { %v4264_v45 = vor.u32 %v4849_v7, %v4263_v12  ;;  %2346 = vmatpush.bf16.msrb.mxu3 %v4276_v32  ;;  %v4240_v43 = vor.u32 %v4842_v51, %v4239_v39  ;;  %v4836_v12 = vld [vmem:[#allocation14 + $0x8c] sm:$0xf]  ;;  %v4225_v7 = vld [vmem:[#allocation14 + $0x98] sm:$0xf0]  ;;  %v4201_v47 = vld [vmem:[#allocation14 + $0x70] sm:$0xf0] }
 0x33a   :  { %v5606_v63 = vadd.f32 %v1780_v40, %v1779_v61  ;;  %v1768_v2 = vadd.f32 %v5023_v42, %v1767_v44  ;;  %2321 = vmatpush.bf16.msra.mxu1 %v4252_v27  ;;  %v4840_v40 = vld [vmem:[#allocation14 + $0xac] sm:$0xf]  ;;  %v4241_v61 = vld [vmem:[#allocation14 + $0xb8] sm:$0xf0]  ;;  %v4228_v41 = vor.u32 %v4836_v12, %v4225_v7  ;;  %v4207_v11 = vld [vmem:[#allocation14 + $0x68] sm:$0xf]  ;;  %v4204_v34 = vor.u32 %v4831_v9, %v4201_v47 }
 0x33b   :  { %2307 = vmatpush.bf16.msra.mxu0 %v4264_v45  ;;  %2334 = vmatpush.bf16.msrb.mxu2 %v4256_v29  ;;  %v4244_v44 = vor.u32 %v4840_v40, %v4241_v61  ;;  %v4199_v45 = vld [vmem:[#allocation14 + $0x60] sm:$0xf]  ;;  %v4834_v25 = vld [vmem:[#allocation14 + $0x74] sm:$0xf0]  ;;  %v4832_v55 = vld [vmem:[#allocation14 + $0x6c] sm:$0xf] }
 0x33c   :  { %5026 = vtanh.f32 %v5606_v63  ;;  %v1772_v54 = vsel %vm1771_vm14, %v5023_v42, %v1768_v2  ;;  %v4844_v42 = vld [vmem:[#allocation14 + $0xcc] sm:$0xf]  ;;  %v4215_v2 = vld [vmem:[#allocation14 + $0x80] sm:$0xf]  ;;  %v4200_v10 = vor.u32 %v4833_v8, %v4199_v45  ;;  %v4208_v16 = vor.u32 %v4834_v25, %v4207_v11  ;;  %v4829_v29 = vld [vmem:[#allocation14 + $0x4c] sm:$0xf0] }
 0x33d   :  { %v1777_v53 = vsel %vm1774_vm15, %v1776_v59, %v1772_v54  ;;  %v4260_v62 = vor.u32 %v4844_v42, %v4257_v26  ;;  %v4216_v54 = vor.u32 %v4837_v4, %v4215_v2  ;;  %v4217_v59 = vld [vmem:[#allocation14 + $0x90] sm:$0xf0]  ;;  %v4183_v27 = vld [vmem:[#allocation14 + $0x40] sm:$0xf]  ;;  %v4827_v42 = vld [vmem:[#allocation14 + $0x44] sm:$0xf] }
 0x33e   :  { %2322 = vmatpush.bf16.msra.mxu1 %v4236_v23  ;;  %v4184_v50 = vor.u32 %v4829_v29, %v4183_v27  ;;  %v4185_v33 = vld [vmem:[#allocation14 + $0x50] sm:$0xf0]  ;;  %v4830_v31 = vld [vmem:[#allocation14 + $0x54] sm:$0xf0]  ;;  %v4828_v39 = vld [vmem:[#allocation14 + $0x4c] sm:$0xf] }
 0x33f   :  { %2308 = vmatpush.bf16.msra.mxu0 %v4248_v18  ;;  %2347 = vmatpush.bf16.msrb.mxu3 %v4260_v62  ;;  %v4209_v18 = vld [vmem:[#allocation14 + $0x78] sm:$0xf0]  ;;  %v4188_v46 = vor.u32 %v4827_v42, %v4185_v33  ;;  %v4167_v51 = vld [vmem:[#allocation14 + $0x20] sm:$0xf]  ;;  %v4825_v23 = vld [vmem:[#allocation14 + $0x2c] sm:$0xf0] }
 0x340   :  { %2335 = vmatpush.bf16.msrb.mxu2 %v4240_v43  ;;  %v4212_v19 = vor.u32 %v4832_v55, %v4209_v18  ;;  %v4168_v40 = vor.u32 %v4825_v23, %v4167_v51  ;;  %v4823_v61 = vld [vmem:[#allocation14 + $0x24] sm:$0xf]  ;;  %v4175_v2 = vld [vmem:[#allocation14 + $0x28] sm:$0xf]  ;;  %v4151_v45 = vld [vmem:[#allocation14] sm:$0xf] }
 0x341   :  { %v4821_v8 = vld [vmem:[#allocation14 + $0xc] sm:$0xf0]  ;;  %v4819_v9 = vld [vmem:[#allocation14 + $0x4] sm:$0xf]  ;;  %v4153_v47 = vld [vmem:[#allocation14 + $0x10] sm:$0xf0] }
 0x342   :  { %v5027_v38 = vpop.eup %5026  ;;  %v4159_v11 = vld [vmem:[#allocation14 + $0x8] sm:$0xf]  ;;  %v4822_v25 = vld [vmem:[#allocation14 + $0x14] sm:$0xf0] }
 0x343   :  { %v1783_v0 = vmul.f32 %v5027_v38, %v1777_v53  ;;  %2309 = vmatpush.bf16.msra.mxu0 %v4232_v24  ;;  %2348 = vmatpush.bf16.msrb.mxu3 %v4244_v44  ;;  %v4223_v38 = vld [vmem:[#allocation14 + $0x88] sm:$0xf]  ;;  %v4838_v53 = vld [vmem:[#allocation14 + $0x94] sm:$0xf0]  ;;  %v4169_v44 = vld [vmem:[#allocation14 + $0x30] sm:$0xf0] }
 0x344   :  { %v4191_v24 = vld [vmem:[#allocation14 + $0x48] sm:$0xf] }
 0x345   :  { %v1784_v5 = vpack.c.bf16 %v1783_v0, %v1783_v0  ;;  %v4220_v0 = vor.u32 %v4835_v48, %v4217_v59  ;;  %v4826_v59 = vld [vmem:[#allocation14 + $0x34] sm:$0xf0] }
 0x346   :  { %v4176_v7 = vor.u32 %v4826_v59, %v4175_v2 }
 0x347   :  { %1786 = vst [vmem:[#allocation3 + $0xc] sm:$0xf] %v1784_v5  ;;  %1994 = vmatmul.bf16.vlgmr.msrb.gmra.mxu0 %v1784_v5  ;;  %2007 = vmatmul.bf16.vlgmr.msrb.gmra.mxu1 %v1784_v5 }
 0x348   :  { %2020 = vmatmul.bf16.vlgmr.msra.gmra.mxu2 %v1784_v5  ;;  %2033 = vmatmul.bf16.vlgmr.msra.gmra.mxu3 %v1784_v5  ;;  %v4224_v5 = vor.u32 %v4838_v53, %v4223_v38  ;;  %v4824_v38 = vld [vmem:[#allocation14 + $0x2c] sm:$0xf]  ;;  %v4177_v53 = vld [vmem:[#allocation14 + $0x38] sm:$0xf0] }
 0x349   :  { %2310 = vmatpush.bf16.msra.mxu0 %v4216_v54  ;;  %2323 = vmatpush.bf16.msra.mxu1 %v4220_v0  ;;  %v4172_v54 = vor.u32 %v4823_v61, %v4169_v44 }
 0x34a   :  { %2336 = vmatpush.bf16.msrb.mxu2 %v4224_v5  ;;  %2349 = vmatpush.bf16.msrb.mxu3 %v4228_v41  ;;  %v4180_v41 = vor.u32 %v4824_v38, %v4177_v53 }
 0x34d   :  { %2311 = vmatpush.bf16.msra.mxu0 %v4200_v10  ;;  %2324 = vmatpush.bf16.msra.mxu1 %v4204_v34  ;;  %v4152_v10 = vor.u32 %v4821_v8, %v4151_v45  ;;  %v4820_v34 = vld [vmem:[#allocation14 + $0xc] sm:$0xf] }
 0x34e   :  { %2337 = vmatpush.bf16.msrb.mxu2 %v4208_v16  ;;  %2350 = vmatpush.bf16.msrb.mxu3 %v4212_v19  ;;  %v4161_v16 = vld [vmem:[#allocation14 + $0x18] sm:$0xf0] }
 0x351   :  { %2312 = vmatpush.bf16.msra.mxu0 %v4184_v50  ;;  %2325 = vmatpush.bf16.msra.mxu1 %v4188_v46 }
 0x355   :  { %2313 = vmatpush.bf16.msra.mxu0 %v4168_v40  ;;  %2326 = vmatpush.bf16.msra.mxu1 %v4172_v54 }
 0x359   :  { %2314 = vmatpush.bf16.msra.mxu0 %v4152_v10 }
 0x3c4   :  { %v1995_v15 = vpop.f32.mrf.mxu0  ;;  %v2008_v32 = vpop.f32.mrf.mxu1 }
 0x3c5   :  { %v2038_v20 = vadd.f32 %v1995_v15, %v5447_v52  ;;  %v2039_v17 = vadd.f32 %v2008_v32, %v5450_v37  ;;  %v4192_v52 = vor.u32 %v4830_v31, %v4191_v24  ;;  %v4193_v37 = vld [vmem:[#allocation14 + $0x58] sm:$0xf0]  ;;  %v4156_v32 = vor.u32 %v4819_v9, %v4153_v47 }
 0x3c6   :  { %v4196_v43 = vor.u32 %v4828_v39, %v4193_v37 }
 0x3c7   :  { %v4146_v26 = vmul.f32 -1.442695, %v2038_v20  ;;  %v4147_v62 = vmul.f32 -1.442695, %v2039_v17  ;;  %2338 = vmatpush.bf16.msrb.mxu2 %v4192_v52  ;;  %v4164_v17 = vor.u32 %v4820_v34, %v4161_v16  ;;  %2327 = vmatpush.bf16.msra.mxu1 %v4156_v32  ;;  %v4881_v16 = vld [vmem:[#allocation14 + $0xec] sm:$0xf0] }
 0x3c8   :  { %2351 = vmatpush.bf16.msrb.mxu3 %v4196_v43 }
 0x3c9   :  { %5028 = vpow2.f32 %v4146_v26 }
 0x3ca   :  { %5030 = vpow2.f32 %v4147_v62 }
 0x3cb   :  { %v2021_v4 = vpop.f32.mrf.mxu2  ;;  %v2034_v48 = vpop.f32.mrf.mxu3  ;;  %2339 = vmatpush.bf16.msrb.mxu2 %v4176_v7 }
 0x3cc   :  { %v2041_v0 = vadd.f32 %v2034_v48, %v5516_v6  ;;  %v1997_v5 = vpop.f32.mrf.mxu0  ;;  %v2010_v12 = vpop.f32.mrf.mxu1  ;;  %v4160_v6 = vor.u32 %v4822_v25, %v4159_v11  ;;  %2352 = vmatpush.bf16.msrb.mxu3 %v4180_v41  ;;  %v2040_v50 = vadd.f32 %v2021_v4, %v5513_v3 }
 0x3ce   :  { %v4148_v15 = vmul.f32 -1.442695, %v2041_v0 }
 0x3cf   :  { %v5029_v55 = vpop.eup %5028  ;;  %2340 = vmatpush.bf16.msrb.mxu2 %v4160_v6 }
 0x3d0   :  { %v5031_v18 = vpop.eup %5030  ;;  %v2045_v20 = vadd.f32 1.0, %v5029_v55  ;;  %5032 = vpow2.f32 %v4148_v15  ;;  %2353 = vmatpush.bf16.msrb.mxu3 %v4164_v17  ;;  %v4879_v55 = vld [vmem:[#allocation14 + $0xe4] sm:$0xf]  ;;  %v4882_v17 = vld [vmem:[#allocation14 + $0xf4] sm:$0xf0] }
 0x3d1   :  { %v2064_v19 = vadd.f32 1.0, %v5031_v18  ;;  %v4396_v18 = vld [vmem:[#allocation14 + $0xf0] sm:$0xf0] }
 0x3d2   :  { %5034 = vrcp.f32 %v2045_v20  ;;  %v2057_v52 = vand.u32 2147483648, %v2045_v20  ;;  %v2055_v23 = vand.u32 2147483647, %v2045_v20  ;;  %vm2051_vm2 = vweird.f32 %v2045_v20 }
 0x3d3   :  { %5036 = vrcp.f32 %v2064_v19  ;;  %v2023_v27 = vpop.f32.mrf.mxu2  ;;  %v2036_v29 = vpop.f32.mrf.mxu3  ;;  %v2076_v37 = vand.u32 2147483648, %v2064_v19  ;;  %v2074_v40 = vand.u32 2147483647, %v2064_v19  ;;  %vm2070_vm3 = vweird.f32 %v2064_v19 }
 0x3d4   :  { %v2058_v3 = vor.u32 1.1754944e-38, %v2057_v52  ;;  %vm2056_vm6 = vcmp.eq.f32.partialorder %v2055_v23, 8.507059e+37  ;;  %v4880_v29 = vld [vmem:[#allocation14 + $0xec] sm:$0xf]  ;;  %v4388_v23 = vld [vmem:[#allocation14 + $0xd8] sm:$0xf0] }
 0x3d5   :  { %v2077_v48 = vor.u32 1.1754944e-38, %v2076_v37  ;;  %vm2075_vm7 = vcmp.eq.f32.partialorder %v2074_v40, 8.507059e+37  ;;  %v4362_v40 = vld [vmem:[#allocation14 + $0xa0] sm:$0xf] }
 0x3d6   :  { %v5033_v42 = vpop.eup %5032 }
 0x3d7   :  { %v2084_v26 = vadd.f32 1.0, %v5033_v42  ;;  %v4404_v42 = vld [vmem:[#allocation14 + $0xf8] sm:$0xf0] }
 0x3d8   :  { %v5035_v62 = vpop.eup %5034 }
 0x3d9   :  { %v5037_v33 = vpop.eup %5036  ;;  %v2047_v46 = vmul.f32 %v5035_v62, %v2045_v20  ;;  %5038 = vrcp.f32 %v2084_v26  ;;  %vm2052_vm0 = vweird.f32 %v5035_v62  ;;  %v2096_v9 = vand.u32 2147483648, %v2084_v26  ;;  %v4402_v20 = vld [vmem:[#allocation14 + $0xe8] sm:$0xf] }
 0x3da   :  { %v2066_v24 = vmul.f32 %v5037_v33, %v2064_v19  ;;  %5040 = vtanh.f32 %v2040_v50  ;;  %vm2071_vm1 = vweird.f32 %v5037_v33  ;;  %vm2053_vm4 = vmor %vm2051_vm2, %vm2052_vm0  ;;  %vm2090_vm9 = vweird.f32 %v2084_v26  ;;  %v4877_v50 = vld [vmem:[#allocation14 + $0xcc] sm:$0xf0] }
 0x3db   :  { %v2048_v31 = vsub.f32 1.0, %v2047_v46  ;;  %vm2072_vm5 = vmor %vm2070_vm3, %vm2071_vm1  ;;  %v2094_v10 = vand.u32 2147483647, %v2084_v26  ;;  %v2097_v11 = vor.u32 1.1754944e-38, %v2096_v9  ;;  %v4399_v19 = vor.u32 %v4879_v55, %v4396_v18  ;;  %v4354_v9 = vld [vmem:[#allocation14 + $0x88] sm:$0xf] }
 0x3dc   :  { %v2067_v39 = vsub.f32 1.0, %v2066_v24  ;;  %v4403_v27 = vor.u32 %v4882_v17, %v4402_v20  ;;  %v4380_v24 = vld [vmem:[#allocation14 + $0xd0] sm:$0xf0]  ;;  %v375_v55 = vadd.f32 %v5458_v21, %v5442_v13  ;;  %v4338_v17 = vld [vmem:[#allocation14 + $0x68] sm:$0xf] }
 0x3dd   :  { %v2049_v51 = vmul.f32 %v5035_v62, %v2048_v31  ;;  %vm2095_vm11 = vcmp.eq.f32.partialorder %v2094_v10, 8.507059e+37  ;;  %2641 = vmatpush.bf16.msrb.mxu1 %v4399_v19  ;;  %v4386_v31 = vld [vmem:[#allocation14 + $0xc8] sm:$0xf]  ;;  %v4870_v10 = vld [vmem:[#allocation14 + $0x94] sm:$0xf0] }
 0x3de   :  { %v2068_v43 = vmul.f32 %v5037_v33, %v2067_v39  ;;  %2654 = vmatpush.bf16.msra.mxu2 %v4403_v27  ;;  %v4878_v39 = vld [vmem:[#allocation14 + $0xd4] sm:$0xf0]  ;;  %v4332_v20 = vld [vmem:[#allocation14 + $0x70] sm:$0xf0]  ;;  %v4314_v21 = vld [vmem:[#allocation14 + $0x40] sm:$0xf] }
 0x3df   :  { %v5039_v61 = vpop.eup %5038  ;;  %v2050_v44 = vadd.f32 %v5035_v62, %v2049_v51  ;;  %v4387_v37 = vor.u32 %v4878_v39, %v4386_v31  ;;  %v4876_v51 = vld [vmem:[#allocation14 + $0xcc] sm:$0xf]  ;;  %v4866_v19 = vld [vmem:[#allocation14 + $0x74] sm:$0xf0]  ;;  %v4861_v31 = vld [vmem:[#allocation14 + $0x4c] sm:$0xf0] }
 0x3e0   :  { %v2069_v2 = vadd.f32 %v5037_v33, %v2068_v43  ;;  %v2086_v4 = vmul.f32 %v5039_v61, %v2084_v26  ;;  %v5041_v59 = vpop.eup %5040  ;;  %vm2091_vm8 = vweird.f32 %v5039_v61  ;;  %v4407_v26 = vor.u32 %v4880_v29, %v4404_v42 }
 0x3e1   :  { %v2054_v54 = vsel %vm2053_vm4, %v5035_v62, %v2050_v44  ;;  %vm2092_vm10 = vmor %vm2090_vm9, %vm2091_vm8  ;;  %v4378_v62 = vld [vmem:[#allocation14 + $0xc0] sm:$0xf]  ;;  %v4391_v43 = vor.u32 %v4876_v51, %v4388_v23  ;;  %v4871_v44 = vld [vmem:[#allocation14 + $0xa4] sm:$0xf] }
 0x3e2   :  { %v2059_v38 = vsel %vm2056_vm6, %v2058_v3, %v2054_v54  ;;  %v2073_v53 = vsel %vm2072_vm5, %v5037_v33, %v2069_v2  ;;  %v2087_v0 = vsub.f32 1.0, %v2086_v4  ;;  %v4875_v33 = vld [vmem:[#allocation14 + $0xc4] sm:$0xf]  ;;  %2667 = vmatpush.bf16.msra.mxu3 %v4407_v26  ;;  %v4379_v46 = vor.u32 %v4877_v50, %v4378_v62  ;;  %2655 = vmatpush.bf16.msra.mxu2 %v4387_v37  ;;  %v4364_v2 = vld [vmem:[#allocation14 + $0xb0] sm:$0xf0] }
 0x3e3   :  { %v2078_v5 = vsel %vm2075_vm7, %v2077_v48, %v2073_v53  ;;  %v2101_v12 = vmul.f32 %v5041_v59, %v2059_v38  ;;  %v4383_v52 = vor.u32 %v4875_v33, %v4380_v24  ;;  %v4370_v4 = vld [vmem:[#allocation14 + $0xa8] sm:$0xf]  ;;  %v4874_v48 = vld [vmem:[#allocation14 + $0xb4] sm:$0xf0]  ;;  %v4367_v54 = vor.u32 %v4871_v44, %v4364_v2  ;;  %v4872_v38 = vld [vmem:[#allocation14 + $0xac] sm:$0xf] }
 0x3e4   :  { %v2100_v7 = vmul.f32 %v2078_v5, %v5606_v63  ;;  %v2088_v41 = vmul.f32 %v5039_v61, %v2087_v0  ;;  %v4394_v63 = vld [vmem:[#allocation14 + $0xe0] sm:$0xf]  ;;  %v4371_v59 = vor.u32 %v4874_v48, %v4370_v4  ;;  %v4372_v53 = vld [vmem:[#allocation14 + $0xb8] sm:$0xf0]  ;;  %v4339_v26 = vor.u32 %v4866_v19, %v4338_v17  ;;  %v4864_v62 = vld [vmem:[#allocation14 + $0x6c] sm:$0xf] }
 0x3e5   :  { %v4395_v6 = vor.u32 %v4881_v16, %v4394_v63  ;;  %2642 = vmatpush.bf16.msrb.mxu1 %v4383_v52  ;;  %v4375_v0 = vor.u32 %v4872_v38, %v4372_v53  ;;  %v4346_v5 = vld [vmem:[#allocation14 + $0x80] sm:$0xf]  ;;  %v4865_v63 = vld [vmem:[#allocation14 + $0x6c] sm:$0xf0]  ;;  %v4863_v16 = vld [vmem:[#allocation14 + $0x64] sm:$0xf]  ;;  %v4315_v37 = vor.u32 %v4861_v31, %v4314_v21 }
 0x3e6   :  { %v5614_v45 = vadd.f32 %v2101_v12, %v2100_v7  ;;  %v2089_v8 = vadd.f32 %v5039_v61, %v2088_v41  ;;  %2668 = vmatpush.bf16.msra.mxu3 %v4391_v43  ;;  %2656 = vmatpush.bf16.msra.mxu2 %v4371_v59  ;;  %v4869_v12 = vld [vmem:[#allocation14 + $0x8c] sm:$0xf0]  ;;  %v4867_v7 = vld [vmem:[#allocation14 + $0x84] sm:$0xf]  ;;  %v4335_v42 = vor.u32 %v4863_v16, %v4332_v20  ;;  %v4340_v50 = vld [vmem:[#allocation14 + $0x78] sm:$0xf0] }
 0x3e7   :  { %2628 = vmatpush.bf16.msrb.mxu0 %v4395_v6  ;;  %v4347_v41 = vor.u32 %v4869_v12, %v4346_v5  ;;  %v404_v6 = vadd.f32 %v5460_v22, %v5444_v14  ;;  %v4343_v24 = vor.u32 %v4864_v62, %v4340_v50  ;;  %v4859_v22 = vld [vmem:[#allocation14 + $0x44] sm:$0xf]  ;;  %v4316_v51 = vld [vmem:[#allocation14 + $0x50] sm:$0xf0]  ;;  %v4322_v43 = vld [vmem:[#allocation14 + $0x48] sm:$0xf] }
 0x3e8   :  { %5042 = vtanh.f32 %v5614_v45  ;;  %v2093_v47 = vsel %vm2092_vm10, %v5039_v61, %v2089_v8  ;;  %v4873_v61 = vld [vmem:[#allocation14 + $0xac] sm:$0xf0]  ;;  %v4348_v8 = vld [vmem:[#allocation14 + $0x90] sm:$0xf0]  ;;  %v4319_v23 = vor.u32 %v4859_v22, %v4316_v51  ;;  %v4298_v2 = vld [vmem:[#allocation14 + $0x20] sm:$0xf] }
 0x3e9   :  { %v2098_v15 = vsel %vm2095_vm11, %v2097_v11, %v2093_v47  ;;  %v4363_v3 = vor.u32 %v4873_v61, %v4362_v40  ;;  %2643 = vmatpush.bf16.msrb.mxu1 %v4367_v54  ;;  %v4351_v47 = vor.u32 %v4867_v7, %v4348_v8  ;;  %v4355_v11 = vor.u32 %v4870_v10, %v4354_v9  ;;  %v4862_v40 = vld [vmem:[#allocation14 + $0x54] sm:$0xf0]  ;;  %v4860_v61 = vld [vmem:[#allocation14 + $0x4c] sm:$0xf]  ;;  %v4857_v4 = vld [vmem:[#allocation14 + $0x2c] sm:$0xf0] }
 0x3ea   :  { %2669 = vmatpush.bf16.msra.mxu3 %v4375_v0  ;;  %v4323_v44 = vor.u32 %v4862_v40, %v4322_v43  ;;  %v4299_v54 = vor.u32 %v4857_v4, %v4298_v2  ;;  %v4855_v59 = vld [vmem:[#allocation14 + $0x24] sm:$0xf]  ;;  %v4300_v38 = vld [vmem:[#allocation14 + $0x30] sm:$0xf0]  ;;  %v4306_v53 = vld [vmem:[#allocation14 + $0x28] sm:$0xf] }
 0x3eb   :  { %2629 = vmatpush.bf16.msrb.mxu0 %v4379_v46  ;;  %2657 = vmatpush.bf16.msra.mxu2 %v4355_v11  ;;  %v4303_v12 = vor.u32 %v4855_v59, %v4300_v38  ;;  %v4858_v7 = vld [vmem:[#allocation14 + $0x34] sm:$0xf0]  ;;  %v4308_v8 = vld [vmem:[#allocation14 + $0x38] sm:$0xf0]  ;;  %v4284_v16 = vld [vmem:[#allocation14 + $0x10] sm:$0xf0] }
 0x3ec   :  { %v4307_v11 = vor.u32 %v4858_v7, %v4306_v53  ;;  %v4852_v17 = vld [vmem:[#allocation14 + $0xc] sm:$0xf]  ;;  %v4292_v19 = vld [vmem:[#allocation14 + $0x18] sm:$0xf0] }
 0x3ed   :  { %2644 = vmatpush.bf16.msrb.mxu1 %v4351_v47 }
 0x3ee   :  { %v5043_v25 = vpop.eup %5042 }
 0x3ef   :  { %v2104_v32 = vmul.f32 %v5043_v25, %v2098_v15  ;;  %2630 = vmatpush.bf16.msrb.mxu0 %v4363_v3  ;;  %v4868_v25 = vld [vmem:[#allocation14 + $0x8c] sm:$0xf]  ;;  %v4356_v15 = vld [vmem:[#allocation14 + $0x98] sm:$0xf0]  ;;  %2658 = vmatpush.bf16.msra.mxu2 %v4339_v26  ;;  %v4295_v26 = vor.u32 %v4852_v17, %v4292_v19  ;;  %v4527_v17 = vld [vmem:[#allocation14 + $0xf0] sm:$0xf0] }
 0x3f0   :  { %v4324_v3 = vld [vmem:[#allocation14 + $0x58] sm:$0xf0]  ;;  %v4533_v19 = vld [vmem:[#allocation14 + $0xe8] sm:$0xf] }
 0x3f1   :  { %v2105_v34 = vpack.c.bf16 %v2104_v32, %v2104_v32  ;;  %v4359_v32 = vor.u32 %v4868_v25, %v4356_v15  ;;  %2645 = vmatpush.bf16.msrb.mxu1 %v4335_v42  ;;  %v4327_v48 = vor.u32 %v4860_v61, %v4324_v3  ;;  %v4282_v15 = vld [vmem:[#allocation14] sm:$0xf] }
 0x3f3   :  { %2107 = vst [vmem:[#allocation3 + $0x10] sm:$0xf] %v2105_v34  ;;  %2315 = vmatmul.bf16.vlgmr.msra.gmra.mxu0 %v2105_v34  ;;  %2328 = vmatmul.bf16.vlgmr.msra.gmra.mxu1 %v2105_v34 }
 0x3f4   :  { %2341 = vmatmul.bf16.vlgmr.msrb.gmra.mxu2 %v2105_v34  ;;  %2354 = vmatmul.bf16.vlgmr.msrb.gmra.mxu3 %v2105_v34  ;;  %v4330_v34 = vld [vmem:[#allocation14 + $0x60] sm:$0xf] }
 0x3f5   :  { %2631 = vmatpush.bf16.msrb.mxu0 %v4347_v41  ;;  %2670 = vmatpush.bf16.msra.mxu3 %v4359_v32  ;;  %v4331_v18 = vor.u32 %v4865_v63, %v4330_v34  ;;  %v4856_v41 = vld [vmem:[#allocation14 + $0x2c] sm:$0xf]  ;;  %v4853_v32 = vld [vmem:[#allocation14 + $0xc] sm:$0xf0]  ;;  %v4851_v34 = vld [vmem:[#allocation14 + $0x4] sm:$0xf] }
 0x3f6   :  { %2646 = vmatpush.bf16.msrb.mxu1 %v4319_v23  ;;  %2659 = vmatpush.bf16.msra.mxu2 %v4323_v44  ;;  %v4311_v25 = vor.u32 %v4856_v41, %v4308_v8  ;;  %v4283_v63 = vor.u32 %v4853_v32, %v4282_v15  ;;  %v4287_v20 = vor.u32 %v4851_v34, %v4284_v16 }
 0x3f9   :  { %2632 = vmatpush.bf16.msrb.mxu0 %v4331_v18  ;;  %2671 = vmatpush.bf16.msra.mxu3 %v4343_v24 }
 0x3fa   :  { %2647 = vmatpush.bf16.msrb.mxu1 %v4303_v12  ;;  %2660 = vmatpush.bf16.msra.mxu2 %v4307_v11 }
 0x3fd   :  { %2633 = vmatpush.bf16.msrb.mxu0 %v4315_v37  ;;  %2672 = vmatpush.bf16.msra.mxu3 %v4327_v48 }
 0x3fe   :  { %2648 = vmatpush.bf16.msrb.mxu1 %v4287_v20 }
 0x401   :  { %2634 = vmatpush.bf16.msrb.mxu0 %v4299_v54  ;;  %2673 = vmatpush.bf16.msra.mxu3 %v4311_v25 }
 0x405   :  { %2635 = vmatpush.bf16.msrb.mxu0 %v4283_v63  ;;  %2674 = vmatpush.bf16.msra.mxu3 %v4295_v26  ;;  %v4535_v26 = vld [vmem:[#allocation14 + $0xf8] sm:$0xf0] }
 0x470   :  { %v2316_v27 = vpop.f32.mrf.mxu0  ;;  %v2329_v29 = vpop.f32.mrf.mxu1 }
 0x471   :  { %v2359_v33 = vadd.f32 %v2316_v27, %v375_v55  ;;  %v2360_v46 = vadd.f32 %v2329_v29, %v404_v6  ;;  %v4290_v55 = vld [vmem:[#allocation14 + $0x8] sm:$0xf]  ;;  %v4854_v6 = vld [vmem:[#allocation14 + $0x14] sm:$0xf0] }
 0x473   :  { %v4277_v39 = vmul.f32 -1.442695, %v2359_v33  ;;  %v4278_v52 = vmul.f32 -1.442695, %v2360_v46 }
 0x475   :  { %5044 = vpow2.f32 %v4277_v39 }
 0x476   :  { %5046 = vpow2.f32 %v4278_v52 }
 0x477   :  { %v2342_v0 = vpop.f32.mrf.mxu2  ;;  %v2355_v5 = vpop.f32.mrf.mxu3 }
 0x478   :  { %v2362_v9 = vadd.f32 %v2355_v5, %v5526_v60  ;;  %v2318_v10 = vpop.f32.mrf.mxu0  ;;  %v2331_v47 = vpop.f32.mrf.mxu1  ;;  %v4291_v60 = vor.u32 %v4854_v6, %v4290_v55  ;;  %v2361_v31 = vadd.f32 %v2342_v0, %v5523_v57  ;;  %v4913_v6 = vld [vmem:[#allocation14 + $0xec] sm:$0xf0] }
 0x47a   :  { %v4279_v18 = vmul.f32 -1.442695, %v2362_v9  ;;  %2661 = vmatpush.bf16.msra.mxu2 %v4291_v60 }
 0x47b   :  { %v5045_v27 = vpop.eup %5044 }
 0x47c   :  { %v5047_v29 = vpop.eup %5046  ;;  %v2366_v42 = vadd.f32 1.0, %v5045_v27  ;;  %5048 = vpow2.f32 %v4279_v18  ;;  %v4911_v18 = vld [vmem:[#allocation14 + $0xe4] sm:$0xf]  ;;  %v4914_v27 = vld [vmem:[#allocation14 + $0xf4] sm:$0xf0] }
 0x47d   :  { %v2385_v62 = vadd.f32 1.0, %v5047_v29  ;;  %v4530_v60 = vor.u32 %v4911_v18, %v4527_v17  ;;  %v4534_v29 = vor.u32 %v4914_v27, %v4533_v19  ;;  %v4896_v27 = vld [vmem:[#allocation14 + $0x6c] sm:$0xf] }
 0x47e   :  { %5050 = vrcp.f32 %v2366_v42  ;;  %v2378_v23 = vand.u32 2147483648, %v2366_v42  ;;  %v2376_v61 = vand.u32 2147483647, %v2366_v42  ;;  %vm2372_vm14 = vweird.f32 %v2366_v42 }
 0x47f   :  { %5052 = vrcp.f32 %v2385_v62  ;;  %v2344_v50 = vpop.f32.mrf.mxu2  ;;  %v2357_v33 = vpop.f32.mrf.mxu3  ;;  %v2397_v43 = vand.u32 2147483648, %v2385_v62  ;;  %v2395_v3 = vand.u32 2147483647, %v2385_v62  ;;  %vm2391_vm15 = vweird.f32 %v2385_v62  ;;  %2962 = vmatpush.bf16.msra.mxu1 %v4530_v60  ;;  %2975 = vmatpush.bf16.msrb.mxu2 %v4534_v29  ;;  %v4471_v60 = vld [vmem:[#allocation14 + $0x78] sm:$0xf0] }
 0x480   :  { %v2379_v57 = vor.u32 1.1754944e-38, %v2378_v23  ;;  %vm2377_vm2 = vcmp.eq.f32.partialorder %v2376_v61, 8.507059e+37  ;;  %v4509_v50 = vld [vmem:[#allocation14 + $0xc0] sm:$0xf]  ;;  %v4909_v33 = vld [vmem:[#allocation14 + $0xcc] sm:$0xf0] }
 0x481   :  { %v2398_v59 = vor.u32 1.1754944e-38, %v2397_v43  ;;  %vm2396_vm3 = vcmp.eq.f32.partialorder %v2395_v3, 8.507059e+37  ;;  %v4493_v43 = vld [vmem:[#allocation14 + $0xa0] sm:$0xf]  ;;  %v4903_v61 = vld [vmem:[#allocation14 + $0xa4] sm:$0xf] }
 0x482   :  { %v5049_v46 = vpop.eup %5048  ;;  %v4495_v3 = vld [vmem:[#allocation14 + $0xb0] sm:$0xf0] }
 0x483   :  { %v2405_v24 = vadd.f32 1.0, %v5049_v46  ;;  %v4907_v46 = vld [vmem:[#allocation14 + $0xc4] sm:$0xf] }
 0x484   :  { %v5051_v21 = vpop.eup %5050 }
 0x485   :  { %v5053_v22 = vpop.eup %5052  ;;  %v2368_v39 = vmul.f32 %v5051_v21, %v2366_v42  ;;  %5054 = vrcp.f32 %v2405_v24  ;;  %vm2373_vm12 = vweird.f32 %v5051_v21  ;;  %v2417_v11 = vand.u32 2147483648, %v2405_v24  ;;  %v4912_v42 = vld [vmem:[#allocation14 + $0xec] sm:$0xf] }
 0x486   :  { %v2387_v52 = vmul.f32 %v5053_v22, %v2385_v62  ;;  %5056 = vtanh.f32 %v2361_v31  ;;  %vm2392_vm13 = vweird.f32 %v5053_v22  ;;  %vm2374_vm0 = vmor %vm2372_vm14, %vm2373_vm12  ;;  %vm2411_vm5 = vweird.f32 %v2405_v24  ;;  %v4517_v31 = vld [vmem:[#allocation14 + $0xc8] sm:$0xf] }
 0x487   :  { %v2369_v37 = vsub.f32 1.0, %v2368_v39  ;;  %vm2393_vm1 = vmor %vm2391_vm15, %vm2392_vm13  ;;  %v2415_v25 = vand.u32 2147483647, %v2405_v24  ;;  %v2418_v32 = vor.u32 1.1754944e-38, %v2417_v11  ;;  %v4538_v62 = vor.u32 %v4912_v42, %v4535_v26  ;;  %v4900_v11 = vld [vmem:[#allocation14 + $0x8c] sm:$0xf] }
 0x488   :  { %v2388_v51 = vsub.f32 1.0, %v2387_v52  ;;  %v4474_v26 = vor.u32 %v4896_v27, %v4471_v60 }
 0x489   :  { %v2370_v40 = vmul.f32 %v5051_v21, %v2369_v37  ;;  %vm2416_vm7 = vcmp.eq.f32.partialorder %v2415_v25, 8.507059e+37  ;;  %2988 = vmatpush.bf16.msrb.mxu3 %v4538_v62  ;;  %v4908_v37 = vld [vmem:[#allocation14 + $0xcc] sm:$0xf]  ;;  %v4487_v25 = vld [vmem:[#allocation14 + $0x98] sm:$0xf0] }
 0x48a   :  { %v2389_v44 = vmul.f32 %v5053_v22, %v2388_v51  ;;  %v4519_v51 = vld [vmem:[#allocation14 + $0xd8] sm:$0xf0]  ;;  %v4445_v62 = vld [vmem:[#allocation14 + $0x40] sm:$0xf] }
 0x48b   :  { %v5055_v2 = vpop.eup %5054  ;;  %v2371_v4 = vadd.f32 %v5051_v21, %v2370_v40  ;;  %v4522_v23 = vor.u32 %v4908_v37, %v4519_v51  ;;  %v4905_v40 = vld [vmem:[#allocation14 + $0xac] sm:$0xf0]  ;;  %v4892_v37 = vld [vmem:[#allocation14 + $0x4c] sm:$0xf]  ;;  %v4429_v51 = vld [vmem:[#allocation14 + $0x20] sm:$0xf] }
 0x48c   :  { %v2390_v48 = vadd.f32 %v5053_v22, %v2389_v44  ;;  %v2407_v54 = vmul.f32 %v5055_v2, %v2405_v24  ;;  %v5057_v53 = vpop.eup %5056  ;;  %vm2412_vm4 = vweird.f32 %v5055_v2  ;;  %v4510_v24 = vor.u32 %v4909_v33, %v4509_v50  ;;  %v4893_v50 = vld [vmem:[#allocation14 + $0x4c] sm:$0xf0]  ;;  %v4891_v33 = vld [vmem:[#allocation14 + $0x44] sm:$0xf] }
 0x48d   :  { %v2375_v38 = vsel %vm2374_vm0, %v5051_v21, %v2371_v4  ;;  %vm2413_vm6 = vmor %vm2411_vm5, %vm2412_vm4  ;;  %v4511_v21 = vld [vmem:[#allocation14 + $0xd0] sm:$0xf0]  ;;  %2989 = vmatpush.bf16.msrb.mxu3 %v4522_v23  ;;  %v4494_v44 = vor.u32 %v4905_v40, %v4493_v43  ;;  %v4906_v4 = vld [vmem:[#allocation14 + $0xb4] sm:$0xf0] }
 0x48e   :  { %v2380_v0 = vsel %vm2377_vm2, %v2379_v57, %v2375_v38  ;;  %v2394_v5 = vsel %vm2393_vm1, %v5053_v22, %v2390_v48  ;;  %v2408_v12 = vsub.f32 1.0, %v2407_v54  ;;  %v4910_v22 = vld [vmem:[#allocation14 + $0xd4] sm:$0xf0]  ;;  %v4514_v39 = vor.u32 %v4907_v46, %v4511_v21  ;;  %v4904_v54 = vld [vmem:[#allocation14 + $0xac] sm:$0xf] }
 0x48f   :  { %v2399_v7 = vsel %vm2396_vm3, %v2398_v59, %v2394_v5  ;;  %v2422_v41 = vmul.f32 %v5057_v53, %v2380_v0  ;;  %v4518_v52 = vor.u32 %v4910_v22, %v4517_v31  ;;  %v4498_v57 = vor.u32 %v4903_v61, %v4495_v3  ;;  %v4503_v59 = vld [vmem:[#allocation14 + $0xb8] sm:$0xf0]  ;;  %v4477_v53 = vld [vmem:[#allocation14 + $0x80] sm:$0xf]  ;;  %v4901_v0 = vld [vmem:[#allocation14 + $0x8c] sm:$0xf0] }
 0x490   :  { %v2421_v8 = vmul.f32 %v2399_v7, %v5614_v45  ;;  %v2409_v9 = vmul.f32 %v5055_v2, %v2408_v12  ;;  %v4525_v45 = vld [vmem:[#allocation14 + $0xe0] sm:$0xf]  ;;  %2963 = vmatpush.bf16.msra.mxu1 %v4514_v39  ;;  %v4506_v38 = vor.u32 %v4904_v54, %v4503_v59  ;;  %v4899_v5 = vld [vmem:[#allocation14 + $0x84] sm:$0xf]  ;;  %v4478_v12 = vor.u32 %v4901_v0, %v4477_v53  ;;  %v4479_v7 = vld [vmem:[#allocation14 + $0x90] sm:$0xf0] }
 0x491   :  { %v4526_v20 = vor.u32 %v4913_v6, %v4525_v45  ;;  %2976 = vmatpush.bf16.msrb.mxu2 %v4518_v52  ;;  %v4469_v45 = vld [vmem:[#allocation14 + $0x68] sm:$0xf]  ;;  %v4898_v6 = vld [vmem:[#allocation14 + $0x74] sm:$0xf0]  ;;  %v4446_v21 = vor.u32 %v4893_v50, %v4445_v62  ;;  %v4447_v31 = vld [vmem:[#allocation14 + $0x50] sm:$0xf0] }
 0x492   :  { %v5624_v10 = vadd.f32 %v2422_v41, %v2421_v8  ;;  %v2410_v47 = vadd.f32 %v5055_v2, %v2409_v9  ;;  %2990 = vmatpush.bf16.msrb.mxu3 %v4506_v38  ;;  %v4485_v41 = vld [vmem:[#allocation14 + $0x88] sm:$0xf]  ;;  %v4902_v8 = vld [vmem:[#allocation14 + $0x94] sm:$0xf0]  ;;  %v4482_v9 = vor.u32 %v4899_v5, %v4479_v7  ;;  %v4470_v19 = vor.u32 %v4898_v6, %v4469_v45  ;;  %v4889_v23 = vld [vmem:[#allocation14 + $0x2c] sm:$0xf0] }
 0x493   :  { %2949 = vmatpush.bf16.msra.mxu0 %v4526_v20  ;;  %v4450_v22 = vor.u32 %v4891_v33, %v4447_v31  ;;  %v4453_v39 = vld [vmem:[#allocation14 + $0x48] sm:$0xf]  ;;  %v4894_v52 = vld [vmem:[#allocation14 + $0x54] sm:$0xf0]  ;;  %v4430_v40 = vor.u32 %v4889_v23, %v4429_v51  ;;  %v4887_v61 = vld [vmem:[#allocation14 + $0x24] sm:$0xf] }
 0x494   :  { %5058 = vtanh.f32 %v5624_v10  ;;  %v2414_v15 = vsel %vm2413_vm6, %v5055_v2, %v2410_v47  ;;  %v4501_v2 = vld [vmem:[#allocation14 + $0xa8] sm:$0xf]  ;;  %2964 = vmatpush.bf16.msra.mxu1 %v4498_v57  ;;  %v4486_v47 = vor.u32 %v4902_v8, %v4485_v41  ;;  %v4888_v54 = vld [vmem:[#allocation14 + $0x2c] sm:$0xf]  ;;  %v4439_v59 = vld [vmem:[#allocation14 + $0x38] sm:$0xf0] }
 0x495   :  { %v2419_v63 = vsel %vm2416_vm7, %v2418_v32, %v2414_v15  ;;  %v4502_v48 = vor.u32 %v4906_v4, %v4501_v2  ;;  %v4490_v15 = vor.u32 %v4900_v11, %v4487_v25  ;;  %v4461_v32 = vld [vmem:[#allocation14 + $0x60] sm:$0xf]  ;;  %v4437_v3 = vld [vmem:[#allocation14 + $0x28] sm:$0xf]  ;;  %v4885_v41 = vld [vmem:[#allocation14 + $0xc] sm:$0xf0] }
 0x496   :  { %v4413_v7 = vld [vmem:[#allocation14] sm:$0xf]  ;;  %v4883_v8 = vld [vmem:[#allocation14 + $0x4] sm:$0xf]  ;;  %v4421_v11 = vld [vmem:[#allocation14 + $0x8] sm:$0xf] }
 0x497   :  { %2950 = vmatpush.bf16.msra.mxu0 %v4510_v24  ;;  %2977 = vmatpush.bf16.msrb.mxu2 %v4502_v48  ;;  %v4890_v48 = vld [vmem:[#allocation14 + $0x34] sm:$0xf0] }
 0x498   :  { %2965 = vmatpush.bf16.msra.mxu1 %v4482_v9  ;;  %2991 = vmatpush.bf16.msrb.mxu3 %v4490_v15  ;;  %v4438_v5 = vor.u32 %v4890_v48, %v4437_v3  ;;  %v4414_v9 = vor.u32 %v4885_v41, %v4413_v7  ;;  %v4886_v25 = vld [vmem:[#allocation14 + $0x14] sm:$0xf0] }
 0x49a   :  { %v5059_v34 = vpop.eup %5058 }
 0x49b   :  { %v2425_v16 = vmul.f32 %v5059_v34, %v2419_v63  ;;  %2951 = vmatpush.bf16.msra.mxu0 %v4494_v44  ;;  %2978 = vmatpush.bf16.msrb.mxu2 %v4486_v47  ;;  %v4897_v34 = vld [vmem:[#allocation14 + $0x6c] sm:$0xf0]  ;;  %v4895_v63 = vld [vmem:[#allocation14 + $0x64] sm:$0xf]  ;;  %v4431_v44 = vld [vmem:[#allocation14 + $0x30] sm:$0xf0] }
 0x49c   :  { %2992 = vmatpush.bf16.msrb.mxu3 %v4474_v26  ;;  %v4434_v57 = vor.u32 %v4887_v61, %v4431_v44  ;;  %v4415_v47 = vld [vmem:[#allocation14 + $0x10] sm:$0xf0] }
 0x49d   :  { %v2426_v55 = vpack.c.bf16 %v2425_v16, %v2425_v16  ;;  %v4462_v16 = vor.u32 %v4897_v34, %v4461_v32  ;;  %v4418_v32 = vor.u32 %v4883_v8, %v4415_v47  ;;  %v4884_v34 = vld [vmem:[#allocation14 + $0xc] sm:$0xf]  ;;  %v409_v8 = vadd.f32 %v5482_v36, %v5444_v14 }
 0x49f   :  { %2428 = vst [vmem:[#allocation3 + $0x14] sm:$0xf] %v2426_v55  ;;  %2636 = vmatmul.bf16.vlgmr.msrb.gmra.mxu0 %v2426_v55  ;;  %2649 = vmatmul.bf16.vlgmr.msrb.gmra.mxu1 %v2426_v55 }
 0x4a0   :  { %2662 = vmatmul.bf16.vlgmr.msra.gmra.mxu2 %v2426_v55  ;;  %2675 = vmatmul.bf16.vlgmr.msra.gmra.mxu3 %v2426_v55  ;;  %v4463_v55 = vld [vmem:[#allocation14 + $0x70] sm:$0xf0] }
 0x4a1   :  { %2952 = vmatpush.bf16.msra.mxu0 %v4478_v12  ;;  %v4466_v17 = vor.u32 %v4895_v63, %v4463_v55  ;;  %2979 = vmatpush.bf16.msrb.mxu2 %v4470_v19  ;;  %v4442_v12 = vor.u32 %v4888_v54, %v4439_v59  ;;  %v4423_v63 = vld [vmem:[#allocation14 + $0x18] sm:$0xf0] }
 0x4a2   :  { %v4426_v6 = vor.u32 %v4884_v34, %v4423_v63 }
 0x4a3   :  { %2966 = vmatpush.bf16.msra.mxu1 %v4466_v17 }
 0x4a5   :  { %2953 = vmatpush.bf16.msra.mxu0 %v4462_v16 }
 0x4a7   :  { %2967 = vmatpush.bf16.msra.mxu1 %v4450_v22 }
 0x4a9   :  { %2954 = vmatpush.bf16.msra.mxu0 %v4446_v21 }
 0x4ab   :  { %2968 = vmatpush.bf16.msra.mxu1 %v4434_v57 }
 0x4ad   :  { %2955 = vmatpush.bf16.msra.mxu0 %v4430_v40 }
 0x4af   :  { %2969 = vmatpush.bf16.msra.mxu1 %v4418_v32 }
 0x4b1   :  { %2956 = vmatpush.bf16.msra.mxu0 %v4414_v9 }
 0x51c   :  { %v2637_v18 = vpop.f32.mrf.mxu0  ;;  %v2650_v20 = vpop.f32.mrf.mxu1 }
 0x51d   :  { %v2680_v29 = vadd.f32 %v2637_v18, %v5469_v28  ;;  %v2681_v42 = vadd.f32 %v2650_v20, %v5472_v30  ;;  %v4454_v28 = vor.u32 %v4894_v52, %v4453_v39  ;;  %v4455_v30 = vld [vmem:[#allocation14 + $0x58] sm:$0xf0] }
 0x51e   :  { %v4458_v43 = vor.u32 %v4892_v37, %v4455_v30 }
 0x51f   :  { %v4408_v46 = vmul.f32 -1.442695, %v2680_v29  ;;  %v4409_v24 = vmul.f32 -1.442695, %v2681_v42  ;;  %2980 = vmatpush.bf16.msrb.mxu2 %v4454_v28 }
 0x520   :  { %2993 = vmatpush.bf16.msrb.mxu3 %v4458_v43 }
 0x521   :  { %5060 = vpow2.f32 %v4408_v46 }
 0x522   :  { %5062 = vpow2.f32 %v4409_v24 }
 0x523   :  { %v2663_v2 = vpop.f32.mrf.mxu2  ;;  %v2676_v4 = vpop.f32.mrf.mxu3  ;;  %2981 = vmatpush.bf16.msrb.mxu2 %v4438_v5 }
 0x524   :  { %v2683_v38 = vadd.f32 %v2676_v4, %v5538_v56  ;;  %v2639_v53 = vpop.f32.mrf.mxu0  ;;  %v2652_v0 = vpop.f32.mrf.mxu1  ;;  %v4422_v56 = vor.u32 %v4886_v25, %v4421_v11  ;;  %2994 = vmatpush.bf16.msrb.mxu3 %v4442_v12  ;;  %v2682_v29 = vadd.f32 %v2663_v2, %v5533_v49 }
 0x526   :  { %v4410_v15 = vmul.f32 -1.442695, %v2683_v38 }
 0x527   :  { %v5061_v16 = vpop.eup %5060  ;;  %2982 = vmatpush.bf16.msrb.mxu2 %v4422_v56 }
 0x528   :  { %v5063_v55 = vpop.eup %5062  ;;  %v2687_v45 = vadd.f32 1.0, %v5061_v16  ;;  %5064 = vpow2.f32 %v4410_v15  ;;  %2995 = vmatpush.bf16.msrb.mxu3 %v4426_v6 }
 0x529   :  { %v2706_v18 = vadd.f32 1.0, %v5063_v55 }
 0x52a   :  { %5066 = vrcp.f32 %v2687_v45  ;;  %v2699_v46 = vand.u32 2147483648, %v2687_v45  ;;  %v2697_v31 = vand.u32 2147483647, %v2687_v45  ;;  %vm2693_vm10 = vweird.f32 %v2687_v45 }
 0x52b   :  { %5068 = vrcp.f32 %v2706_v18  ;;  %v2665_v20 = vpop.f32.mrf.mxu2  ;;  %v2678_v17 = vpop.f32.mrf.mxu3  ;;  %v2718_v24 = vand.u32 2147483648, %v2706_v18  ;;  %v2716_v39 = vand.u32 2147483647, %v2706_v18  ;;  %vm2712_vm11 = vweird.f32 %v2706_v18 }
 0x52c   :  { %v2700_v49 = vor.u32 1.1754944e-38, %v2699_v46  ;;  %vm2698_vm14 = vcmp.eq.f32.partialorder %v2697_v31, 8.507059e+37 }
 0x52d   :  { %v2719_v51 = vor.u32 1.1754944e-38, %v2718_v24  ;;  %vm2717_vm15 = vcmp.eq.f32.partialorder %v2716_v39, 8.507059e+37 }
 0x52e   :  { %v5065_v19 = vpop.eup %5064 }
 0x52f   :  { %v2726_v27 = vadd.f32 1.0, %v5065_v19 }
 0x530   :  { %v5067_v60 = vpop.eup %5066 }
 0x531   :  { %v5069_v42 = vpop.eup %5068  ;;  %v2689_v26 = vmul.f32 %v5067_v60, %v2687_v45  ;;  %5070 = vrcp.f32 %v2726_v27  ;;  %vm2694_vm8 = vweird.f32 %v5067_v60  ;;  %v2738_v59 = vand.u32 2147483648, %v2726_v27 }
 0x532   :  { %v2708_v62 = vmul.f32 %v5069_v42, %v2706_v18  ;;  %5072 = vtanh.f32 %v2682_v29  ;;  %vm2713_vm9 = vweird.f32 %v5069_v42  ;;  %vm2695_vm12 = vmor %vm2693_vm10, %vm2694_vm8  ;;  %vm2732_vm1 = vweird.f32 %v2726_v27 }
 0x533   :  { %v2690_v50 = vsub.f32 1.0, %v2689_v26  ;;  %vm2714_vm13 = vmor %vm2712_vm11, %vm2713_vm9  ;;  %v2736_v38 = vand.u32 2147483647, %v2726_v27  ;;  %v2739_v0 = vor.u32 1.1754944e-38, %v2738_v59 }
 0x534   :  { %v2709_v33 = vsub.f32 1.0, %v2708_v62 }
 0x535   :  { %v2691_v21 = vmul.f32 %v5067_v60, %v2690_v50  ;;  %vm2737_vm3 = vcmp.eq.f32.partialorder %v2736_v38, 8.507059e+37 }
 0x536   :  { %v2710_v22 = vmul.f32 %v5069_v42, %v2709_v33 }
 0x537   :  { %v5071_v52 = vpop.eup %5070  ;;  %v2692_v37 = vadd.f32 %v5067_v60, %v2691_v21 }
 0x538   :  { %v2711_v28 = vadd.f32 %v5069_v42, %v2710_v22  ;;  %v2728_v30 = vmul.f32 %v5071_v52, %v2726_v27  ;;  %v5073_v43 = vpop.eup %5072  ;;  %vm2733_vm0 = vweird.f32 %v5071_v52 }
 0x539   :  { %v2696_v23 = vsel %vm2695_vm12, %v5067_v60, %v2692_v37  ;;  %vm2734_vm2 = vmor %vm2732_vm1, %vm2733_vm0 }
 0x53a   :  { %v2701_v40 = vsel %vm2698_vm14, %v2700_v49, %v2696_v23  ;;  %v2715_v61 = vsel %vm2714_vm13, %v5069_v42, %v2711_v28  ;;  %v2729_v44 = vsub.f32 1.0, %v2728_v30 }
 0x53b   :  { %v2720_v3 = vsel %vm2717_vm15, %v2719_v51, %v2715_v61  ;;  %v2743_v2 = vmul.f32 %v5073_v43, %v2701_v40 }
 0x53c   :  { %v2742_v4 = vmul.f32 %v2720_v3, %v5624_v10  ;;  %v2730_v57 = vmul.f32 %v5071_v52, %v2729_v44  ;;  %v380_v10 = vadd.f32 %v5480_v35, %v5442_v13 }
 0x53e   :  { %v5632_v48 = vadd.f32 %v2743_v2, %v2742_v4  ;;  %v2731_v54 = vadd.f32 %v5071_v52, %v2730_v57 }
 0x540   :  { %5074 = vtanh.f32 %v5632_v48  ;;  %v2735_v53 = vsel %vm2734_vm2, %v5071_v52, %v2731_v54 }
 0x541   :  { %v2740_v12 = vsel %vm2737_vm3, %v2739_v0, %v2735_v53 }
 0x546   :  { %v5075_v5 = vpop.eup %5074 }
 0x547   :  { %v2746_v7 = vmul.f32 %v5075_v5, %v2740_v12 }
 0x549   :  { %v2747_v41 = vpack.c.bf16 %v2746_v7, %v2746_v7 }
 0x54b   :  { %2749 = vst [vmem:[#allocation3 + $0x18] sm:$0xf] %v2747_v41  ;;  %2957 = vmatmul.bf16.vlgmr.msra.gmra.mxu0 %v2747_v41  ;;  %2970 = vmatmul.bf16.vlgmr.msra.gmra.mxu1 %v2747_v41 }
 0x54c   :  { %2983 = vmatmul.bf16.vlgmr.msrb.gmra.mxu2 %v2747_v41  ;;  %2996 = vmatmul.bf16.vlgmr.msrb.gmra.mxu3 %v2747_v41 }
 0x5c8   :  { %v2958_v9 = vpop.f32.mrf.mxu0  ;;  %v2971_v47 = vpop.f32.mrf.mxu1 }
 0x5c9   :  { %v3001_v11 = vadd.f32 %v2958_v9, %v380_v10  ;;  %v3002_v25 = vadd.f32 %v2971_v47, %v409_v8 }
 0x5cb   :  { %v4539_v15 = vmul.f32 -1.442695, %v3001_v11  ;;  %v4540_v32 = vmul.f32 -1.442695, %v3002_v25 }
 0x5cd   :  { %5076 = vpow2.f32 %v4539_v15 }
 0x5ce   :  { %5078 = vpow2.f32 %v4540_v32 }
 0x5cf   :  { %v2984_v34 = vpop.f32.mrf.mxu2  ;;  %v2997_v63 = vpop.f32.mrf.mxu3 }
 0x5d0   :  { %v3004_v16 = vadd.f32 %v2997_v63, %v5548_v1  ;;  %v2960_v56 = vpop.f32.mrf.mxu0  ;;  %v2973_v55 = vpop.f32.mrf.mxu1  ;;  %v3003_v27 = vadd.f32 %v2984_v34, %v5545_v58 }
 0x5d2   :  { %v4541_v45 = vmul.f32 -1.442695, %v3004_v16 }
 0x5d3   :  { %v5077_v6 = vpop.eup %5076 }
 0x5d4   :  { %v5079_v13 = vpop.eup %5078  ;;  %v3008_v35 = vadd.f32 1.0, %v5077_v6  ;;  %5080 = vpow2.f32 %v4541_v45 }
 0x5d5   :  { %v3027_v14 = vadd.f32 1.0, %v5079_v13 }
 0x5d6   :  { %5082 = vrcp.f32 %v3008_v35  ;;  %v3020_v62 = vand.u32 2147483648, %v3008_v35  ;;  %v3018_v46 = vand.u32 2147483647, %v3008_v35  ;;  %vm3014_vm6 = vweird.f32 %v3008_v35 }
 0x5d7   :  { %5084 = vrcp.f32 %v3027_v14  ;;  %v2986_v36 = vpop.f32.mrf.mxu2  ;;  %v2999_v18 = vpop.f32.mrf.mxu3  ;;  %v3039_v50 = vand.u32 2147483648, %v3027_v14  ;;  %v3037_v21 = vand.u32 2147483647, %v3027_v14  ;;  %vm3033_vm7 = vweird.f32 %v3027_v14 }
 0x5d8   :  { %v3021_v58 = vor.u32 1.1754944e-38, %v3020_v62  ;;  %vm3019_vm10 = vcmp.eq.f32.partialorder %v3018_v46, 8.507059e+37 }
 0x5d9   :  { %v3040_v37 = vor.u32 1.1754944e-38, %v3039_v50  ;;  %vm3038_vm11 = vcmp.eq.f32.partialorder %v3037_v21, 8.507059e+37 }
 0x5da   :  { %v5081_v20 = vpop.eup %5080 }
 0x5db   :  { %v3047_v17 = vadd.f32 1.0, %v5081_v20 }
 0x5dc   :  { %v5083_v19 = vpop.eup %5082 }
 0x5dd   :  { %v5085_v60 = vpop.eup %5084  ;;  %v3010_v29 = vmul.f32 %v5083_v19, %v3008_v35  ;;  %5086 = vrcp.f32 %v3047_v17  ;;  %vm3015_vm4 = vweird.f32 %v5083_v19  ;;  %v3059_v4 = vand.u32 2147483648, %v3047_v17 }
 0x5de   :  { %v3029_v1 = vmul.f32 %v5085_v60, %v3027_v14  ;;  %5088 = vtanh.f32 %v3003_v27  ;;  %vm3034_vm5 = vweird.f32 %v5085_v60  ;;  %vm3016_vm8 = vmor %vm3014_vm6, %vm3015_vm4  ;;  %vm3053_vm13 = vweird.f32 %v3047_v17 }
 0x5df   :  { %v3011_v42 = vsub.f32 1.0, %v3010_v29  ;;  %vm3035_vm9 = vmor %vm3033_vm7, %vm3034_vm5  ;;  %v3057_v57 = vand.u32 2147483647, %v3047_v17  ;;  %v3060_v59 = vor.u32 1.1754944e-38, %v3059_v4 }
 0x5e0   :  { %v3030_v26 = vsub.f32 1.0, %v3029_v1 }
 0x5e1   :  { %v3012_v33 = vmul.f32 %v5083_v19, %v3011_v42  ;;  %vm3058_vm15 = vcmp.eq.f32.partialorder %v3057_v57, 8.507059e+37 }
 0x5e2   :  { %v3031_v24 = vmul.f32 %v5085_v60, %v3030_v26 }
 0x5e3   :  { %v5087_v31 = vpop.eup %5086  ;;  %v3013_v22 = vadd.f32 %v5083_v19, %v3012_v33 }
 0x5e4   :  { %v3032_v39 = vadd.f32 %v5085_v60, %v3031_v24  ;;  %v3049_v52 = vmul.f32 %v5087_v31, %v3047_v17  ;;  %v5089_v28 = vpop.eup %5088  ;;  %vm3054_vm12 = vweird.f32 %v5087_v31 }
 0x5e5   :  { %v3017_v49 = vsel %vm3016_vm8, %v5083_v19, %v3013_v22  ;;  %vm3055_vm14 = vmor %vm3053_vm13, %vm3054_vm12 }
 0x5e6   :  { %v3022_v30 = vsel %vm3019_vm10, %v3021_v58, %v3017_v49  ;;  %v3036_v51 = vsel %vm3035_vm9, %v5085_v60, %v3032_v39  ;;  %v3050_v23 = vsub.f32 1.0, %v3049_v52 }
 0x5e7   :  { %v3041_v43 = vsel %vm3038_vm11, %v3040_v37, %v3036_v51  ;;  %v3064_v40 = vmul.f32 %v5089_v28, %v3022_v30 }
 0x5e8   :  { %v3063_v61 = vmul.f32 %v3041_v43, %v5632_v48  ;;  %v3051_v44 = vmul.f32 %v5087_v31, %v3050_v23 }
 0x5ea   :  { %v3065_v3 = vadd.f32 %v3064_v40, %v3063_v61  ;;  %v3052_v2 = vadd.f32 %v5087_v31, %v3051_v44 }
 0x5ec   :  { %5090 = vtanh.f32 %v3065_v3  ;;  %v3056_v54 = vsel %vm3055_vm14, %v5087_v31, %v3052_v2 }
 0x5ed   :  { %v3061_v53 = vsel %vm3058_vm15, %v3060_v59, %v3056_v54 }
 0x5f2   :  { %v5091_v38 = vpop.eup %5090 }
 0x5f3   :  { %v3067_v0 = vmul.f32 %v5091_v38, %v3061_v53 }
 0x5f5   :  { %v3068_v5 = vpack.c.bf16 %v3067_v0, %v3067_v0 }
 0x5f7   :  { %3070 = vst [vmem:[#allocation3 + $0x1c] sm:$0xf] %v3068_v5 }
 0x5f8   :  { %5314 = dma.done.wait [#allocation5], 2048 }
 0x5f9   :  { %5315 = vsyncadd [#allocation5], 4294965248  ;;  %3283 = vst [vmem:[#allocation16] sm:$0xff] %v3067_v0  ;;  %v4616_v48 = vld [vmem:[#allocation4 + $0x70] sm:$0xf]  ;;  %v4915_v51 = vld [vmem:[#allocation3] sm:$0xff] }
 0x5fa   :  { %3284 = vst [vmem:[#allocation18] sm:$0xff] %v3065_v3  ;;  %v4934_v12 = vld [vmem:[#allocation4 + $0x74] sm:$0xf0]  ;;  %v4933_v7 = vld [vmem:[#allocation4 + $0x74] sm:$0xf]  ;;  %v4916_v23 = vld [vmem:[#allocation3 + $0x8] sm:$0xff] }
 0x5fb   :  { %v4617_v41 = vor.u32 %v4934_v12, %v4616_v48  ;;  %v4618_v10 = vld [vmem:[#allocation4 + $0x78] sm:$0xf0]  ;;  %v4608_v8 = vld [vmem:[#allocation4 + $0x60] sm:$0xf]  ;;  %v4932_v9 = vld [vmem:[#allocation4 + $0x64] sm:$0xf0] }
 0x5fc   :  { %v4621_v47 = vor.u32 %v4933_v7, %v4618_v10  ;;  %v4931_v11 = vld [vmem:[#allocation4 + $0x64] sm:$0xf]  ;;  %v4610_v25 = vld [vmem:[#allocation4 + $0x68] sm:$0xf0]  ;;  %v4609_v15 = vor.u32 %v4932_v9, %v4608_v8  ;;  %v4600_v34 = vld [vmem:[#allocation4 + $0x50] sm:$0xf] }
 0x5fd   :  { %3209 = vmatpush.bf16.msrb.mxu0 %v4617_v41  ;;  %v4613_v32 = vor.u32 %v4931_v11, %v4610_v25  ;;  %v4930_v63 = vld [vmem:[#allocation4 + $0x54] sm:$0xf0]  ;;  %v4929_v16 = vld [vmem:[#allocation4 + $0x54] sm:$0xf]  ;;  %v4602_v56 = vld [vmem:[#allocation4 + $0x58] sm:$0xf0] }
 0x5fe   :  { %3238 = vmatpush.bf16.msrb.mxu1 %v4621_v47  ;;  %v4601_v55 = vor.u32 %v4930_v63, %v4600_v34  ;;  %v4605_v45 = vor.u32 %v4929_v16, %v4602_v56  ;;  %v4592_v6 = vld [vmem:[#allocation4 + $0x40] sm:$0xf]  ;;  %v4928_v13 = vld [vmem:[#allocation4 + $0x44] sm:$0xf0]  ;;  %v4927_v35 = vld [vmem:[#allocation4 + $0x44] sm:$0xf] }
 0x5ff   :  { %v4594_v14 = vld [vmem:[#allocation4 + $0x48] sm:$0xf0]  ;;  %v4593_v36 = vor.u32 %v4928_v13, %v4592_v6  ;;  %v4584_v20 = vld [vmem:[#allocation4 + $0x30] sm:$0xf]  ;;  %v4926_v17 = vld [vmem:[#allocation4 + $0x34] sm:$0xf0] }
 0x600   :  { %v4597_v18 = vor.u32 %v4927_v35, %v4594_v14  ;;  %v4925_v19 = vld [vmem:[#allocation4 + $0x34] sm:$0xf]  ;;  %v4586_v27 = vld [vmem:[#allocation4 + $0x38] sm:$0xf0]  ;;  %v4585_v60 = vor.u32 %v4926_v17, %v4584_v20  ;;  %v4576_v1 = vld [vmem:[#allocation4 + $0x20] sm:$0xf] }
 0x601   :  { %3210 = vmatpush.bf16.msrb.mxu0 %v4609_v15  ;;  %v4589_v29 = vor.u32 %v4925_v19, %v4586_v27  ;;  %v4924_v42 = vld [vmem:[#allocation4 + $0x24] sm:$0xf0]  ;;  %v4923_v26 = vld [vmem:[#allocation4 + $0x24] sm:$0xf]  ;;  %v4578_v62 = vld [vmem:[#allocation4 + $0x28] sm:$0xf0] }
 0x602   :  { %3239 = vmatpush.bf16.msrb.mxu1 %v4613_v32  ;;  %v4577_v50 = vor.u32 %v4924_v42, %v4576_v1  ;;  %v4581_v33 = vor.u32 %v4923_v26, %v4578_v62  ;;  %v4568_v46 = vld [vmem:[#allocation4 + $0x10] sm:$0xf]  ;;  %v4922_v24 = vld [vmem:[#allocation4 + $0x14] sm:$0xf0]  ;;  %v4921_v21 = vld [vmem:[#allocation4 + $0x14] sm:$0xf] }
 0x603   :  { %v4570_v31 = vld [vmem:[#allocation4 + $0x18] sm:$0xf0]  ;;  %v4569_v22 = vor.u32 %v4922_v24, %v4568_v46  ;;  %v4560_v39 = vld [vmem:[#allocation4] sm:$0xf]  ;;  %v4920_v52 = vld [vmem:[#allocation4 + $0x4] sm:$0xf0] }
 0x604   :  { %v4573_v58 = vor.u32 %v4921_v21, %v4570_v31  ;;  %v4919_v37 = vld [vmem:[#allocation4 + $0x4] sm:$0xf]  ;;  %v4562_v49 = vld [vmem:[#allocation4 + $0x8] sm:$0xf0]  ;;  %v4561_v28 = vor.u32 %v4920_v52, %v4560_v39  ;;  %v4917_v43 = vld [vmem:[#allocation3 + $0x10] sm:$0xff]  ;;  %s5330_s6 = smov [#allocation16]  }
 0x605   :  { %3211 = vmatpush.bf16.msrb.mxu0 %v4601_v55  ;;  %v4565_v30 = vor.u32 %v4919_v37, %v4562_v49  ;;  %v4918_v40 = vld [vmem:[#allocation3 + $0x18] sm:$0xff]  ;;  %s3303_s1 = sshll.u32 %s5330_s6, 4  ;;  %s3305_s27 = sshll.u32 %s5669_s9, 4  ;;  %v3099_v61 = vld [vmem:[%s5667_s7] sm:$0x3]  ;;  %s3304_s1 = int_to_ptr.vmem [resolvable:$true] %s3303_s1  ;;  %s3306_s27 = int_to_ptr.hbm [resolvable:$true] %s3305_s27 }
 0x606   :  { %3240 = vmatpush.bf16.msrb.mxu1 %v4605_v45  ;;  %3308 = dma.vmem_to_hbm [thread:$0]  %s3304_s1, 128, %s3306_s27, [#allocation17]   ;;  %v3101_v44 = vperm.slane %v3099_v61, 0  ;;  %v3102_v3 = vperm.slane %v3099_v61, 1 }
 0x607   :  { %s5331_s28 = smov [#allocation18]   ;;  %s3316_s11 = sshll.u32 %s5670_s10, 4  ;;  %s3317_s11 = int_to_ptr.hbm [resolvable:$true] %s3316_s11 }
 0x608   :  { %s3314_s3 = sshll.u32 %s5331_s28, 4  ;;  %s5332_s7 = smov [#allocation15]   ;;  %s3315_s3 = int_to_ptr.vmem [resolvable:$true] %s3314_s3 }
 0x609   :  { %3212 = vmatpush.bf16.msrb.mxu0 %v4593_v36  ;;  %3319 = dma.vmem_to_hbm [thread:$0]  %s3315_s3, 128, %s3317_s11, [#allocation17]  }
 0x60a   :  { %3241 = vmatpush.bf16.msrb.mxu1 %v4597_v18  ;;  %s3289_s9 = sshll.u32 %s5332_s7, 4  ;;  %s3291_s15 = sshll.u32 %s5668_s8, 4  ;;  %s3290_s9 = int_to_ptr.vmem [resolvable:$true] %s3289_s9  ;;  %s3292_s15 = int_to_ptr.hbm [resolvable:$true] %s3291_s15 }
 0x60d   :  { %3213 = vmatpush.bf16.msrb.mxu0 %v4585_v60 }
 0x60e   :  { %3242 = vmatpush.bf16.msrb.mxu1 %v4589_v29 }
 0x611   :  { %3214 = vmatpush.bf16.msrb.mxu0 %v4577_v50 }
 0x612   :  { %3243 = vmatpush.bf16.msrb.mxu1 %v4581_v33 }
 0x615   :  { %3215 = vmatpush.bf16.msrb.mxu0 %v4569_v22 }
 0x616   :  { %3244 = vmatpush.bf16.msrb.mxu1 %v4573_v58 }
 0x619   :  { %3216 = vmatpush.bf16.msrb.mxu0 %v4561_v28 }
 0x61a   :  { %3245 = vmatpush.bf16.msrb.mxu1 %v4565_v30 }
 0x61c   :  { %3217 = vmatmul.bf16.vlgmr.msrb.gmra.mxu0 %v4915_v51 }
 0x61d   :  { %3246 = vmatmul.bf16.vlgmr.msrb.gmra.mxu1 %v4915_v51 }
 0x62c   :  { %3222 = vmatmul.bf16.gmra.mxu0 %v4916_v23 }
 0x62d   :  { %3251 = vmatmul.bf16.gmra.mxu1 %v4916_v23 }
 0x63c   :  { %3227 = vmatmul.bf16.gmra.mxu0 %v4917_v43 }
 0x63d   :  { %3256 = vmatmul.bf16.gmra.mxu1 %v4917_v43 }
 0x64c   :  { %3232 = vmatmul.bf16.gmra.mxu0 %v4918_v40 }
 0x64d   :  { %3261 = vmatmul.bf16.gmra.mxu1 %v4918_v40 }
 0x699   :  { %v3218_v2 = vpop.f32.mrf.mxu0 }
 0x69a   :  { %v3219_v4 = vadd.f32 %v3218_v2, %v3101_v44  ;;  %v3247_v57 = vpop.f32.mrf.mxu1 }
 0x69b   :  { %v3248_v54 = vadd.f32 %v3247_v57, %v3102_v3 }
 0x69c   :  { %3267 = vst [vmem:[#allocation15] sm:$0xff] %v3219_v4 }
 0x69d   :  { %3268 = vst [vmem:[#allocation15 + $0x8] sm:$0xff] %v3248_v54 }
 0x6a1   :  { %v3220_v59 = vpop.f32.mrf.mxu0 }
 0x6a2   :  { %v3221_v38 = vadd.f32 %v3220_v59, %v3101_v44  ;;  %v3249_v53 = vpop.f32.mrf.mxu1 }
 0x6a3   :  { %v3250_v0 = vadd.f32 %v3249_v53, %v3102_v3 }
 0x6a4   :  { %3269 = vst [vmem:[#allocation15 + $0x10] sm:$0xff] %v3221_v38 }
 0x6a5   :  { %3270 = vst [vmem:[#allocation15 + $0x18] sm:$0xff] %v3250_v0 }
 0x6a9   :  { %v3223_v5 = vpop.f32.mrf.mxu0 }
 0x6aa   :  { %v3224_v48 = vadd.f32 %v3223_v5, %v3101_v44  ;;  %v3252_v12 = vpop.f32.mrf.mxu1 }
 0x6ab   :  { %v3253_v7 = vadd.f32 %v3252_v12, %v3102_v3 }
 0x6ac   :  { %3271 = vst [vmem:[#allocation15 + $0x20] sm:$0xff] %v3224_v48 }
 0x6ad   :  { %3272 = vst [vmem:[#allocation15 + $0x28] sm:$0xff] %v3253_v7 }
 0x6b1   :  { %v3225_v41 = vpop.f32.mrf.mxu0 }
 0x6b2   :  { %v3226_v10 = vadd.f32 %v3225_v41, %v3101_v44  ;;  %v3254_v8 = vpop.f32.mrf.mxu1 }
 0x6b3   :  { %v3255_v9 = vadd.f32 %v3254_v8, %v3102_v3 }
 0x6b4   :  { %3273 = vst [vmem:[#allocation15 + $0x30] sm:$0xff] %v3226_v10 }
 0x6b5   :  { %3274 = vst [vmem:[#allocation15 + $0x38] sm:$0xff] %v3255_v9 }
 0x6b9   :  { %v3228_v47 = vpop.f32.mrf.mxu0 }
 0x6ba   :  { %v3229_v11 = vadd.f32 %v3228_v47, %v3101_v44  ;;  %v3257_v25 = vpop.f32.mrf.mxu1 }
 0x6bb   :  { %v3258_v15 = vadd.f32 %v3257_v25, %v3102_v3 }
 0x6bc   :  { %3275 = vst [vmem:[#allocation15 + $0x40] sm:$0xff] %v3229_v11 }
 0x6bd   :  { %3276 = vst [vmem:[#allocation15 + $0x48] sm:$0xff] %v3258_v15 }
 0x6c1   :  { %v3230_v32 = vpop.f32.mrf.mxu0 }
 0x6c2   :  { %v3231_v34 = vadd.f32 %v3230_v32, %v3101_v44  ;;  %v3259_v63 = vpop.f32.mrf.mxu1 }
 0x6c3   :  { %v3260_v16 = vadd.f32 %v3259_v63, %v3102_v3 }
 0x6c4   :  { %3277 = vst [vmem:[#allocation15 + $0x50] sm:$0xff] %v3231_v34 }
 0x6c5   :  { %3278 = vst [vmem:[#allocation15 + $0x58] sm:$0xff] %v3260_v16 }
 0x6c9   :  { %v3233_v56 = vpop.f32.mrf.mxu0 }
 0x6ca   :  { %v3234_v55 = vadd.f32 %v3233_v56, %v3101_v44  ;;  %v3262_v45 = vpop.f32.mrf.mxu1 }
 0x6cb   :  { %v3263_v6 = vadd.f32 %v3262_v45, %v3102_v3 }
 0x6cc   :  { %3279 = vst [vmem:[#allocation15 + $0x60] sm:$0xff] %v3234_v55 }
 0x6cd   :  { %3280 = vst [vmem:[#allocation15 + $0x68] sm:$0xff] %v3263_v6 }
 0x6d1   :  { %v3235_v13 = vpop.f32.mrf.mxu0 }
 0x6d2   :  { %v3236_v35 = vadd.f32 %v3235_v13, %v3101_v44  ;;  %v3264_v14 = vpop.f32.mrf.mxu1 }
 0x6d3   :  { %v3265_v36 = vadd.f32 %v3264_v14, %v3102_v3 }
 0x6d4   :  { %3281 = vst [vmem:[#allocation15 + $0x70] sm:$0xff] %v3236_v35 }
 0x6d5   :  { %3282 = vst [vmem:[#allocation15 + $0x78] sm:$0xff] %v3265_v36 }
 0x6d6   :  { %3297 = dma.vmem_to_hbm [thread:$0]  %s3290_s9, 2048, %s3292_s15, [#allocation8], %s5322_s23, %s5322_s23, %s5323_s24  }
 0x6d7   :  { %5316 = dma.done.wait [#allocation8], 2048  }
 0x6d8   :  { %5317 = vsyncadd [#allocation8], 4294965248 }
 0x6d9   :  { %5318 = dma.done.wait [#allocation17], 256  }
 0x6da   :  { %5319 = vsyncadd [#allocation17], 4294967040 }
 0x6db   :  { %3332 = vsyncpa [#allocation7], 1 }
 0x6dc   :  { %3333 = vsyncpa [#allocation10], 1 }
 0x6dd   :  { %3334 = vsyncpa [#allocation13], 1 }
 0x6de   :  { %3335 = vsyncpa [#allocation8], 1 }
 0x6df   :  { %3336 = vsyncpa [#allocation17], 1 }
 0x6e0   :  { %3337 = vsyncmov [#allocation5] }
 0x6e3   :  { %s3338_s8 = vpop.sfrf %3337 }
 0x6e4   :  { %p4622_p0 = scmp.ne.s32.totalorder %s3338_s8, 0 }
 0x6e6   :  { %3342 = shalt.err (%p4622_p0)  }

</bundles_post_ra>
